<compile_context>
chip_gen: v5e
topology: v5e:2x2
jax: 0.10.0
libtpu: 0.0.40
codegen_flags: <defaults>
</compile_context>

<pallas_src>
import functools
import math

import jax
import jax.numpy as jnp
from jax.experimental import pallas as pl
from jax.experimental.pallas import tpu as pltpu

_BN_EPS = 1e-5


def _compute_vmem_limit():
    """Generation-aware scoped-VMEM limit: ~80% of physical per-core VMEM."""
    cap = None
    try:
        cap = getattr(pltpu.get_tpu_info(), "vmem_capacity_bytes", None)
    except Exception:
        cap = None
    if not cap:
        cap = 64 * 1024 * 1024      # conservative: v7x has 64 MiB per TensorCore
    return int(cap * 0.8)


_VMEM_LIMIT = _compute_vmem_limit()


def _cparams(dims):
    return pltpu.CompilerParams(dimension_semantics=dims,
                                vmem_limit_bytes=_VMEM_LIMIT)


def _pick_tile(dim, candidates):
    """Largest candidate that exactly divides dim, else the full extent
    (a full-extent block is always legal regardless of (8,128) tiling)."""
    for c in candidates:
        if c <= dim and dim % c == 0:
            return c
    return dim


# ----------------------------------------------------------------------------
# Pallas kernels
# ----------------------------------------------------------------------------
def _erf(x):
    # Abramowitz & Stegun 7.1.26 polynomial erf, |err| < 1.5e-7 — matches the
    # exact (erf-based) torch.nn.GELU() to f32 precision. VPU + one EUP exp.
    p = 0.3275911
    a1, a2, a3, a4, a5 = (0.254829592, -0.284496736, 1.421413741,
                          -1.453152027, 1.061405429)
    s = jnp.where(x >= 0.0, 1.0, -1.0)
    ax = jnp.abs(x)
    t = 1.0 / (1.0 + p * ax)
    poly = ((((a5 * t + a4) * t + a3) * t + a2) * t + a1) * t
    return s * (1.0 - poly * jnp.exp(-ax * ax))


def _gelu(x):
    return 0.5 * x * (1.0 + _erf(x * (1.0 / math.sqrt(2.0))))


def _mm_kernel(act, has_scale, has_res):
    """Tiled matmul with K-axis accumulation and a fused epilogue:
       o = act((x @ w) * scale + bias [+ res])."""
    def kernel(x_ref, w_ref, *rest):
        i = 0
        b_ref = rest[i]; i += 1
        s_ref = None
        if has_scale:
            s_ref = rest[i]; i += 1
        res_ref = None
        if has_res:
            res_ref = rest[i]; i += 1
        o_ref, acc_ref = rest[i], rest[i + 1]

        k = pl.program_id(2)

        @pl.when(k == 0)
        def _():
            acc_ref[...] = jnp.zeros_like(acc_ref)

        acc_ref[...] += jnp.dot(x_ref[...], w_ref[...],
                                preferred_element_type=jnp.float32)

        @pl.when(k == pl.num_programs(2) - 1)
        def _():
            y = acc_ref[...]
            if has_scale:
                y = y * s_ref[...]
            y = y + b_ref[...]
            if has_res:
                y = y + res_ref[...].astype(jnp.float32)
            if act == "relu":
                y = jnp.maximum(y, 0.0)
            elif act == "gelu":
                y = _gelu(y)
            o_ref[...] = y.astype(o_ref.dtype)

    return kernel


def matmul_scale_bias_act(x, w, bias, scale=None, res=None, act="none"):
    """o = act((x @ w) * scale + bias [+ res]); bf16 operands on the MXU,
    f32 accumulation + f32 epilogue, (M, N, K)-tiled grid."""
    m, kdim = x.shape
    n = w.shape[1]
    tm = _pick_tile(m, (256, 128, 64, 32, 16, 8))
    tn = _pick_tile(n, (512, 256, 128))
    tk = _pick_tile(kdim, (512, 256, 128))
    grid = (m // tm, n // tn, kdim // tk)

    in_specs = [
        pl.BlockSpec((tm, tk), lambda i, j, k: (i, k)),
        pl.BlockSpec((tk, tn), lambda i, j, k: (k, j)),
        pl.BlockSpec((1, tn), lambda i, j, k: (0, j)),      # bias: K-resident
    ]
    args = [x.astype(jnp.bfloat16), w.astype(jnp.bfloat16),
            bias.reshape(1, n).astype(jnp.float32)]
    if scale is not None:
        in_specs.append(pl.BlockSpec((1, tn), lambda i, j, k: (0, j)))
        args.append(scale.reshape(1, n).astype(jnp.float32))
    if res is not None:
        in_specs.append(pl.BlockSpec((tm, tn), lambda i, j, k: (i, j)))
        args.append(res)

    return pl.pallas_call(
        _mm_kernel(act, scale is not None, res is not None),
        out_shape=jax.ShapeDtypeStruct((m, n), jnp.float32),
        grid_spec=pltpu.PrefetchScalarGridSpec(
            num_scalar_prefetch=0,
            grid=grid,
            in_specs=in_specs,
            out_specs=pl.BlockSpec((tm, tn), lambda i, j, k: (i, j)),
            scratch_shapes=[pltpu.VMEM((tm, tn), jnp.float32)],
        ),
        compiler_params=_cparams(("parallel", "parallel", "arbitrary")),
    )(*args)


def _reduce_kernel(op, k):
    def kernel(x_ref, o_ref):
        x = x_ref[...].astype(jnp.float32)
        if op == "max":
            acc = jnp.max(x, axis=0)
        else:
            acc = jnp.sum(x, axis=0) * (1.0 / k)
        o_ref[...] = acc
    return kernel


def window_reduce(stacked, op):
    """stacked: (K, M, C) -> (M, C) max/mean over the window axis, tiled over M
    so only a (K, tm, C) slab is resident in VMEM at a time."""
    k, m, c = stacked.shape
    tm = _pick_tile(m, (512, 256, 128, 64, 32, 16, 8))
    return pl.pallas_call(
        _reduce_kernel(op, k),
        out_shape=jax.ShapeDtypeStruct((m, c), jnp.float32),
        grid_spec=pltpu.PrefetchScalarGridSpec(
            num_scalar_prefetch=0,
            grid=(m // tm,),
            in_specs=[pl.BlockSpec((k, tm, c), lambda i: (0, i, 0))],
            out_specs=pl.BlockSpec((tm, c), lambda i: (i, 0)),
        ),
        compiler_params=_cparams(("parallel",)),
    )(stacked)


def _head_kernel(hw):
    inv = 1.0 / hw

    def kernel(x_ref, w1_ref, b1_ref, w2_ref, b2_ref, o_ref):
        # global average pool fused with proj+GELU and out_layer+GELU
        feats = jnp.sum(x_ref[...].astype(jnp.float32), axis=0) * inv   # (tb, C)
        z = jnp.dot(feats.astype(jnp.bfloat16), w1_ref[...],
                    preferred_element_type=jnp.float32)
        z = _gelu(z + b1_ref[...])
        # TODO(synk): F.dropout is active only in training mode; identity here.
        y = jnp.dot(z.astype(jnp.bfloat16), w2_ref[...],
                    preferred_element_type=jnp.float32)
        o_ref[...] = _gelu(y + b2_ref[...])

    return kernel


# ----------------------------------------------------------------------------
# Glue: im2col / pooling window extraction (pure data rearrangement)
# ----------------------------------------------------------------------------
def _out_hw(h, w, k, stride, pad):
    return (h + 2 * pad - k) // stride + 1, (w + 2 * pad - k) // stride + 1


def _im2col(x, n, h, w, c, k, stride, pad):
    """x: (N*H*W, C) rows (NHWC order) -> (N*OH*OW, C*k*k) bf16 patch matrix."""
    oh, ow = _out_hw(h, w, k, stride, pad)
    x4 = x.reshape(n, h, w, c)
    if k == 1 and pad == 0:
        if stride != 1:
            x4 = x4[:, ::stride, ::stride, :]
        return x4.reshape(n * oh * ow, c).astype(jnp.bfloat16)
    xp = jnp.pad(x4, ((0, 0), (pad, pad), (pad, pad), (0, 0)))
    cols = []
    for di in range(k):
        for dj in range(k):
            cols.append(xp[:, di:di + stride * oh:stride,
                            dj:dj + stride * ow:stride, :])
    # feature order (c, di, dj) matches PyTorch OIHW weight flattening
    patches = jnp.stack(cols, axis=-1)               # (N, OH, OW, C, k*k)
    return patches.reshape(n * oh * ow, c * k * k).astype(jnp.bfloat16)


def conv_bn_act(x, w2d, bn, n, h, w, c_in, k, stride, pad, act, res=None):
    scale, bias = bn
    cols = _im2col(x, n, h, w, c_in, k, stride, pad)
    y = matmul_scale_bias_act(cols, w2d, bias, scale=scale, res=res, act=act)
    oh, ow = _out_hw(h, w, k, stride, pad)
    return y, oh, ow


def maxpool3x3_s2(x, n, h, w, c):
    oh, ow = _out_hw(h, w, 3, 2, 1)
    x4 = x.reshape(n, h, w, c)
    xp = jnp.pad(x4, ((0, 0), (1, 1), (1, 1), (0, 0)),
                 constant_values=-jnp.inf)
    cols = [xp[:, di:di + 2 * oh:2, dj:dj + 2 * ow:2, :]
            for di in range(3) for dj in range(3)]
    stacked = jnp.stack(cols, axis=0).reshape(9, n * oh * ow, c)
    return window_reduce(stacked, "max"), oh, ow


def avgpool2x2_s2(x, n, h, w, c):
    # All call sites here have even H/W, so the timm avg-down pool's
    # ceil_mode=True / count_include_pad=False are no-ops.
    assert h % 2 == 0 and w % 2 == 0
    oh, ow = h // 2, w // 2
    x4 = x.reshape(n, h, w, c)
    cols = [x4[:, di::2, dj::2, :] for di in range(2) for dj in range(2)]
    stacked = jnp.stack(cols, axis=0).reshape(4, n * oh * ow, c)
    return window_reduce(stacked, "mean"), oh, ow


# ----------------------------------------------------------------------------
# Deterministic parameter initialization (synthetic — no checkpoint load)
# ----------------------------------------------------------------------------
class _KeyGen:
    def __init__(self, key):
        self._key = key
        self._i = 0

    def __call__(self):
        self._i += 1
        return jax.random.fold_in(self._key, self._i)


def _init_conv(kg, c_in, c_out, k, gain):
    std = math.sqrt(gain / (c_in * k * k))
    w = std * jax.random.normal(kg(), (c_out, c_in, k, k), jnp.float32)  # OIHW
    return w.reshape(c_out, c_in * k * k).T.astype(jnp.bfloat16)  # (Cin*k*k, Cout)


def _init_bn(kg, c):
    gamma = 1.0 + 0.1 * jax.random.normal(kg(), (c,), jnp.float32)
    beta = 0.1 * jax.random.normal(kg(), (c,), jnp.float32)
    mean = 0.1 * jax.random.normal(kg(), (c,), jnp.float32)
    var = 1.0 + 0.1 * jax.random.uniform(kg(), (c,), jnp.float32)
    scale = gamma / jnp.sqrt(var + _BN_EPS)   # eval-mode BN folded to scale/bias
    bias = beta - mean * scale
    return scale, bias


def _init_linear(kg, d_in, d_out):
    bound = 1.0 / math.sqrt(d_in)
    w = jax.random.uniform(kg(), (d_out, d_in), jnp.float32, -bound, bound)
    b = jax.random.uniform(kg(), (d_out,), jnp.float32, -bound, bound)
    return w.T.astype(jnp.bfloat16), b               # (d_in, d_out), (d_out,)


_STAGE_BLOCKS = (3, 8, 36, 3)        # resnet152
_STAGE_PLANES = (64, 128, 256, 512)
_STAGE_STRIDES = (1, 2, 2, 2)
_EXPANSION = 4


def init_params(key, embed_dim, num_classes):
    kg = _KeyGen(key)
    params = {}
    # 'd' variant deep stem: 3x3/2 (3->32), 3x3 (32->32), 3x3 (32->64), BN+ReLU each
    params["stem"] = [
        (_init_conv(kg, 3, 32, 3, 2.0), _init_bn(kg, 32)),
        (_init_conv(kg, 32, 32, 3, 2.0), _init_bn(kg, 32)),
        (_init_conv(kg, 32, 64, 3, 2.0), _init_bn(kg, 64)),
    ]
    inplanes = 64
    layers = []
    for planes, nblocks, stride in zip(_STAGE_PLANES, _STAGE_BLOCKS, _STAGE_STRIDES):
        blocks = []
        for b in range(nblocks):
            s = stride if b == 0 else 1
            out = planes * _EXPANSION
            blk = {
                "conv1": _init_conv(kg, inplanes, planes, 1, 2.0),
                "bn1": _init_bn(kg, planes),
                "conv2": _init_conv(kg, planes, planes, 3, 2.0),
                "bn2": _init_bn(kg, planes),
                "conv3": _init_conv(kg, planes, out, 1, 1.0),
                "bn3": _init_bn(kg, out),
            }
            if b == 0 and (s != 1 or inplanes != out):
                # 'd' variant avg-down shortcut: AvgPool2d(2, s) -> 1x1 conv -> BN
                blk["ds_conv"] = _init_conv(kg, inplanes, out, 1, 1.0)
                blk["ds_bn"] = _init_bn(kg, out)
            blocks.append((blk, s))
            inplanes = out
        layers.append(blocks)
    params["layers"] = layers
    num_features = inplanes                           # 2048 (features.fc.in_features)
    params["proj"] = _init_linear(kg, num_features, embed_dim)
    params["out"] = _init_linear(kg, embed_dim, num_classes)
    return params, num_features


# ----------------------------------------------------------------------------
# Forward pass
# ----------------------------------------------------------------------------
@functools.partial(jax.jit, static_argnames=("n", "h", "wd"))
def _stem_and_pool(x, stem, n, h, wd):
    c = x.shape[1]
    for (w2d, bn), s in zip(stem, (2, 1, 1)):
        x, h, wd = conv_bn_act(x, w2d, bn, n, h, wd, c, 3, s, 1, "relu")
        c = w2d.shape[1]
    x, _, _ = maxpool3x3_s2(x, n, h, wd, c)
    return x


@functools.partial(jax.jit, static_argnames=("n", "h", "wd", "stride"))
def _bottleneck(x, blk, n, h, wd, stride):
    c_in = x.shape[1]
    planes = blk["bn1"][0].shape[0]
    # shortcut path ('d' variant: avg-down + 1x1 conv + BN when downsampling)
    if "ds_conv" in blk:
        shortcut, sh, sw = x, h, wd
        if stride != 1:
            shortcut, sh, sw = avgpool2x2_s2(shortcut, n, sh, sw, c_in)
        shortcut, _, _ = conv_bn_act(shortcut, blk["ds_conv"], blk["ds_bn"],
                                     n, sh, sw, c_in, 1, 1, 0, "none")
    else:
        shortcut = x
    y, h1, w1 = conv_bn_act(x, blk["conv1"], blk["bn1"], n, h, wd, c_in,
                            1, 1, 0, "relu")
    y, h2, w2 = conv_bn_act(y, blk["conv2"], blk["bn2"], n, h1, w1, planes,
                            3, stride, 1, "relu")
    # conv3 + BN, with the residual add + ReLU fused into the matmul epilogue
    y, _, _ = conv_bn_act(y, blk["conv3"], blk["bn3"], n, h2, w2, planes,
                          1, 1, 0, "relu", res=shortcut)
    return y


@functools.partial(jax.jit, static_argnames=("n", "hw"))
def _pool_and_head(x, proj, out, n, hw):
    c = x.shape[1]
    x3 = jnp.transpose(x.reshape(n, hw, c), (1, 0, 2))   # (HW, N, C)
    pw, pb = proj
    ow_, ob = out
    d_embed = pw.shape[1]
    n_cls = ow_.shape[1]
    tb = _pick_tile(n, (256, 128, 64, 32, 16, 8))
    return pl.pallas_call(
        _head_kernel(hw),
        out_shape=jax.ShapeDtypeStruct((n, n_cls), jnp.float32),
        grid_spec=pltpu.PrefetchScalarGridSpec(
            num_scalar_prefetch=0,
            grid=(n // tb,),
            in_specs=[
                pl.BlockSpec((hw, tb, c), lambda i: (0, i, 0)),
                pl.BlockSpec((c, d_embed), lambda i: (0, 0)),
                pl.BlockSpec((1, d_embed), lambda i: (0, 0)),
                pl.BlockSpec((d_embed, n_cls), lambda i: (0, 0)),
                pl.BlockSpec((1, n_cls), lambda i: (0, 0)),
            ],
            out_specs=pl.BlockSpec((tb, n_cls), lambda i: (i, 0)),
        ),
        compiler_params=_cparams(("parallel",)),
    )(x3, pw, pb.reshape(1, d_embed), ow_, ob.reshape(1, n_cls))


def resnet152d_forward(params, x_nchw):
    # TODO(synk): BatchNorm uses folded running statistics (eval semantics);
    # train-mode batch statistics are not implemented.
    n, c, h, wd = x_nchw.shape
    assert c == 3
    x = jnp.transpose(x_nchw, (0, 2, 3, 1)).reshape(n * h * wd, c)  # NHWC rows
    x = _stem_and_pool(x, params["stem"], n=n, h=h, wd=wd)
    h, wd = _out_hw(h, wd, 3, 2, 1)   # stem conv1 stride 2
    h, wd = _out_hw(h, wd, 3, 2, 1)   # maxpool 3x3/2
    for blocks in params["layers"]:
        for blk, stride in blocks:
            x = _bottleneck(x, blk, n=n, h=h, wd=wd, stride=stride)
            if stride != 1:
                h, wd = _out_hw(h, wd, 3, stride, 1)
    return _pool_and_head(x, params["proj"], params["out"], n=n, hw=h * wd)


if __name__ == "__main__":
    num_classes = 8
    embed_dim = 32
    key = jax.random.PRNGKey(0)
    pkey, xkey = jax.random.split(key)
    params, num_features = init_params(pkey, embed_dim, num_classes)
    x = jax.random.normal(xkey, (2, 3, 32, 32), jnp.float32)  # NCHW like PyTorch
    out = resnet152d_forward(params, x)
    out = jax.block_until_ready(out)
    assert out.shape == (2, num_classes)
    assert bool(jnp.all(jnp.isfinite(out)))
    print("KERNEL_OK")
</pallas_src>

<mosaic_0001>
module attributes {stable_mosaic.version = 11 : i64} {
  func.func @kernel(%arg0: i32, %arg1: i32, %arg2: i32, %arg3: memref<256x27xbf16, #tpu.memory_space<vmem>>, %arg4: memref<27x32xbf16, #tpu.memory_space<vmem>>, %arg5: memref<1x32xf32, #tpu.memory_space<vmem>>, %arg6: memref<1x32xf32, #tpu.memory_space<vmem>>, %arg7: memref<256x32xf32, #tpu.memory_space<vmem>>, %arg8: memref<256x32xf32, #tpu.memory_space<vmem>>) attributes {dimension_semantics = [#tpu.dimension_semantics<parallel>, #tpu.dimension_semantics<parallel>, #tpu.dimension_semantics<arbitrary>], iteration_bounds = array<i64: 2, 1, 1>, scalar_prefetch = 0 : i64, scratch_operands = 1 : i64, tpu.core_type = #tpu.core_type<tc>, window_params = [{transform_indices = @transform_0, window_bounds = array<i64: 256, 27>}, {transform_indices = @transform_1, window_bounds = array<i64: 27, 32>}, {transform_indices = @transform_2, window_bounds = array<i64: 1, 32>}, {transform_indices = @transform_3, window_bounds = array<i64: 1, 32>}, {transform_indices = @transform_4, window_bounds = array<i64: 256, 32>}]} {
    %c0_i32 = arith.constant 0 : i32
    %0 = arith.cmpi eq, %arg2, %c0_i32 : i32
    %1 = arith.extui %0 : i1 to i32
    %c0_i32_0 = arith.constant 0 : i32
    %2 = arith.cmpi ne, %1, %c0_i32_0 : i32
    scf.if %2 {
      %cst_10 = arith.constant 0.000000e+00 : f32
      %12 = vector.broadcast %cst_10 : f32 to vector<256x32xf32>
      %c0_11 = arith.constant 0 : index
      %c0_12 = arith.constant 0 : index
      %13 = vector.load %arg8[%c0_11, %c0_12] : memref<256x32xf32, #tpu.memory_space<vmem>>, vector<256x32xf32>
      tpu.vector_store %arg8[%c0_11, %c0_12], %12 {strides = array<i32>} : memref<256x32xf32, #tpu.memory_space<vmem>>, vector<256x32xf32>,
    } else {
    }
    %c0 = arith.constant 0 : index
    %c0_1 = arith.constant 0 : index
    %3 = vector.load %arg8[%c0, %c0_1] : memref<256x32xf32, #tpu.memory_space<vmem>>, vector<256x32xf32>
    %c0_2 = arith.constant 0 : index
    %c0_3 = arith.constant 0 : index
    %4 = vector.load %arg3[%c0_2, %c0_3] : memref<256x27xbf16, #tpu.memory_space<vmem>>, vector<256x27xbf16>
    %c0_4 = arith.constant 0 : index
    %c0_5 = arith.constant 0 : index
    %5 = vector.load %arg4[%c0_4, %c0_5] : memref<27x32xbf16, #tpu.memory_space<vmem>>, vector<27x32xbf16>
    %cst = arith.constant dense<0.000000e+00> : vector<256x32xf32>
    %6 = tpu.matmul %4, %5, %cst {dimension_numbers = #tpu.dot_dimension_numbers<[1], [0], [0], [1], [0, 0, 1, 1], [], []>} : vector<256x27xbf16>, vector<27x32xbf16>, vector<256x32xf32> -> vector<256x32xf32>
    %7 = arith.addf %3, %6 : vector<256x32xf32>
    %c0_6 = arith.constant 0 : index
    %c0_7 = arith.constant 0 : index
    %8 = vector.load %arg8[%c0_6, %c0_7] : memref<256x32xf32, #tpu.memory_space<vmem>>, vector<256x32xf32>
    tpu.vector_store %arg8[%c0_6, %c0_7], %7 {strides = array<i32>} : memref<256x32xf32, #tpu.memory_space<vmem>>, vector<256x32xf32>,
    %c0_i32_8 = arith.constant 0 : i32
    %9 = arith.cmpi eq, %arg2, %c0_i32_8 : i32
    %10 = arith.extui %9 : i1 to i32
    %c0_i32_9 = arith.constant 0 : i32
    %11 = arith.cmpi ne, %10, %c0_i32_9 : i32
    scf.if %11 {
      %c0_10 = arith.constant 0 : index
      %c0_11 = arith.constant 0 : index
      %12 = vector.load %arg8[%c0_10, %c0_11] : memref<256x32xf32, #tpu.memory_space<vmem>>, vector<256x32xf32>
      %c0_12 = arith.constant 0 : index
      %c0_13 = arith.constant 0 : index
      %13 = vector.load %arg6[%c0_12, %c0_13] : memref<1x32xf32, #tpu.memory_space<vmem>>, vector<1x32xf32>
      %14 = vector.broadcast %13 : vector<1x32xf32> to vector<256x32xf32>
      %15 = arith.mulf %12, %14 : vector<256x32xf32>
      %c0_14 = arith.constant 0 : index
      %c0_15 = arith.constant 0 : index
      %16 = vector.load %arg5[%c0_14, %c0_15] : memref<1x32xf32, #tpu.memory_space<vmem>>, vector<1x32xf32>
      %17 = vector.broadcast %16 : vector<1x32xf32> to vector<256x32xf32>
      %18 = arith.addf %15, %17 : vector<256x32xf32>
      %cst_16 = arith.constant 0.000000e+00 : f32
      %19 = vector.broadcast %cst_16 : f32 to vector<256x32xf32>
      %20 = arith.maximumf %18, %19 : vector<256x32xf32>
      %c0_17 = arith.constant 0 : index
      %c0_18 = arith.constant 0 : index
      %21 = vector.load %arg7[%c0_17, %c0_18] : memref<256x32xf32, #tpu.memory_space<vmem>>, vector<256x32xf32>
      tpu.vector_store %arg7[%c0_17, %c0_18], %20 {strides = array<i32>} : memref<256x32xf32, #tpu.memory_space<vmem>>, vector<256x32xf32>,
    } else {
    }
    return
  }
  func.func @transform_0(%arg0: i32, %arg1: i32, %arg2: i32) -> (i32, i32) {
    %c0_i32 = arith.constant 0 : i32
    return %arg0, %arg2 : i32, i32
  }
  func.func @transform_1(%arg0: i32, %arg1: i32, %arg2: i32) -> (i32, i32) {
    %c0_i32 = arith.constant 0 : i32
    return %arg2, %arg1 : i32, i32
  }
  func.func @transform_2(%arg0: i32, %arg1: i32, %arg2: i32) -> (i32, i32) {
    %c0_i32 = arith.constant 0 : i32
    %c0_i32_0 = arith.constant 0 : i32
    return %c0_i32, %arg1 : i32, i32
  }
  func.func @transform_3(%arg0: i32, %arg1: i32, %arg2: i32) -> (i32, i32) {
    %c0_i32 = arith.constant 0 : i32
    %c0_i32_0 = arith.constant 0 : i32
    return %c0_i32, %arg1 : i32, i32
  }
  func.func @transform_4(%arg0: i32, %arg1: i32, %arg2: i32) -> (i32, i32) {
    %c0_i32 = arith.constant 0 : i32
    return %arg0, %arg1 : i32, i32
  }
}

module attributes {stable_mosaic.version = 11 : i64} {
  func.func @kernel(%arg0: i32, %arg1: i32, %arg2: i32, %arg3: memref<256x288xbf16, #tpu.memory_space<vmem>>, %arg4: memref<288x32xbf16, #tpu.memory_space<vmem>>, %arg5: memref<1x32xf32, #tpu.memory_space<vmem>>, %arg6: memref<1x32xf32, #tpu.memory_space<vmem>>, %arg7: memref<256x32xf32, #tpu.memory_space<vmem>>, %arg8: memref<256x32xf32, #tpu.memory_space<vmem>>) attributes {dimension_semantics = [#tpu.dimension_semantics<parallel>, #tpu.dimension_semantics<parallel>, #tpu.dimension_semantics<arbitrary>], iteration_bounds = array<i64: 2, 1, 1>, scalar_prefetch = 0 : i64, scratch_operands = 1 : i64, tpu.core_type = #tpu.core_type<tc>, window_params = [{transform_indices = @transform_0, window_bounds = array<i64: 256, 288>}, {transform_indices = @transform_1, window_bounds = array<i64: 288, 32>}, {transform_indices = @transform_2, window_bounds = array<i64: 1, 32>}, {transform_indices = @transform_3, window_bounds = array<i64: 1, 32>}, {transform_indices = @transform_4, window_bounds = array<i64: 256, 32>}]} {
    %c0_i32 = arith.constant 0 : i32
    %0 = arith.cmpi eq, %arg2, %c0_i32 : i32
    %1 = arith.extui %0 : i1 to i32
    %c0_i32_0 = arith.constant 0 : i32
    %2 = arith.cmpi ne, %1, %c0_i32_0 : i32
    scf.if %2 {
      %cst_10 = arith.constant 0.000000e+00 : f32
      %12 = vector.broadcast %cst_10 : f32 to vector<256x32xf32>
      %c0_11 = arith.constant 0 : index
      %c0_12 = arith.constant 0 : index
      %13 = vector.load %arg8[%c0_11, %c0_12] : memref<256x32xf32, #tpu.memory_space<vmem>>, vector<256x32xf32>
      tpu.vector_store %arg8[%c0_11, %c0_12], %12 {strides = array<i32>} : memref<256x32xf32, #tpu.memory_space<vmem>>, vector<256x32xf32>,
    } else {
    }
    %c0 = arith.constant 0 : index
    %c0_1 = arith.constant 0 : index
    %3 = vector.load %arg8[%c0, %c0_1] : memref<256x32xf32, #tpu.memory_space<vmem>>, vector<256x32xf32>
    %c0_2 = arith.constant 0 : index
    %c0_3 = arith.constant 0 : index
    %4 = vector.load %arg3[%c0_2, %c0_3] : memref<256x288xbf16, #tpu.memory_space<vmem>>, vector<256x288xbf16>
    %c0_4 = arith.constant 0 : index
    %c0_5 = arith.constant 0 : index
    %5 = vector.load %arg4[%c0_4, %c0_5] : memref<288x32xbf16, #tpu.memory_space<vmem>>, vector<288x32xbf16>
    %cst = arith.constant dense<0.000000e+00> : vector<256x32xf32>
    %6 = tpu.matmul %4, %5, %cst {dimension_numbers = #tpu.dot_dimension_numbers<[1], [0], [0], [1], [0, 0, 1, 1], [], []>} : vector<256x288xbf16>, vector<288x32xbf16>, vector<256x32xf32> -> vector<256x32xf32>
    %7 = arith.addf %3, %6 : vector<256x32xf32>
    %c0_6 = arith.constant 0 : index
    %c0_7 = arith.constant 0 : index
    %8 = vector.load %arg8[%c0_6, %c0_7] : memref<256x32xf32, #tpu.memory_space<vmem>>, vector<256x32xf32>
    tpu.vector_store %arg8[%c0_6, %c0_7], %7 {strides = array<i32>} : memref<256x32xf32, #tpu.memory_space<vmem>>, vector<256x32xf32>,
    %c0_i32_8 = arith.constant 0 : i32
    %9 = arith.cmpi eq, %arg2, %c0_i32_8 : i32
    %10 = arith.extui %9 : i1 to i32
    %c0_i32_9 = arith.constant 0 : i32
    %11 = arith.cmpi ne, %10, %c0_i32_9 : i32
    scf.if %11 {
      %c0_10 = arith.constant 0 : index
      %c0_11 = arith.constant 0 : index
      %12 = vector.load %arg8[%c0_10, %c0_11] : memref<256x32xf32, #tpu.memory_space<vmem>>, vector<256x32xf32>
      %c0_12 = arith.constant 0 : index
      %c0_13 = arith.constant 0 : index
      %13 = vector.load %arg6[%c0_12, %c0_13] : memref<1x32xf32, #tpu.memory_space<vmem>>, vector<1x32xf32>
      %14 = vector.broadcast %13 : vector<1x32xf32> to vector<256x32xf32>
      %15 = arith.mulf %12, %14 : vector<256x32xf32>
      %c0_14 = arith.constant 0 : index
      %c0_15 = arith.constant 0 : index
      %16 = vector.load %arg5[%c0_14, %c0_15] : memref<1x32xf32, #tpu.memory_space<vmem>>, vector<1x32xf32>
      %17 = vector.broadcast %16 : vector<1x32xf32> to vector<256x32xf32>
      %18 = arith.addf %15, %17 : vector<256x32xf32>
      %cst_16 = arith.constant 0.000000e+00 : f32
      %19 = vector.broadcast %cst_16 : f32 to vector<256x32xf32>
      %20 = arith.maximumf %18, %19 : vector<256x32xf32>
      %c0_17 = arith.constant 0 : index
      %c0_18 = arith.constant 0 : index
      %21 = vector.load %arg7[%c0_17, %c0_18] : memref<256x32xf32, #tpu.memory_space<vmem>>, vector<256x32xf32>
      tpu.vector_store %arg7[%c0_17, %c0_18], %20 {strides = array<i32>} : memref<256x32xf32, #tpu.memory_space<vmem>>, vector<256x32xf32>,
    } else {
    }
    return
  }
  func.func @transform_0(%arg0: i32, %arg1: i32, %arg2: i32) -> (i32, i32) {
    %c0_i32 = arith.constant 0 : i32
    return %arg0, %arg2 : i32, i32
  }
  func.func @transform_1(%arg0: i32, %arg1: i32, %arg2: i32) -> (i32, i32) {
    %c0_i32 = arith.constant 0 : i32
    return %arg2, %arg1 : i32, i32
  }
  func.func @transform_2(%arg0: i32, %arg1: i32, %arg2: i32) -> (i32, i32) {
    %c0_i32 = arith.constant 0 : i32
    %c0_i32_0 = arith.constant 0 : i32
    return %c0_i32, %arg1 : i32, i32
  }
  func.func @transform_3(%arg0: i32, %arg1: i32, %arg2: i32) -> (i32, i32) {
    %c0_i32 = arith.constant 0 : i32
    %c0_i32_0 = arith.constant 0 : i32
    return %c0_i32, %arg1 : i32, i32
  }
  func.func @transform_4(%arg0: i32, %arg1: i32, %arg2: i32) -> (i32, i32) {
    %c0_i32 = arith.constant 0 : i32
    return %arg0, %arg1 : i32, i32
  }
}

module attributes {stable_mosaic.version = 11 : i64} {
  func.func @kernel(%arg0: i32, %arg1: i32, %arg2: i32, %arg3: memref<256x288xbf16, #tpu.memory_space<vmem>>, %arg4: memref<288x64xbf16, #tpu.memory_space<vmem>>, %arg5: memref<1x64xf32, #tpu.memory_space<vmem>>, %arg6: memref<1x64xf32, #tpu.memory_space<vmem>>, %arg7: memref<256x64xf32, #tpu.memory_space<vmem>>, %arg8: memref<256x64xf32, #tpu.memory_space<vmem>>) attributes {dimension_semantics = [#tpu.dimension_semantics<parallel>, #tpu.dimension_semantics<parallel>, #tpu.dimension_semantics<arbitrary>], iteration_bounds = array<i64: 2, 1, 1>, scalar_prefetch = 0 : i64, scratch_operands = 1 : i64, tpu.core_type = #tpu.core_type<tc>, window_params = [{transform_indices = @transform_0, window_bounds = array<i64: 256, 288>}, {transform_indices = @transform_1, window_bounds = array<i64: 288, 64>}, {transform_indices = @transform_2, window_bounds = array<i64: 1, 64>}, {transform_indices = @transform_3, window_bounds = array<i64: 1, 64>}, {transform_indices = @transform_4, window_bounds = array<i64: 256, 64>}]} {
    %c0_i32 = arith.constant 0 : i32
    %0 = arith.cmpi eq, %arg2, %c0_i32 : i32
    %1 = arith.extui %0 : i1 to i32
    %c0_i32_0 = arith.constant 0 : i32
    %2 = arith.cmpi ne, %1, %c0_i32_0 : i32
    scf.if %2 {
      %cst_10 = arith.constant 0.000000e+00 : f32
      %12 = vector.broadcast %cst_10 : f32 to vector<256x64xf32>
      %c0_11 = arith.constant 0 : index
      %c0_12 = arith.constant 0 : index
      %13 = vector.load %arg8[%c0_11, %c0_12] : memref<256x64xf32, #tpu.memory_space<vmem>>, vector<256x64xf32>
      tpu.vector_store %arg8[%c0_11, %c0_12], %12 {strides = array<i32>} : memref<256x64xf32, #tpu.memory_space<vmem>>, vector<256x64xf32>,
    } else {
    }
    %c0 = arith.constant 0 : index
    %c0_1 = arith.constant 0 : index
    %3 = vector.load %arg8[%c0, %c0_1] : memref<256x64xf32, #tpu.memory_space<vmem>>, vector<256x64xf32>
    %c0_2 = arith.constant 0 : index
    %c0_3 = arith.constant 0 : index
    %4 = vector.load %arg3[%c0_2, %c0_3] : memref<256x288xbf16, #tpu.memory_space<vmem>>, vector<256x288xbf16>
    %c0_4 = arith.constant 0 : index
    %c0_5 = arith.constant 0 : index
    %5 = vector.load %arg4[%c0_4, %c0_5] : memref<288x64xbf16, #tpu.memory_space<vmem>>, vector<288x64xbf16>
    %cst = arith.constant dense<0.000000e+00> : vector<256x64xf32>
    %6 = tpu.matmul %4, %5, %cst {dimension_numbers = #tpu.dot_dimension_numbers<[1], [0], [0], [1], [0, 0, 1, 1], [], []>} : vector<256x288xbf16>, vector<288x64xbf16>, vector<256x64xf32> -> vector<256x64xf32>
    %7 = arith.addf %3, %6 : vector<256x64xf32>
    %c0_6 = arith.constant 0 : index
    %c0_7 = arith.constant 0 : index
    %8 = vector.load %arg8[%c0_6, %c0_7] : memref<256x64xf32, #tpu.memory_space<vmem>>, vector<256x64xf32>
    tpu.vector_store %arg8[%c0_6, %c0_7], %7 {strides = array<i32>} : memref<256x64xf32, #tpu.memory_space<vmem>>, vector<256x64xf32>,
    %c0_i32_8 = arith.constant 0 : i32
    %9 = arith.cmpi eq, %arg2, %c0_i32_8 : i32
    %10 = arith.extui %9 : i1 to i32
    %c0_i32_9 = arith.constant 0 : i32
    %11 = arith.cmpi ne, %10, %c0_i32_9 : i32
    scf.if %11 {
      %c0_10 = arith.constant 0 : index
      %c0_11 = arith.constant 0 : index
      %12 = vector.load %arg8[%c0_10, %c0_11] : memref<256x64xf32, #tpu.memory_space<vmem>>, vector<256x64xf32>
      %c0_12 = arith.constant 0 : index
      %c0_13 = arith.constant 0 : index
      %13 = vector.load %arg6[%c0_12, %c0_13] : memref<1x64xf32, #tpu.memory_space<vmem>>, vector<1x64xf32>
      %14 = vector.broadcast %13 : vector<1x64xf32> to vector<256x64xf32>
      %15 = arith.mulf %12, %14 : vector<256x64xf32>
      %c0_14 = arith.constant 0 : index
      %c0_15 = arith.constant 0 : index
      %16 = vector.load %arg5[%c0_14, %c0_15] : memref<1x64xf32, #tpu.memory_space<vmem>>, vector<1x64xf32>
      %17 = vector.broadcast %16 : vector<1x64xf32> to vector<256x64xf32>
      %18 = arith.addf %15, %17 : vector<256x64xf32>
      %cst_16 = arith.constant 0.000000e+00 : f32
      %19 = vector.broadcast %cst_16 : f32 to vector<256x64xf32>
      %20 = arith.maximumf %18, %19 : vector<256x64xf32>
      %c0_17 = arith.constant 0 : index
      %c0_18 = arith.constant 0 : index
      %21 = vector.load %arg7[%c0_17, %c0_18] : memref<256x64xf32, #tpu.memory_space<vmem>>, vector<256x64xf32>
      tpu.vector_store %arg7[%c0_17, %c0_18], %20 {strides = array<i32>} : memref<256x64xf32, #tpu.memory_space<vmem>>, vector<256x64xf32>,
    } else {
    }
    return
  }
  func.func @transform_0(%arg0: i32, %arg1: i32, %arg2: i32) -> (i32, i32) {
    %c0_i32 = arith.constant 0 : i32
    return %arg0, %arg2 : i32, i32
  }
  func.func @transform_1(%arg0: i32, %arg1: i32, %arg2: i32) -> (i32, i32) {
    %c0_i32 = arith.constant 0 : i32
    return %arg2, %arg1 : i32, i32
  }
  func.func @transform_2(%arg0: i32, %arg1: i32, %arg2: i32) -> (i32, i32) {
    %c0_i32 = arith.constant 0 : i32
    %c0_i32_0 = arith.constant 0 : i32
    return %c0_i32, %arg1 : i32, i32
  }
  func.func @transform_3(%arg0: i32, %arg1: i32, %arg2: i32) -> (i32, i32) {
    %c0_i32 = arith.constant 0 : i32
    %c0_i32_0 = arith.constant 0 : i32
    return %c0_i32, %arg1 : i32, i32
  }
  func.func @transform_4(%arg0: i32, %arg1: i32, %arg2: i32) -> (i32, i32) {
    %c0_i32 = arith.constant 0 : i32
    return %arg0, %arg1 : i32, i32
  }
}

module attributes {stable_mosaic.version = 11 : i64} {
  func.func @kernel(%arg0: i32, %arg1: memref<9x128x64xf32, #tpu.memory_space<vmem>>, %arg2: memref<128x64xf32, #tpu.memory_space<vmem>>) attributes {dimension_semantics = [#tpu.dimension_semantics<parallel>], iteration_bounds = array<i64: 1>, scalar_prefetch = 0 : i64, scratch_operands = 0 : i64, tpu.core_type = #tpu.core_type<tc>, window_params = [{transform_indices = @transform_0, window_bounds = array<i64: 9, 128, 64>}, {transform_indices = @transform_1, window_bounds = array<i64: 128, 64>}]} {
    %c0 = arith.constant 0 : index
    %c0_0 = arith.constant 0 : index
    %c0_1 = arith.constant 0 : index
    %0 = vector.load %arg1[%c0, %c0_0, %c0_1] : memref<9x128x64xf32, #tpu.memory_space<vmem>>, vector<9x128x64xf32>
    %cst = arith.constant dense<0xFF800000> : vector<128x64xf32>
    %1 = vector.multi_reduction <maximumf>, %0, %cst [0] : vector<9x128x64xf32> to vector<128x64xf32>
    %c0_2 = arith.constant 0 : index
    %c0_3 = arith.constant 0 : index
    %2 = vector.load %arg2[%c0_2, %c0_3] : memref<128x64xf32, #tpu.memory_space<vmem>>, vector<128x64xf32>
    tpu.vector_store %arg2[%c0_2, %c0_3], %1 {strides = array<i32>} : memref<128x64xf32, #tpu.memory_space<vmem>>, vector<128x64xf32>,
    return
  }
  func.func @transform_0(%arg0: i32) -> (i32, i32, i32) {
    %c0_i32 = arith.constant 0 : i32
    %c0_i32_0 = arith.constant 0 : i32
    %c0_i32_1 = arith.constant 0 : i32
    return %c0_i32, %arg0, %c0_i32_0 : i32, i32, i32
  }
  func.func @transform_1(%arg0: i32) -> (i32, i32) {
    %c0_i32 = arith.constant 0 : i32
    %c0_i32_0 = arith.constant 0 : i32
    return %arg0, %c0_i32 : i32, i32
  }
}

</mosaic_0001>

<bundles_post_ra>
// kernel: _stem_and_pool.4
= control target key start
LH: loop header
LB: loop body
LE: loop exit
PB: predicated region body
PF: predicated region fallthrough
CT: control target
= control target key end

     0   :  { %s1206_s15 = smov 0   ;;  %s1208_s16 = smov 0   ;;  %s1490_s0 = inlined_call_operand.vmem [shape: bf16[512,27], index: 0, kind: input, shape index: {}]   ;;  %s1491_s1 = inlined_call_operand.vmem [shape: bf16[27,32], index: 1, kind: input, shape index: {}]   ;;  %s1492_s2 = inlined_call_operand.vmem [shape: f32[1,32], index: 2, kind: input, shape index: {}]   ;;  %s1493_s3 = inlined_call_operand.vmem [shape: f32[1,32], index: 3, kind: input, shape index: {}]   ;;  %s1494_s4 = inlined_call_operand.vmem [shape: f32[512,32], index: 4, kind: output, shape index: {}]  }
   0x1   :  { %s1210_s17 = smov 0  }
   0x2 LB: > { %s33_s18 = sadd.s32 1, %s1173_s16  ;;  %p1008_p0 = scmp.ge.s32.totalorder %s1177_s17, 1  ;;  %s1177_s17 = sphi %s1210_s17, %s14_s17   ;;  %s1173_s16 = sphi %s1208_s16, %s1496_s16   ;;  %s1169_s15 = sphi %s1206_s15, %s1495_s15  }
   0x3   : > { %p35_p1 = scmp.ge.s32.totalorder %s33_s18, 2  ;;  %p221_p2 = scmp.lt.s32.totalorder %s1177_s17, 3 }
   0x5   : > { %s1498_s18 = smov (%p35_p1, %s33_s18), 0  ;;  %p222_p3 = pnand %p1008_p0, %p221_p2 }
   0x6   : > { %s1009_s23 = sshll.u32 (!%p222_p3), %s1169_s15, 5 }
   0x7   : > { %225 = sbr.rel (%p222_p3) target bundleno = 233 (0xe9), region = 36  ;;  %p268_p4 = scmp.lt.s32.totalorder (!%p222_p3), %s1009_s23, 63 }
   0xc   : > { %v1083_v0 = vld [vmem:[%s1491_s1 + $0x8] sm:$0xf]  ;;  %v1120_v1 = vld [vmem:[%s1491_s1 + $0x8] sm:$0x30]  ;;  %vm546_vm0 = vcmask 1044480   ;;  %vm547_vm1 = vcmask 1045504  }
   0xd   : > { %v1084_v2 = vor.u32 %v1120_v1, %v1083_v0  ;;  %v1179_v3 = vmov 65535   ;;  %s1500_s23 = smov (!%p268_p4, %s1009_s23), 63  ;;  %v1119_v7 = vld [vmem:[%s1491_s1] sm:$0xff]  ;;  %vm497_vm2 = vcmask 220160   ;;  %vm305_vm3 = vcmask 261120  }
   0xe   : > { %v548_v4 = vsel %vm546_vm0, 4294967295, %v1179_v3  ;;  %s1010_s26 = sshll.u32 %s1500_s23, 2  ;;  %v1180_v16 = vmov 0.0   ;;  %v1310_v35 = vld [vmem:[%s1493_s3] ss:$0 sm:$0xff]  ;;  %s1012_s8 = sshll.u32 %s1500_s23, 3 }
   0xf   : > { %v549_v5 = vsel %vm547_vm1, %v548_v4, 0  ;;  %s1239_s29 = scalar_lea.vmem %s1490_s0, %s1010_s26  ;;  %306 = vst.msk [vmem:[#allocation2] sm:$0xff] %vm305_vm3, %v1180_v16  ;;  %v1315_v42 = vld [vmem:[%s1492_s2] ss:$0 sm:$0xff]  ;;  %s1328_s11 = scalar_lea.vmem %s1494_s4, %s1012_s8 }
  0x10   : > { %v551_v6 = vand.u32 %v1084_v2, %v549_v5  ;;  %v1103_v8 = vld [vmem:[%s1239_s29] sm:$0xff]  ;;  %v1104_v12 = vld [vmem:[%s1239_s29 + $0x8] sm:$0xff]  ;;  %307 = vst.msk [vmem:[#allocation2 + $0x8] sm:$0xff] %vm305_vm3, %v1180_v16  ;;  %v1105_v17 = vld [vmem:[%s1239_s29 + $0x10] sm:$0xff] }
  0x11   : > { %v1107_v9 = vld [vmem:[%s1239_s29 + $0x20] sm:$0xff]  ;;  %v1108_v13 = vld [vmem:[%s1239_s29 + $0x28] sm:$0xff]  ;;  %308 = vst.msk [vmem:[#allocation2 + $0x10] sm:$0xff] %vm305_vm3, %v1180_v16  ;;  %v1109_v18 = vld [vmem:[%s1239_s29 + $0x30] sm:$0xff] }
  0x12   : > { %559 = vmatpush.bf16.msra.mxu0 %v551_v6  ;;  %1121 = vmatpush.bf16.msra.mxu1 %v551_v6  ;;  %v1111_v10 = vld [vmem:[%s1239_s29 + $0x40] sm:$0xff]  ;;  %v1112_v14 = vld [vmem:[%s1239_s29 + $0x48] sm:$0xff]  ;;  %309 = vst.msk [vmem:[#allocation2 + $0x18] sm:$0xff] %vm305_vm3, %v1180_v16  ;;  %v1113_v19 = vld [vmem:[%s1239_s29 + $0x50] sm:$0xff] }
  0x13   : > { %1122 = vmatpush.bf16.msra.mxu2 %v551_v6  ;;  %1123 = vmatpush.bf16.msra.mxu3 %v551_v6  ;;  %v1115_v11 = vld [vmem:[%s1239_s29 + $0x60] sm:$0xff]  ;;  %v1116_v15 = vld [vmem:[%s1239_s29 + $0x68] sm:$0xff]  ;;  %310 = vst.msk [vmem:[#allocation2 + $0x20] sm:$0xff] %vm305_vm3, %v1180_v16  ;;  %v1117_v20 = vld [vmem:[%s1239_s29 + $0x70] sm:$0xff] }
  0x14   : > { %311 = vst.msk [vmem:[#allocation2 + $0x28] sm:$0xff] %vm305_vm3, %v1180_v16  ;;  %v1106_v21 = vld [vmem:[%s1239_s29 + $0x18] sm:$0xff] }
  0x15   : > { %312 = vst.msk [vmem:[#allocation2 + $0x30] sm:$0xff] %vm305_vm3, %v1180_v16  ;;  %v1110_v22 = vld [vmem:[%s1239_s29 + $0x38] sm:$0xff] }
  0x16   : > { %560 = vmatpush.bf16.msra.mxu0 %v1119_v7  ;;  %1124 = vmatpush.bf16.msra.mxu1 %v1119_v7  ;;  %313 = vst.msk [vmem:[#allocation2 + $0x38] sm:$0xff] %vm305_vm3, %v1180_v16  ;;  %v1114_v23 = vld [vmem:[%s1239_s29 + $0x58] sm:$0xff]  ;;  %v338_v25 = vld [vmem:[#allocation2] sm:$0xff] }
  0x17   : > { %1125 = vmatpush.bf16.msra.mxu2 %v1119_v7  ;;  %1126 = vmatpush.bf16.msra.mxu3 %v1119_v7  ;;  %314 = vst.msk [vmem:[#allocation2 + $0x40] sm:$0xff] %vm305_vm3, %v1180_v16  ;;  %v1118_v24 = vld [vmem:[%s1239_s29 + $0x78] sm:$0xff]  ;;  %v339_v33 = vld [vmem:[#allocation2 + $0x8] sm:$0xff] }
  0x18   : > { %315 = vst.msk [vmem:[#allocation2 + $0x48] sm:$0xff] %vm305_vm3, %v1180_v16  ;;  %v340_v53 = vld [vmem:[#allocation2 + $0x10] sm:$0xff] }
  0x19   : > { %1085 = vmatmul.msk.bf16.vlgmr.msra.gmra.mxu0 %vm497_vm2, %v1103_v8  ;;  %1089 = vmatmul.msk.bf16.vlgmr.msra.gmra.mxu1 %vm497_vm2, %v1107_v9  ;;  %316 = vst.msk [vmem:[#allocation2 + $0x50] sm:$0xff] %vm305_vm3, %v1180_v16 }
  0x1a   : > { %1093 = vmatmul.msk.bf16.vlgmr.msra.gmra.mxu2 %vm497_vm2, %v1111_v10  ;;  %1097 = vmatmul.msk.bf16.vlgmr.msra.gmra.mxu3 %vm497_vm2, %v1115_v11  ;;  %317 = vst.msk [vmem:[#allocation2 + $0x58] sm:$0xff] %vm305_vm3, %v1180_v16 }
  0x1b   : > { %318 = vst.msk [vmem:[#allocation2 + $0x60] sm:$0xff] %vm305_vm3, %v1180_v16 }
  0x1c   : > { %319 = vst.msk [vmem:[#allocation2 + $0x68] sm:$0xff] %vm305_vm3, %v1180_v16 }
  0x1d   : > { %320 = vst.msk [vmem:[#allocation2 + $0x70] sm:$0xff] %vm305_vm3, %v1180_v16 }
  0x1e   : > { %321 = vst.msk [vmem:[#allocation2 + $0x78] sm:$0xff] %vm305_vm3, %v1180_v16  ;;  %v346_v26 = vld [vmem:[#allocation2 + $0x40] sm:$0xff] }
  0x1f   : > { %322 = vst.msk [vmem:[#allocation2 + $0x80] sm:$0xff] %vm305_vm3, %v1180_v16  ;;  %v347_v34 = vld [vmem:[#allocation2 + $0x48] sm:$0xff] }
  0x20   : > { %323 = vst.msk [vmem:[#allocation2 + $0x88] sm:$0xff] %vm305_vm3, %v1180_v16  ;;  %v348_v57 = vld [vmem:[#allocation2 + $0x50] sm:$0xff] }
  0x21   : > { %324 = vst.msk [vmem:[#allocation2 + $0x90] sm:$0xff] %vm305_vm3, %v1180_v16 }
  0x22   : > { %325 = vst.msk [vmem:[#allocation2 + $0x98] sm:$0xff] %vm305_vm3, %v1180_v16 }
  0x23   : > { %326 = vst.msk [vmem:[#allocation2 + $0xa0] sm:$0xff] %vm305_vm3, %v1180_v16 }
  0x24   : > { %327 = vst.msk [vmem:[#allocation2 + $0xa8] sm:$0xff] %vm305_vm3, %v1180_v16 }
  0x25   : > { %328 = vst.msk [vmem:[#allocation2 + $0xb0] sm:$0xff] %vm305_vm3, %v1180_v16 }
  0x26   : > { %329 = vst.msk [vmem:[#allocation2 + $0xb8] sm:$0xff] %vm305_vm3, %v1180_v16  ;;  %v354_v31 = vld [vmem:[#allocation2 + $0x80] sm:$0xff] }
  0x27   : > { %330 = vst.msk [vmem:[#allocation2 + $0xc0] sm:$0xff] %vm305_vm3, %v1180_v16  ;;  %v355_v50 = vld [vmem:[#allocation2 + $0x88] sm:$0xff] }
  0x28   : > { %331 = vst.msk [vmem:[#allocation2 + $0xc8] sm:$0xff] %vm305_vm3, %v1180_v16  ;;  %v356_v11 = vld [vmem:[#allocation2 + $0x90] sm:$0xff] }
  0x29   : > { %1086 = vmatmul.msk.bf16.gmra.mxu0 %vm497_vm2, %v1104_v12  ;;  %1090 = vmatmul.msk.bf16.gmra.mxu1 %vm497_vm2, %v1108_v13  ;;  %332 = vst.msk [vmem:[#allocation2 + $0xd0] sm:$0xff] %vm305_vm3, %v1180_v16 }
  0x2a   : > { %1094 = vmatmul.msk.bf16.gmra.mxu2 %vm497_vm2, %v1112_v14  ;;  %1098 = vmatmul.msk.bf16.gmra.mxu3 %vm497_vm2, %v1116_v15  ;;  %333 = vst.msk [vmem:[#allocation2 + $0xd8] sm:$0xff] %vm305_vm3, %v1180_v16 }
  0x2b   : > { %334 = vst.msk [vmem:[#allocation2 + $0xe0] sm:$0xff] %vm305_vm3, %v1180_v16 }
  0x2c   : > { %335 = vst.msk [vmem:[#allocation2 + $0xe8] sm:$0xff] %vm305_vm3, %v1180_v16 }
  0x2d   : > { %336 = vst.msk [vmem:[#allocation2 + $0xf0] sm:$0xff] %vm305_vm3, %v1180_v16 }
  0x2e   : > { %337 = vst.msk [vmem:[#allocation2 + $0xf8] sm:$0xff] %vm305_vm3, %v1180_v16  ;;  %v362_v32 = vld [vmem:[#allocation2 + $0xc0] sm:$0xff] }
  0x2f   : > { %v363_v51 = vld [vmem:[#allocation2 + $0xc8] sm:$0xff] }
  0x30   : > { %v364_v14 = vld [vmem:[#allocation2 + $0xd0] sm:$0xff] }
  0x39   : > { %1087 = vmatmul.msk.bf16.gmra.mxu0 %vm497_vm2, %v1105_v17  ;;  %1091 = vmatmul.msk.bf16.gmra.mxu1 %vm497_vm2, %v1109_v18 }
  0x3a   : > { %1095 = vmatmul.msk.bf16.gmra.mxu2 %vm497_vm2, %v1113_v19  ;;  %1099 = vmatmul.msk.bf16.gmra.mxu3 %vm497_vm2, %v1117_v20  ;;  %v341_v19 = vld [vmem:[#allocation2 + $0x18] sm:$0xff] }
  0x49   : > { %1088 = vmatmul.msk.bf16.gmra.mxu0 %vm497_vm2, %v1106_v21  ;;  %1092 = vmatmul.msk.bf16.gmra.mxu1 %vm497_vm2, %v1110_v22 }
  0x4a   : > { %1096 = vmatmul.msk.bf16.gmra.mxu2 %vm497_vm2, %v1114_v23  ;;  %1100 = vmatmul.msk.bf16.gmra.mxu3 %vm497_vm2, %v1118_v24  ;;  %v349_v23 = vld [vmem:[#allocation2 + $0x58] sm:$0xff] }
  0x96   : > { %v562_v27 = vpop.f32.mrf.mxu0  ;;  %v582_v28 = vpop.f32.mrf.mxu1 }
  0x97   : > { %v642_v29 = vadd.f32 %v562_v27, %v338_v25  ;;  %v650_v30 = vadd.f32 %v582_v28, %v346_v26 }
  0x99   : > { %675 = vst.msk [vmem:[#allocation2] sm:$0xff] %vm305_vm3, %v642_v29 }
  0x9a   : > { %683 = vst.msk [vmem:[#allocation2 + $0x40] sm:$0xff] %vm305_vm3, %v650_v30 }
  0x9d   : > { %v602_v36 = vpop.f32.mrf.mxu2  ;;  %v622_v37 = vpop.f32.mrf.mxu3 }
  0x9e   : > { %v658_v38 = vadd.f32 %v602_v36, %v354_v31  ;;  %v666_v39 = vadd.f32 %v622_v37, %v362_v32  ;;  %v564_v40 = vpop.f32.mrf.mxu0  ;;  %v584_v41 = vpop.f32.mrf.mxu1 }
  0x9f   : > { %v643_v43 = vadd.f32 %v564_v40, %v339_v33  ;;  %v651_v44 = vadd.f32 %v584_v41, %v347_v34  ;;  %v357_v40 = vld [vmem:[#allocation2 + $0x98] sm:$0xff] }
  0xa0   : > { %v710_v45 = vld [vmem:[#allocation2] sm:$0xff]  ;;  %691 = vst.msk [vmem:[#allocation2 + $0x80] sm:$0xff] %vm305_vm3, %v658_v38 }
  0xa1   : > { %v746_v46 = vmul.f32 %v1310_v35, %v710_v45  ;;  %v718_v47 = vld [vmem:[#allocation2 + $0x40] sm:$0xff]  ;;  %699 = vst.msk [vmem:[#allocation2 + $0xc0] sm:$0xff] %vm305_vm3, %v666_v39  ;;  %v365_v45 = vld [vmem:[#allocation2 + $0xd8] sm:$0xff] }
  0xa2   : > { %v754_v48 = vmul.f32 %v1310_v35, %v718_v47  ;;  %676 = vst.msk [vmem:[#allocation2 + $0x8] sm:$0xff] %vm305_vm3, %v643_v43 }
  0xa3   : > { %v782_v49 = vadd.f32 %v1315_v42, %v746_v46  ;;  %684 = vst.msk [vmem:[#allocation2 + $0x48] sm:$0xff] %vm305_vm3, %v651_v44 }
  0xa4   : > { %v790_v52 = vadd.f32 %v1315_v42, %v754_v48 }
  0xa5   : > { %v814_v54 = vmax.f32 %v782_v49, 0.0  ;;  %v604_v55 = vpop.f32.mrf.mxu2  ;;  %v624_v56 = vpop.f32.mrf.mxu3  ;;  %v342_v49 = vld [vmem:[#allocation2 + $0x20] sm:$0xff] }
  0xa6   : > { %v822_v58 = vmax.f32 %v790_v52, 0.0  ;;  %v659_v59 = vadd.f32 %v604_v55, %v355_v50  ;;  %v667_v60 = vadd.f32 %v624_v56, %v363_v51  ;;  %v567_v61 = vpop.f32.mrf.mxu0  ;;  %v587_v62 = vpop.f32.mrf.mxu1 }
  0xa7   : > { %846 = vst.msk [vmem:[%s1328_s11] sm:$0xff] %vm305_vm3, %v814_v54  ;;  %v726_v63 = vld [vmem:[#allocation2 + $0x80] sm:$0xff]  ;;  %v644_v0 = vadd.f32 %v567_v61, %v340_v53  ;;  %v652_v3 = vadd.f32 %v587_v62, %v348_v57 }
  0xa8   : > { %854 = vst.msk [vmem:[%s1328_s11 + $0x40] sm:$0xff] %vm305_vm3, %v822_v58  ;;  %v762_v1 = vmul.f32 %v1310_v35, %v726_v63  ;;  %v734_v2 = vld [vmem:[#allocation2 + $0xc0] sm:$0xff] }
  0xa9   : > { %v770_v4 = vmul.f32 %v1310_v35, %v734_v2  ;;  %v711_v5 = vld [vmem:[#allocation2 + $0x8] sm:$0xff]  ;;  %692 = vst.msk [vmem:[#allocation2 + $0x88] sm:$0xff] %vm305_vm3, %v659_v59  ;;  %v350_v54 = vld [vmem:[#allocation2 + $0x60] sm:$0xff] }
  0xaa   : > { %v798_v6 = vadd.f32 %v1315_v42, %v762_v1  ;;  %v747_v7 = vmul.f32 %v1310_v35, %v711_v5  ;;  %v719_v8 = vld [vmem:[#allocation2 + $0x48] sm:$0xff]  ;;  %700 = vst.msk [vmem:[#allocation2 + $0xc8] sm:$0xff] %vm305_vm3, %v667_v60  ;;  %v358_v5 = vld [vmem:[#allocation2 + $0xa0] sm:$0xff] }
  0xab   : > { %v806_v9 = vadd.f32 %v1315_v42, %v770_v4  ;;  %v755_v10 = vmul.f32 %v1310_v35, %v719_v8  ;;  %677 = vst.msk [vmem:[#allocation2 + $0x10] sm:$0xff] %vm305_vm3, %v644_v0 }
  0xac   : > { %v830_v12 = vmax.f32 %v798_v6, 0.0  ;;  %v783_v13 = vadd.f32 %v1315_v42, %v747_v7  ;;  %685 = vst.msk [vmem:[#allocation2 + $0x50] sm:$0xff] %vm305_vm3, %v652_v3 }
  0xad   : > { %v838_v15 = vmax.f32 %v806_v9, 0.0  ;;  %v791_v16 = vadd.f32 %v1315_v42, %v755_v10  ;;  %v607_v17 = vpop.f32.mrf.mxu2  ;;  %v627_v18 = vpop.f32.mrf.mxu3  ;;  %v366_v10 = vld [vmem:[#allocation2 + $0xe0] sm:$0xff] }
  0xae   : > { %862 = vst.msk [vmem:[%s1328_s11 + $0x80] sm:$0xff] %vm305_vm3, %v830_v12  ;;  %v815_v20 = vmax.f32 %v783_v13, 0.0  ;;  %v660_v21 = vadd.f32 %v607_v17, %v356_v11  ;;  %v569_v22 = vpop.f32.mrf.mxu0  ;;  %v589_v24 = vpop.f32.mrf.mxu1  ;;  %v668_v26 = vadd.f32 %v627_v18, %v364_v14  ;;  %v351_v18 = vld [vmem:[#allocation2 + $0x68] sm:$0xff] }
  0xaf   : > { %870 = vst.msk [vmem:[%s1328_s11 + $0xc0] sm:$0xff] %vm305_vm3, %v838_v15  ;;  %v823_v25 = vmax.f32 %v791_v16, 0.0  ;;  %v645_v28 = vadd.f32 %v569_v22, %v341_v19  ;;  %v653_v31 = vadd.f32 %v589_v24, %v349_v23  ;;  %v343_v15 = vld [vmem:[#allocation2 + $0x28] sm:$0xff] }
  0xb0   : > { %847 = vst.msk [vmem:[%s1328_s11 + $0x8] sm:$0xff] %vm305_vm3, %v815_v20  ;;  %v727_v27 = vld [vmem:[#allocation2 + $0x88] sm:$0xff] }
  0xb1   : > { %855 = vst.msk [vmem:[%s1328_s11 + $0x48] sm:$0xff] %vm305_vm3, %v823_v25  ;;  %v763_v29 = vmul.f32 %v1310_v35, %v727_v27  ;;  %v735_v30 = vld [vmem:[#allocation2 + $0xc8] sm:$0xff] }
  0xb2   : > { %v771_v32 = vmul.f32 %v1310_v35, %v735_v30  ;;  %v712_v33 = vld [vmem:[#allocation2 + $0x10] sm:$0xff]  ;;  %693 = vst.msk [vmem:[#allocation2 + $0x90] sm:$0xff] %vm305_vm3, %v660_v21 }
  0xb3   : > { %v799_v34 = vadd.f32 %v1315_v42, %v763_v29  ;;  %v748_v36 = vmul.f32 %v1310_v35, %v712_v33  ;;  %v720_v37 = vld [vmem:[#allocation2 + $0x50] sm:$0xff]  ;;  %701 = vst.msk [vmem:[#allocation2 + $0xd0] sm:$0xff] %vm305_vm3, %v668_v26  ;;  %v359_v26 = vld [vmem:[#allocation2 + $0xa8] sm:$0xff] }
  0xb4   : > { %v807_v38 = vadd.f32 %v1315_v42, %v771_v32  ;;  %v756_v39 = vmul.f32 %v1310_v35, %v720_v37  ;;  %678 = vst.msk [vmem:[#allocation2 + $0x18] sm:$0xff] %vm305_vm3, %v645_v28 }
  0xb5   : > { %v831_v41 = vmax.f32 %v799_v34, 0.0  ;;  %v784_v43 = vadd.f32 %v1315_v42, %v748_v36  ;;  %686 = vst.msk [vmem:[#allocation2 + $0x58] sm:$0xff] %vm305_vm3, %v653_v31  ;;  %v609_v44 = vpop.f32.mrf.mxu2  ;;  %v629_v46 = vpop.f32.mrf.mxu3 }
  0xb6   : > { %v839_v47 = vmax.f32 %v807_v38, 0.0  ;;  %v792_v48 = vadd.f32 %v1315_v42, %v756_v39  ;;  %v572_v50 = vpop.f32.mrf.mxu0  ;;  %v592_v51 = vpop.f32.mrf.mxu1  ;;  %v661_v53 = vadd.f32 %v609_v44, %v357_v40  ;;  %v669_v56 = vadd.f32 %v629_v46, %v365_v45  ;;  %v367_v38 = vld [vmem:[#allocation2 + $0xe8] sm:$0xff] }
  0xb7   : > { %863 = vst.msk [vmem:[%s1328_s11 + $0x88] sm:$0xff] %vm305_vm3, %v831_v41  ;;  %v816_v52 = vmax.f32 %v784_v43, 0.0  ;;  %v646_v58 = vadd.f32 %v572_v50, %v342_v49  ;;  %v654_v61 = vadd.f32 %v592_v51, %v350_v54  ;;  %v344_v43 = vld [vmem:[#allocation2 + $0x30] sm:$0xff] }
  0xb8   : > { %871 = vst.msk [vmem:[%s1328_s11 + $0xc8] sm:$0xff] %vm305_vm3, %v839_v47  ;;  %v824_v55 = vmax.f32 %v792_v48, 0.0  ;;  %v352_v47 = vld [vmem:[#allocation2 + $0x70] sm:$0xff] }
  0xb9   : > { %848 = vst.msk [vmem:[%s1328_s11 + $0x10] sm:$0xff] %vm305_vm3, %v816_v52  ;;  %v728_v57 = vld [vmem:[#allocation2 + $0x90] sm:$0xff] }
  0xba   : > { %856 = vst.msk [vmem:[%s1328_s11 + $0x50] sm:$0xff] %vm305_vm3, %v824_v55  ;;  %v764_v59 = vmul.f32 %v1310_v35, %v728_v57  ;;  %v736_v60 = vld [vmem:[#allocation2 + $0xd0] sm:$0xff] }
  0xbb   : > { %v772_v62 = vmul.f32 %v1310_v35, %v736_v60  ;;  %v713_v63 = vld [vmem:[#allocation2 + $0x18] sm:$0xff]  ;;  %694 = vst.msk [vmem:[#allocation2 + $0x98] sm:$0xff] %vm305_vm3, %v661_v53  ;;  %v360_v54 = vld [vmem:[#allocation2 + $0xb0] sm:$0xff] }
  0xbc   : > { %v800_v0 = vadd.f32 %v1315_v42, %v764_v59  ;;  %v749_v1 = vmul.f32 %v1310_v35, %v713_v63  ;;  %v721_v2 = vld [vmem:[#allocation2 + $0x58] sm:$0xff]  ;;  %702 = vst.msk [vmem:[#allocation2 + $0xd8] sm:$0xff] %vm305_vm3, %v669_v56  ;;  %v368_v55 = vld [vmem:[#allocation2 + $0xf0] sm:$0xff] }
  0xbd   : > { %v808_v3 = vadd.f32 %v1315_v42, %v772_v62  ;;  %v757_v4 = vmul.f32 %v1310_v35, %v721_v2  ;;  %679 = vst.msk [vmem:[#allocation2 + $0x20] sm:$0xff] %vm305_vm3, %v646_v58  ;;  %v612_v6 = vpop.f32.mrf.mxu2  ;;  %v632_v7 = vpop.f32.mrf.mxu3 }
  0xbe   : > { %v832_v8 = vmax.f32 %v800_v0, 0.0  ;;  %v785_v9 = vadd.f32 %v1315_v42, %v749_v1  ;;  %687 = vst.msk [vmem:[#allocation2 + $0x60] sm:$0xff] %vm305_vm3, %v654_v61  ;;  %v574_v11 = vpop.f32.mrf.mxu0  ;;  %v594_v12 = vpop.f32.mrf.mxu1  ;;  %v662_v17 = vadd.f32 %v612_v6, %v358_v5  ;;  %v670_v20 = vadd.f32 %v632_v7, %v366_v10 }
  0xbf   : > { %v840_v13 = vmax.f32 %v808_v3, 0.0  ;;  %v793_v14 = vadd.f32 %v1315_v42, %v757_v4  ;;  %v647_v22 = vadd.f32 %v574_v11, %v343_v15  ;;  %v655_v25 = vadd.f32 %v594_v12, %v351_v18 }
  0xc0   : > { %864 = vst.msk [vmem:[%s1328_s11 + $0x90] sm:$0xff] %vm305_vm3, %v832_v8  ;;  %v817_v16 = vmax.f32 %v785_v9, 0.0  ;;  %v345_v9 = vld [vmem:[#allocation2 + $0x38] sm:$0xff] }
  0xc1   : > { %872 = vst.msk [vmem:[%s1328_s11 + $0xd0] sm:$0xff] %vm305_vm3, %v840_v13  ;;  %v825_v19 = vmax.f32 %v793_v14, 0.0  ;;  %v353_v13 = vld [vmem:[#allocation2 + $0x78] sm:$0xff] }
  0xc2   : > { %849 = vst.msk [vmem:[%s1328_s11 + $0x18] sm:$0xff] %vm305_vm3, %v817_v16  ;;  %v729_v21 = vld [vmem:[#allocation2 + $0x98] sm:$0xff] }
  0xc3   : > { %857 = vst.msk [vmem:[%s1328_s11 + $0x58] sm:$0xff] %vm305_vm3, %v825_v19  ;;  %v765_v23 = vmul.f32 %v1310_v35, %v729_v21  ;;  %v737_v24 = vld [vmem:[#allocation2 + $0xd8] sm:$0xff] }
  0xc4   : > { %v773_v27 = vmul.f32 %v1310_v35, %v737_v24  ;;  %v714_v28 = vld [vmem:[#allocation2 + $0x20] sm:$0xff]  ;;  %695 = vst.msk [vmem:[#allocation2 + $0xa0] sm:$0xff] %vm305_vm3, %v662_v17  ;;  %v361_v19 = vld [vmem:[#allocation2 + $0xb8] sm:$0xff] }
  0xc5   : > { %v801_v29 = vadd.f32 %v1315_v42, %v765_v23  ;;  %v750_v30 = vmul.f32 %v1310_v35, %v714_v28  ;;  %v722_v31 = vld [vmem:[#allocation2 + $0x60] sm:$0xff]  ;;  %703 = vst.msk [vmem:[#allocation2 + $0xe0] sm:$0xff] %vm305_vm3, %v670_v20  ;;  %v614_v32 = vpop.f32.mrf.mxu2  ;;  %v634_v33 = vpop.f32.mrf.mxu3  ;;  %v369_v20 = vld [vmem:[#allocation2 + $0xf8] sm:$0xff] }
  0xc6   : > { %v809_v34 = vadd.f32 %v1315_v42, %v773_v27  ;;  %v758_v36 = vmul.f32 %v1310_v35, %v722_v31  ;;  %680 = vst.msk [vmem:[#allocation2 + $0x28] sm:$0xff] %vm305_vm3, %v647_v22  ;;  %v663_v37 = vadd.f32 %v614_v32, %v359_v26  ;;  %v577_v39 = vpop.f32.mrf.mxu0  ;;  %v597_v44 = vpop.f32.mrf.mxu1  ;;  %v671_v49 = vadd.f32 %v634_v33, %v367_v38 }
  0xc7   : > { %v833_v40 = vmax.f32 %v801_v29, 0.0  ;;  %v786_v41 = vadd.f32 %v1315_v42, %v750_v30  ;;  %688 = vst.msk [vmem:[#allocation2 + $0x68] sm:$0xff] %vm305_vm3, %v655_v25  ;;  %v648_v51 = vadd.f32 %v577_v39, %v344_v43  ;;  %v656_v53 = vadd.f32 %v597_v44, %v352_v47 }
  0xc8   : > { %v841_v45 = vmax.f32 %v809_v34, 0.0  ;;  %v794_v46 = vadd.f32 %v1315_v42, %v758_v36  ;;  %696 = vst.msk [vmem:[#allocation2 + $0xa8] sm:$0xff] %vm305_vm3, %v663_v37 }
  0xc9   : > { %865 = vst.msk [vmem:[%s1328_s11 + $0x98] sm:$0xff] %vm305_vm3, %v833_v40  ;;  %v818_v48 = vmax.f32 %v786_v41, 0.0 }
  0xca   : > { %873 = vst.msk [vmem:[%s1328_s11 + $0xd8] sm:$0xff] %vm305_vm3, %v841_v45  ;;  %v826_v50 = vmax.f32 %v794_v46, 0.0 }
  0xcb   : > { %850 = vst.msk [vmem:[%s1328_s11 + $0x20] sm:$0xff] %vm305_vm3, %v818_v48  ;;  %v730_v52 = vld [vmem:[#allocation2 + $0xa0] sm:$0xff] }
  0xcc   : > { %858 = vst.msk [vmem:[%s1328_s11 + $0x60] sm:$0xff] %vm305_vm3, %v826_v50  ;;  %v766_v56 = vmul.f32 %v1310_v35, %v730_v52  ;;  %v738_v57 = vld [vmem:[#allocation2 + $0xe0] sm:$0xff] }
  0xcd   : > { %v774_v58 = vmul.f32 %v1310_v35, %v738_v57  ;;  %v715_v59 = vld [vmem:[#allocation2 + $0x28] sm:$0xff]  ;;  %704 = vst.msk [vmem:[#allocation2 + $0xe8] sm:$0xff] %vm305_vm3, %v671_v49  ;;  %v617_v60 = vpop.f32.mrf.mxu2  ;;  %v637_v61 = vpop.f32.mrf.mxu3 }
  0xce   : > { %v802_v62 = vadd.f32 %v1315_v42, %v766_v56  ;;  %v751_v63 = vmul.f32 %v1310_v35, %v715_v59  ;;  %v723_v0 = vld [vmem:[#allocation2 + $0x68] sm:$0xff]  ;;  %681 = vst.msk [vmem:[#allocation2 + $0x30] sm:$0xff] %vm305_vm3, %v648_v51  ;;  %v664_v1 = vadd.f32 %v617_v60, %v360_v54  ;;  %v672_v2 = vadd.f32 %v637_v61, %v368_v55  ;;  %v579_v10 = vpop.f32.mrf.mxu0  ;;  %v599_v14 = vpop.f32.mrf.mxu1 }
  0xcf   : > { %v810_v3 = vadd.f32 %v1315_v42, %v774_v58  ;;  %v759_v4 = vmul.f32 %v1310_v35, %v723_v0  ;;  %v731_v5 = vld [vmem:[#allocation2 + $0xa8] sm:$0xff]  ;;  %689 = vst.msk [vmem:[#allocation2 + $0x70] sm:$0xff] %vm305_vm3, %v656_v53  ;;  %v649_v18 = vadd.f32 %v579_v10, %v345_v9  ;;  %v657_v23 = vadd.f32 %v599_v14, %v353_v13 }
  0xd0   : > { %v834_v6 = vmax.f32 %v802_v62, 0.0  ;;  %v787_v7 = vadd.f32 %v1315_v42, %v751_v63  ;;  %v767_v8 = vmul.f32 %v1310_v35, %v731_v5  ;;  %697 = vst.msk [vmem:[#allocation2 + $0xb0] sm:$0xff] %vm305_vm3, %v664_v1 }
  0xd1   : > { %v842_v11 = vmax.f32 %v810_v3, 0.0  ;;  %v795_v12 = vadd.f32 %v1315_v42, %v759_v4  ;;  %705 = vst.msk [vmem:[#allocation2 + $0xf0] sm:$0xff] %vm305_vm3, %v672_v2 }
  0xd2   : > { %866 = vst.msk [vmem:[%s1328_s11 + $0xa0] sm:$0xff] %vm305_vm3, %v834_v6  ;;  %v819_v15 = vmax.f32 %v787_v7, 0.0  ;;  %v803_v16 = vadd.f32 %v1315_v42, %v767_v8 }
  0xd3   : > { %874 = vst.msk [vmem:[%s1328_s11 + $0xe0] sm:$0xff] %vm305_vm3, %v842_v11  ;;  %v827_v17 = vmax.f32 %v795_v12, 0.0 }
  0xd4   : > { %851 = vst.msk [vmem:[%s1328_s11 + $0x28] sm:$0xff] %vm305_vm3, %v819_v15  ;;  %v835_v21 = vmax.f32 %v803_v16, 0.0  ;;  %v739_v22 = vld [vmem:[#allocation2 + $0xe8] sm:$0xff] }
  0xd5   : > { %859 = vst.msk [vmem:[%s1328_s11 + $0x68] sm:$0xff] %vm305_vm3, %v827_v17  ;;  %v775_v24 = vmul.f32 %v1310_v35, %v739_v22  ;;  %v716_v25 = vld [vmem:[#allocation2 + $0x30] sm:$0xff]  ;;  %v619_v26 = vpop.f32.mrf.mxu2  ;;  %v639_v27 = vpop.f32.mrf.mxu3 }
  0xd6   : > { %867 = vst.msk [vmem:[%s1328_s11 + $0xa8] sm:$0xff] %vm305_vm3, %v835_v21  ;;  %v752_v28 = vmul.f32 %v1310_v35, %v716_v25  ;;  %v724_v29 = vld [vmem:[#allocation2 + $0x70] sm:$0xff]  ;;  %v665_v30 = vadd.f32 %v619_v26, %v361_v19  ;;  %v673_v31 = vadd.f32 %v639_v27, %v369_v20 }
  0xd7   : > { %v811_v32 = vadd.f32 %v1315_v42, %v775_v24  ;;  %v760_v33 = vmul.f32 %v1310_v35, %v724_v29  ;;  %v732_v34 = vld [vmem:[#allocation2 + $0xb0] sm:$0xff]  ;;  %682 = vst.msk [vmem:[#allocation2 + $0x38] sm:$0xff] %vm305_vm3, %v649_v18 }
  0xd8   : > { %v788_v36 = vadd.f32 %v1315_v42, %v752_v28  ;;  %v768_v37 = vmul.f32 %v1310_v35, %v732_v34  ;;  %v740_v38 = vld [vmem:[#allocation2 + $0xf0] sm:$0xff]  ;;  %690 = vst.msk [vmem:[#allocation2 + $0x78] sm:$0xff] %vm305_vm3, %v657_v23 }
  0xd9   : > { %v843_v39 = vmax.f32 %v811_v32, 0.0  ;;  %v796_v40 = vadd.f32 %v1315_v42, %v760_v33  ;;  %v776_v41 = vmul.f32 %v1310_v35, %v740_v38  ;;  %698 = vst.msk [vmem:[#allocation2 + $0xb8] sm:$0xff] %vm305_vm3, %v665_v30 }
  0xda   : > { %v820_v43 = vmax.f32 %v788_v36, 0.0  ;;  %v804_v44 = vadd.f32 %v1315_v42, %v768_v37  ;;  %706 = vst.msk [vmem:[#allocation2 + $0xf8] sm:$0xff] %vm305_vm3, %v673_v31 }
  0xdb   : > { %875 = vst.msk [vmem:[%s1328_s11 + $0xe8] sm:$0xff] %vm305_vm3, %v843_v39  ;;  %v828_v45 = vmax.f32 %v796_v40, 0.0  ;;  %v812_v46 = vadd.f32 %v1315_v42, %v776_v41 }
  0xdc   : > { %852 = vst.msk [vmem:[%s1328_s11 + $0x30] sm:$0xff] %vm305_vm3, %v820_v43  ;;  %v836_v47 = vmax.f32 %v804_v44, 0.0 }
  0xdd   : > { %860 = vst.msk [vmem:[%s1328_s11 + $0x70] sm:$0xff] %vm305_vm3, %v828_v45  ;;  %v844_v48 = vmax.f32 %v812_v46, 0.0 }
  0xde   : > { %868 = vst.msk [vmem:[%s1328_s11 + $0xb0] sm:$0xff] %vm305_vm3, %v836_v47  ;;  %v717_v49 = vld [vmem:[#allocation2 + $0x38] sm:$0xff] }
  0xdf   : > { %876 = vst.msk [vmem:[%s1328_s11 + $0xf0] sm:$0xff] %vm305_vm3, %v844_v48  ;;  %v753_v50 = vmul.f32 %v1310_v35, %v717_v49  ;;  %v725_v51 = vld [vmem:[#allocation2 + $0x78] sm:$0xff] }
  0xe0   : > { %v761_v52 = vmul.f32 %v1310_v35, %v725_v51  ;;  %v733_v53 = vld [vmem:[#allocation2 + $0xb8] sm:$0xff] }
  0xe1   : > { %v789_v54 = vadd.f32 %v1315_v42, %v753_v50  ;;  %v769_v55 = vmul.f32 %v1310_v35, %v733_v53  ;;  %v741_v56 = vld [vmem:[#allocation2 + $0xf8] sm:$0xff] }
  0xe2   : > { %v797_v57 = vadd.f32 %v1315_v42, %v761_v52  ;;  %v777_v58 = vmul.f32 %v1310_v35, %v741_v56 }
  0xe3   : > { %v821_v59 = vmax.f32 %v789_v54, 0.0  ;;  %v805_v60 = vadd.f32 %v1315_v42, %v769_v55 }
  0xe4   : > { %v829_v61 = vmax.f32 %v797_v57, 0.0  ;;  %v813_v62 = vadd.f32 %v1315_v42, %v777_v58 }
  0xe5   : > { %853 = vst.msk [vmem:[%s1328_s11 + $0x38] sm:$0xff] %vm305_vm3, %v821_v59  ;;  %v837_v63 = vmax.f32 %v805_v60, 0.0 }
  0xe6   : > { %861 = vst.msk [vmem:[%s1328_s11 + $0x78] sm:$0xff] %vm305_vm3, %v829_v61  ;;  %v845_v0 = vmax.f32 %v813_v62, 0.0 }
  0xe7   : > { %869 = vst.msk [vmem:[%s1328_s11 + $0xb8] sm:$0xff] %vm305_vm3, %v837_v63 }
  0xe8   : > { %877 = vst.msk [vmem:[%s1328_s11 + $0xf8] sm:$0xff] %vm305_vm3, %v845_v0 }
  0xe9 PF: > { %s14_s17 = sadd.s32 1, %s1177_s17   ;;  %s1495_s15 = smov %s1173_s16 }
  0xea   : > { %p11_p5 = scmp.ge.s32.totalorder %s14_s17, 4   ;;  %s1496_s16 = smov %s1498_s18 }
  0xec   :  { %13 = sbr.rel (!%p11_p5) target bundleno = 2 (0x2), region = 83 }

// kernel: _stem_and_pool.5
= control target key start
LH: loop header
LB: loop body
LE: loop exit
PB: predicated region body
PF: predicated region fallthrough
CT: control target
= control target key end

     0   :  { %s1959_s15 = smov 0   ;;  %s1961_s16 = smov 0   ;;  %s2454_s0 = inlined_call_operand.vmem [shape: bf16[512,288], index: 0, kind: input, shape index: {}]   ;;  %s2455_s1 = inlined_call_operand.vmem [shape: bf16[288,32], index: 1, kind: input, shape index: {}]   ;;  %s2456_s2 = inlined_call_operand.vmem [shape: f32[1,32], index: 2, kind: input, shape index: {}]   ;;  %s2457_s3 = inlined_call_operand.vmem [shape: f32[1,32], index: 3, kind: input, shape index: {}]   ;;  %s2458_s4 = inlined_call_operand.vmem [shape: f32[512,32], index: 4, kind: output, shape index: {}]  }
   0x1   :  { %s1963_s17 = smov 0  }
   0x2 LB: > { %s33_s18 = sadd.s32 1, %s1927_s16  ;;  %p1510_p0 = scmp.ge.s32.totalorder %s1931_s17, 1  ;;  %s1931_s17 = sphi %s1963_s17, %s14_s17   ;;  %s1927_s16 = sphi %s1961_s16, %s2460_s16   ;;  %s1923_s15 = sphi %s1959_s15, %s2459_s15  }
   0x3   : > { %p35_p1 = scmp.ge.s32.totalorder %s33_s18, 2  ;;  %p224_p2 = scmp.lt.s32.totalorder %s1931_s17, 3 }
   0x5   : > { %s2462_s18 = smov (%p35_p1, %s33_s18), 0  ;;  %p225_p3 = pnand %p1510_p0, %p224_p2 }
   0x6   : > { %s1511_s25 = sshll.u32 (!%p225_p3), %s1923_s15, 5 }
   0x7   : > { %228 = sbr.rel (%p225_p3) target bundleno = 389 (0x185), region = 36  ;;  %p274_p4 = scmp.lt.s32.totalorder (!%p225_p3), %s1511_s25, 63 }
   0xc   : > { %v1852_v0 = vld [vmem:[%s2455_s1 + $0x38] sm:$0xff]  ;;  %v1988_v2 = vld [vmem:[%s2455_s1 + $0x88] sm:$0xff]  ;;  %v1851_v3 = vld [vmem:[%s2455_s1 + $0x30] sm:$0xff]  ;;  %s2464_s25 = smov (!%p274_p4, %s1511_s25), 63  ;;  %vm313_vm0 = vcmask 261120  }
   0xd   : > { %v1983_v1 = vld [vmem:[%s2455_s1 + $0x78] sm:$0xff]  ;;  %875 = vmatpush.bf16.msra.mxu0 %v1852_v0  ;;  %1863 = vmatpush.bf16.msra.mxu3 %v1852_v0  ;;  %v1859_v4 = vld [vmem:[%s2455_s1 + $0x70] sm:$0xff]  ;;  %v2001_v5 = vld [vmem:[%s2455_s1 + $0x80] sm:$0xff]  ;;  %s1881_s6 = smul.u32 12, %s2464_s25  ;;  %s1514_s20 = sshll.u32 %s2464_s25, 3 }
   0xe   : > { %964 = vmatpush.bf16.msra.mxu1 %v1983_v1  ;;  %1059 = vmatpush.bf16.msra.mxu2 %v1988_v2  ;;  %v1850_v6 = vld [vmem:[%s2455_s1 + $0x28] sm:$0xff]  ;;  %v1849_v11 = vld [vmem:[%s2455_s1 + $0x20] sm:$0xff]  ;;  %v1848_v13 = vld [vmem:[%s2455_s1 + $0x18] sm:$0xff]  ;;  %s2231_s23 = scalar_lea.vmem %s2458_s4, %s1514_s20 }
   0xf   : > { %v1858_v7 = vld [vmem:[%s2455_s1 + $0x68] sm:$0xff]  ;;  %s2016_s13 = scalar_lea.vmem %s2454_s0, %s1881_s6  ;;  %v1857_v12 = vld [vmem:[%s2455_s1 + $0x60] sm:$0xff]  ;;  %v1856_v14 = vld [vmem:[%s2455_s1 + $0x58] sm:$0xff] }
  0x10   : > { %v1525_v8 = vld [vmem:[%s2016_s13 + $0x8] sm:$0xf]  ;;  %v1799_v9 = vld [vmem:[%s2016_s13 + $0x10] sm:$0xf0]  ;;  %v1537_v17 = vld [vmem:[%s2016_s13 + $0x20] sm:$0xf] }
  0x11   : > { %876 = vmatpush.bf16.msra.mxu0 %v1851_v3  ;;  %1864 = vmatpush.bf16.msra.mxu3 %v1851_v3  ;;  %v1526_v10 = vor.u32 %v1799_v9, %v1525_v8  ;;  %v1847_v15 = vld [vmem:[%s2455_s1 + $0x10] sm:$0xff]  ;;  %v1802_v18 = vld [vmem:[%s2016_s13 + $0x28] sm:$0xf0]  ;;  %v1845_v22 = vld [vmem:[%s2455_s1] sm:$0xff] }
  0x12   : > { %965 = vmatpush.bf16.msra.mxu1 %v1859_v4  ;;  %1060 = vmatpush.bf16.msra.mxu2 %v2001_v5  ;;  %v1855_v16 = vld [vmem:[%s2455_s1 + $0x50] sm:$0xff]  ;;  %v1846_v19 = vld [vmem:[%s2455_s1 + $0x8] sm:$0xff]  ;;  %v1538_v21 = vor.u32 %v1802_v18, %v1537_v17  ;;  %v1517_v23 = vld [vmem:[%s2016_s13] sm:$0xf] }
  0x13   : > { %v1854_v20 = vld [vmem:[%s2455_s1 + $0x48] sm:$0xff]  ;;  %v1661_v25 = vld [vmem:[%s2016_s13 + $0x120] sm:$0xf]  ;;  %v1797_v28 = vld [vmem:[%s2016_s13 + $0x4] sm:$0xf] }
  0x14   : > { %v1798_v24 = vld [vmem:[%s2016_s13 + $0x8] sm:$0xf0]  ;;  %v1853_v27 = vld [vmem:[%s2455_s1 + $0x40] sm:$0xff]  ;;  %v1519_v29 = vld [vmem:[%s2016_s13 + $0xc] sm:$0xf0] }
  0x15   : > { %877 = vmatpush.bf16.msra.mxu0 %v1850_v6  ;;  %1865 = vmatpush.bf16.msra.mxu3 %v1850_v6  ;;  %v1834_v26 = vld [vmem:[%s2016_s13 + $0x128] sm:$0xf0]  ;;  %v1518_v30 = vor.u32 %v1798_v24, %v1517_v23  ;;  %v1522_v32 = vor.u32 %v1797_v28, %v1519_v29  ;;  %v1549_v33 = vld [vmem:[%s2016_s13 + $0x38] sm:$0xf]  ;;  %v1805_v34 = vld [vmem:[%s2016_s13 + $0x40] sm:$0xf0] }
  0x16   : > { %966 = vmatpush.bf16.msra.mxu1 %v1858_v7  ;;  %1779 = vmatmul.msk.bf16.vlgmr.msra.gmra.mxu2 %vm313_vm0, %v1526_v10  ;;  %v1662_v31 = vor.u32 %v1834_v26, %v1661_v25  ;;  %v1550_v35 = vor.u32 %v1805_v34, %v1549_v33  ;;  %v1529_v36 = vld [vmem:[%s2016_s13 + $0x18] sm:$0xf]  ;;  %v1801_v37 = vld [vmem:[%s2016_s13 + $0x20] sm:$0xf0]  ;;  %v1800_v40 = vld [vmem:[%s2016_s13 + $0x1c] sm:$0xf] }
  0x17   : > { %v1673_v38 = vld [vmem:[%s2016_s13 + $0x138] sm:$0xf]  ;;  %v1837_v39 = vld [vmem:[%s2016_s13 + $0x140] sm:$0xf0]  ;;  %v1531_v41 = vld [vmem:[%s2016_s13 + $0x24] sm:$0xf0]  ;;  %v1530_v42 = vor.u32 %v1801_v37, %v1529_v36 }
  0x18   : > { %v1674_v43 = vor.u32 %v1837_v39, %v1673_v38  ;;  %v1534_v44 = vor.u32 %v1800_v40, %v1531_v41  ;;  %v1561_v45 = vld [vmem:[%s2016_s13 + $0x50] sm:$0xf]  ;;  %v1808_v46 = vld [vmem:[%s2016_s13 + $0x58] sm:$0xf0]  ;;  %v1803_v52 = vld [vmem:[%s2016_s13 + $0x34] sm:$0xf] }
  0x19   : > { %878 = vmatpush.bf16.msra.mxu0 %v1849_v11  ;;  %1866 = vmatpush.bf16.msra.mxu3 %v1849_v11  ;;  %v1562_v47 = vor.u32 %v1808_v46, %v1561_v45  ;;  %v1541_v48 = vld [vmem:[%s2016_s13 + $0x30] sm:$0xf]  ;;  %v1804_v49 = vld [vmem:[%s2016_s13 + $0x38] sm:$0xf0]  ;;  %v1543_v53 = vld [vmem:[%s2016_s13 + $0x3c] sm:$0xf0] }
  0x1a   : > { %967 = vmatpush.bf16.msra.mxu1 %v1857_v12  ;;  %v1685_v50 = vld [vmem:[%s2016_s13 + $0x150] sm:$0xf]  ;;  %v1840_v51 = vld [vmem:[%s2016_s13 + $0x158] sm:$0xf0]  ;;  %v1542_v54 = vor.u32 %v1804_v49, %v1541_v48  ;;  %v1546_v56 = vor.u32 %v1803_v52, %v1543_v53  ;;  %v1573_v57 = vld [vmem:[%s2016_s13 + $0x68] sm:$0xf] }
  0x1b   : > { %v1686_v55 = vor.u32 %v1840_v51, %v1685_v50  ;;  %v1811_v58 = vld [vmem:[%s2016_s13 + $0x70] sm:$0xf0]  ;;  %v1553_v60 = vld [vmem:[%s2016_s13 + $0x48] sm:$0xf]  ;;  %v1806_v0 = vld [vmem:[%s2016_s13 + $0x4c] sm:$0xf] }
  0x1c   : > { %v1574_v59 = vor.u32 %v1811_v58, %v1573_v57  ;;  %v1807_v61 = vld [vmem:[%s2016_s13 + $0x50] sm:$0xf0]  ;;  %v1697_v62 = vld [vmem:[%s2016_s13 + $0x168] sm:$0xf]  ;;  %v1814_v6 = vld [vmem:[%s2016_s13 + $0x88] sm:$0xf0] }
  0x1d   : > { %879 = vmatpush.bf16.msra.mxu0 %v1848_v13  ;;  %1867 = vmatpush.bf16.msra.mxu3 %v1848_v13  ;;  %v1843_v63 = vld [vmem:[%s2016_s13 + $0x170] sm:$0xf0]  ;;  %v1565_v8 = vld [vmem:[%s2016_s13 + $0x60] sm:$0xf]  ;;  %v1810_v9 = vld [vmem:[%s2016_s13 + $0x68] sm:$0xf0] }
  0x1e   : > { %968 = vmatpush.bf16.msra.mxu1 %v1856_v14  ;;  %v1698_v3 = vor.u32 %v1843_v63, %v1697_v62  ;;  %v1833_v10 = vld [vmem:[%s2016_s13 + $0x124] sm:$0xf]  ;;  %v1663_v11 = vld [vmem:[%s2016_s13 + $0x12c] sm:$0xf0]  ;;  %v1597_v17 = vld [vmem:[%s2016_s13 + $0x98] sm:$0xf] }
  0x1f   : > { %v1567_v13 = vld [vmem:[%s2016_s13 + $0x6c] sm:$0xf0]  ;;  %v1817_v18 = vld [vmem:[%s2016_s13 + $0xa0] sm:$0xf0]  ;;  %v1675_v23 = vld [vmem:[%s2016_s13 + $0x144] sm:$0xf0] }
  0x20   : > { %v1812_v24 = vld [vmem:[%s2016_s13 + $0x7c] sm:$0xf]  ;;  %v1579_v25 = vld [vmem:[%s2016_s13 + $0x84] sm:$0xf0]  ;;  %v1609_v29 = vld [vmem:[%s2016_s13 + $0xb0] sm:$0xf] }
  0x21   : > { %880 = vmatpush.bf16.msra.mxu0 %v1847_v15  ;;  %1868 = vmatpush.bf16.msra.mxu3 %v1847_v15  ;;  %v1666_v15 = vor.u32 %v1833_v10, %v1663_v11  ;;  %v1582_v28 = vor.u32 %v1812_v24, %v1579_v25  ;;  %v1816_v33 = vld [vmem:[%s2016_s13 + $0x98] sm:$0xf0]  ;;  %v1839_v34 = vld [vmem:[%s2016_s13 + $0x154] sm:$0xf]  ;;  %v1591_v37 = vld [vmem:[%s2016_s13 + $0x9c] sm:$0xf0] }
  0x22   : > { %969 = vmatpush.bf16.msra.mxu1 %v1855_v16  ;;  %v1815_v36 = vld [vmem:[%s2016_s13 + $0x94] sm:$0xf]  ;;  %v1933_v38 = vmov 0.0   ;;  %v1601_v45 = vld [vmem:[%s2016_s13 + $0xa8] sm:$0xf] }
  0x23   : > { %314 = vst.msk [vmem:[#allocation2] sm:$0xff] %vm313_vm0, %v1933_v38  ;;  %v1594_v41 = vor.u32 %v1815_v36, %v1591_v37  ;;  %v1819_v46 = vld [vmem:[%s2016_s13 + $0xb0] sm:$0xf0]  ;;  %v1699_v48 = vld [vmem:[%s2016_s13 + $0x174] sm:$0xf0] }
  0x24   : > { %315 = vst.msk [vmem:[#allocation2 + $0x8] sm:$0xff] %vm313_vm0, %v1933_v38  ;;  %v1818_v49 = vld [vmem:[%s2016_s13 + $0xac] sm:$0xf]  ;;  %v1603_v50 = vld [vmem:[%s2016_s13 + $0xb4] sm:$0xf0]  ;;  %v1602_v51 = vor.u32 %v1819_v46, %v1601_v45 }
  0x25   : > { %881 = vmatpush.bf16.msra.mxu0 %v1846_v19  ;;  %1869 = vmatpush.bf16.msra.mxu3 %v1846_v19  ;;  %v1598_v19 = vor.u32 %v1817_v18, %v1597_v17  ;;  %316 = vst.msk [vmem:[#allocation2 + $0x10] sm:$0xff] %vm313_vm0, %v1933_v38  ;;  %v1841_v62 = vld [vmem:[%s2016_s13 + $0x160] sm:$0xf0]  ;;  %v1705_v24 = vld [vmem:[%s2016_s13 + $0x170] sm:$0xf] }
  0x26   : > { %970 = vmatpush.bf16.msra.mxu1 %v1854_v20  ;;  %1780 = vmatmul.msk.bf16.gmra.mxu2 %vm313_vm0, %v1538_v21  ;;  %v1813_v21 = vld [vmem:[%s2016_s13 + $0x80] sm:$0xf0]  ;;  %317 = vst.msk [vmem:[#allocation2 + $0x18] sm:$0xff] %vm313_vm0, %v1933_v38  ;;  %v1844_v25 = vld [vmem:[%s2016_s13 + $0x178] sm:$0xf0] }
  0x27   : > { %318 = vst.msk [vmem:[#allocation2 + $0x20] sm:$0xff] %vm313_vm0, %v1933_v38  ;;  %v1821_v63 = vld [vmem:[%s2016_s13 + $0xc4] sm:$0xf]  ;;  %v1657_v46 = vld [vmem:[%s2016_s13 + $0x110] sm:$0xf] }
  0x28   : > { %319 = vst.msk [vmem:[#allocation2 + $0x28] sm:$0xff] %vm313_vm0, %v1933_v38 }
  0x29   : > { %882 = vmatpush.bf16.msra.mxu0 %v1845_v22  ;;  %1870 = vmatpush.bf16.msra.mxu3 %v1845_v22  ;;  %v1836_v22 = vld [vmem:[%s2016_s13 + $0x13c] sm:$0xf]  ;;  %320 = vst.msk [vmem:[#allocation2 + $0x30] sm:$0xff] %vm313_vm0, %v1933_v38 }
  0x2a   : > { %971 = vmatpush.bf16.msra.mxu1 %v1853_v27  ;;  %321 = vst.msk [vmem:[#allocation2 + $0x38] sm:$0xff] %vm313_vm0, %v1933_v38 }
  0x2b   : > { %322 = vst.msk [vmem:[#allocation2 + $0x40] sm:$0xff] %vm313_vm0, %v1933_v38 }
  0x2c   : > { %883 = vmatmul.bf16.vlgmr.msra.gmra.mxu0 %v1518_v30  ;;  %943 = vmatmul.bf16.vlgmr.msra.gmra.mxu3 %v1662_v31  ;;  %v1820_v30 = vld [vmem:[%s2016_s13 + $0xb8] sm:$0xf0]  ;;  %323 = vst.msk [vmem:[#allocation2 + $0x48] sm:$0xff] %vm313_vm0, %v1933_v38 }
  0x2d   : > { %1871 = vmatpush.bf16.msrb.mxu3 %v1983_v1  ;;  %972 = vmatmul.bf16.vlgmr.msra.gmra.mxu1 %v1522_v32  ;;  %v1555_v1 = vld [vmem:[%s2016_s13 + $0x54] sm:$0xf0]  ;;  %v1610_v31 = vor.u32 %v1820_v30, %v1609_v29  ;;  %v1589_v32 = vld [vmem:[%s2016_s13 + $0x90] sm:$0xf]  ;;  %324 = vst.msk [vmem:[#allocation2 + $0x50] sm:$0xff] %vm313_vm0, %v1933_v38 }
  0x2e   : > { %v1590_v39 = vor.u32 %v1816_v33, %v1589_v32  ;;  %325 = vst.msk [vmem:[#allocation2 + $0x58] sm:$0xff] %vm313_vm0, %v1933_v38  ;;  %v1706_v33 = vor.u32 %v1844_v25, %v1705_v24 }
  0x2f   : > { %326 = vst.msk [vmem:[#allocation2 + $0x60] sm:$0xff] %vm313_vm0, %v1933_v38 }
  0x30   : > { %327 = vst.msk [vmem:[#allocation2 + $0x68] sm:$0xff] %vm313_vm0, %v1933_v38 }
  0x31   : > { %1872 = vmatpush.bf16.msrb.mxu3 %v1859_v4  ;;  %v1558_v4 = vor.u32 %v1806_v0, %v1555_v1  ;;  %328 = vst.msk [vmem:[#allocation2 + $0x70] sm:$0xff] %vm313_vm0, %v1933_v38  ;;  %v1615_v0 = vld [vmem:[%s2016_s13 + $0xcc] sm:$0xf0] }
  0x32   : > { %329 = vst.msk [vmem:[#allocation2 + $0x78] sm:$0xff] %vm313_vm0, %v1933_v38 }
  0x33   : > { %330 = vst.msk [vmem:[#allocation2 + $0x80] sm:$0xff] %vm313_vm0, %v1933_v38 }
  0x34   : > { %331 = vst.msk [vmem:[#allocation2 + $0x88] sm:$0xff] %vm313_vm0, %v1933_v38 }
  0x35   : > { %1873 = vmatpush.bf16.msrb.mxu3 %v1858_v7  ;;  %332 = vst.msk [vmem:[#allocation2 + $0x90] sm:$0xff] %vm313_vm0, %v1933_v38 }
  0x36   : > { %1781 = vmatmul.msk.bf16.gmra.mxu2 %vm313_vm0, %v1550_v35  ;;  %v1687_v35 = vld [vmem:[%s2016_s13 + $0x15c] sm:$0xf0]  ;;  %333 = vst.msk [vmem:[#allocation2 + $0x98] sm:$0xff] %vm313_vm0, %v1933_v38 }
  0x37   : > { %v1690_v40 = vor.u32 %v1839_v34, %v1687_v35  ;;  %334 = vst.msk [vmem:[#allocation2 + $0xa0] sm:$0xff] %vm313_vm0, %v1933_v38 }
  0x38   : > { %335 = vst.msk [vmem:[#allocation2 + $0xa8] sm:$0xff] %vm313_vm0, %v1933_v38 }
  0x39   : > { %1874 = vmatpush.bf16.msrb.mxu3 %v1857_v12  ;;  %v1809_v12 = vld [vmem:[%s2016_s13 + $0x64] sm:$0xf]  ;;  %336 = vst.msk [vmem:[#allocation2 + $0xb0] sm:$0xff] %vm313_vm0, %v1933_v38 }
  0x3a   : > { %337 = vst.msk [vmem:[#allocation2 + $0xb8] sm:$0xff] %vm313_vm0, %v1933_v38 }
  0x3b   : > { %338 = vst.msk [vmem:[#allocation2 + $0xc0] sm:$0xff] %vm313_vm0, %v1933_v38 }
  0x3c   : > { %888 = vmatmul.bf16.gmra.mxu0 %v1530_v42  ;;  %948 = vmatmul.bf16.gmra.mxu3 %v1674_v43  ;;  %v1621_v42 = vld [vmem:[%s2016_s13 + $0xc8] sm:$0xf]  ;;  %v1823_v43 = vld [vmem:[%s2016_s13 + $0xd0] sm:$0xf0]  ;;  %339 = vst.msk [vmem:[#allocation2 + $0xc8] sm:$0xff] %vm313_vm0, %v1933_v38 }
  0x3d   : > { %1875 = vmatpush.bf16.msrb.mxu3 %v1856_v14  ;;  %977 = vmatmul.bf16.gmra.mxu1 %v1534_v44  ;;  %v1566_v14 = vor.u32 %v1810_v9, %v1565_v8  ;;  %v1622_v44 = vor.u32 %v1823_v43, %v1621_v42  ;;  %340 = vst.msk [vmem:[#allocation2 + $0xd0] sm:$0xff] %vm313_vm0, %v1933_v38  ;;  %v346_v8 = vld [vmem:[#allocation2] sm:$0xff] }
  0x3e   : > { %341 = vst.msk [vmem:[#allocation2 + $0xd8] sm:$0xff] %vm313_vm0, %v1933_v38 }
  0x3f   : > { %342 = vst.msk [vmem:[#allocation2 + $0xe0] sm:$0xff] %vm313_vm0, %v1933_v38 }
  0x40   : > { %343 = vst.msk [vmem:[#allocation2 + $0xe8] sm:$0xff] %vm313_vm0, %v1933_v38 }
  0x41   : > { %1876 = vmatpush.bf16.msrb.mxu3 %v1855_v16  ;;  %v1570_v16 = vor.u32 %v1809_v12, %v1567_v13  ;;  %344 = vst.msk [vmem:[#allocation2 + $0xf0] sm:$0xff] %vm313_vm0, %v1933_v38  ;;  %v1645_v12 = vld [vmem:[%s2016_s13 + $0xf8] sm:$0xf]  ;;  %v1829_v13 = vld [vmem:[%s2016_s13 + $0x100] sm:$0xf0] }
  0x42   : > { %345 = vst.msk [vmem:[#allocation2 + $0xf8] sm:$0xff] %vm313_vm0, %v1933_v38  ;;  %v1646_v17 = vor.u32 %v1829_v13, %v1645_v12 }
  0x45   : > { %1877 = vmatpush.bf16.msrb.mxu3 %v1854_v20  ;;  %v1577_v20 = vld [vmem:[%s2016_s13 + $0x78] sm:$0xf] }
  0x46   : > { %1782 = vmatmul.msk.bf16.gmra.mxu2 %vm313_vm0, %v1562_v47  ;;  %v1578_v26 = vor.u32 %v1813_v21, %v1577_v20  ;;  %v1842_v47 = vld [vmem:[%s2016_s13 + $0x16c] sm:$0xf]  ;;  %v1625_v21 = vld [vmem:[%s2016_s13 + $0xd8] sm:$0xf] }
  0x47   : > { %v1702_v52 = vor.u32 %v1842_v47, %v1699_v48  ;;  %v347_v20 = vld [vmem:[#allocation2 + $0x8] sm:$0xff]  ;;  %v1832_v47 = vld [vmem:[%s2016_s13 + $0x118] sm:$0xf0] }
  0x49   : > { %1878 = vmatpush.bf16.msrb.mxu3 %v1853_v27  ;;  %v1678_v27 = vor.u32 %v1836_v22, %v1675_v23  ;;  %v1825_v23 = vld [vmem:[%s2016_s13 + $0xe0] sm:$0xf0] }
  0x4a   : > { %v1626_v32 = vor.u32 %v1825_v23, %v1625_v21 }
  0x4c   : > { %893 = vmatmul.bf16.gmra.mxu0 %v1542_v54  ;;  %953 = vmatmul.bf16.gmra.mxu3 %v1686_v55  ;;  %v1606_v54 = vor.u32 %v1818_v49, %v1603_v50  ;;  %v1633_v55 = vld [vmem:[%s2016_s13 + $0xe0] sm:$0xf] }
  0x4d   : > { %1879 = vmatpush.bf16.msra.mxu3 %v1988_v2  ;;  %982 = vmatmul.bf16.gmra.mxu1 %v1546_v56  ;;  %v1554_v2 = vor.u32 %v1807_v61, %v1553_v60  ;;  %v1826_v56 = vld [vmem:[%s2016_s13 + $0xe8] sm:$0xf0]  ;;  %v1693_v61 = vld [vmem:[%s2016_s13 + $0x158] sm:$0xf] }
  0x4e   : > { %v1634_v58 = vor.u32 %v1826_v56, %v1633_v55  ;;  %v1822_v60 = vld [vmem:[%s2016_s13 + $0xc8] sm:$0xf0]  ;;  %v349_v56 = vld [vmem:[#allocation2 + $0x18] sm:$0xff] }
  0x51   : > { %1880 = vmatpush.bf16.msra.mxu3 %v2001_v5  ;;  %v1585_v5 = vld [vmem:[%s2016_s13 + $0x80] sm:$0xf] }
  0x52   : > { %v1586_v7 = vor.u32 %v1814_v6, %v1585_v5  ;;  %v1618_v5 = vor.u32 %v1821_v63, %v1615_v0 }
  0x56   : > { %1783 = vmatmul.msk.bf16.gmra.mxu2 %vm313_vm0, %v1574_v59  ;;  %v1613_v59 = vld [vmem:[%s2016_s13 + $0xc0] sm:$0xf] }
  0x57   : > { %v1614_v1 = vor.u32 %v1822_v60, %v1613_v59  ;;  %v1637_v59 = vld [vmem:[%s2016_s13 + $0xf0] sm:$0xf]  ;;  %v1828_v60 = vld [vmem:[%s2016_s13 + $0xf8] sm:$0xf0] }
  0x5c   : > { %898 = vmatmul.bf16.gmra.mxu0 %v1554_v2  ;;  %958 = vmatmul.bf16.gmra.mxu3 %v1698_v3  ;;  %v1694_v2 = vor.u32 %v1841_v62, %v1693_v61  ;;  %v1827_v61 = vld [vmem:[%s2016_s13 + $0xf4] sm:$0xf]  ;;  %v1639_v62 = vld [vmem:[%s2016_s13 + $0xfc] sm:$0xf0] }
  0x5d   : > { %987 = vmatmul.bf16.gmra.mxu1 %v1558_v4 }
  0x66   : > { %1784 = vmatmul.msk.bf16.gmra.mxu2 %vm313_vm0, %v1586_v7 }
  0x6c   : > { %903 = vmatmul.bf16.gmra.mxu0 %v1566_v14  ;;  %1032 = vmatmul.bf16.vlgmr.msrb.gmra.mxu3 %v1666_v15 }
  0x6d   : > { %992 = vmatmul.bf16.gmra.mxu1 %v1570_v16 }
  0x76   : > { %1785 = vmatmul.msk.bf16.gmra.mxu2 %vm313_vm0, %v1598_v19  ;;  %v2208_v19 = vld [vmem:[%s2457_s3] ss:$0 sm:$0xff] }
  0x7c   : > { %908 = vmatmul.bf16.gmra.mxu0 %v1578_v26  ;;  %1037 = vmatmul.bf16.gmra.mxu3 %v1678_v27  ;;  %v1824_v26 = vld [vmem:[%s2016_s13 + $0xdc] sm:$0xf]  ;;  %v1627_v27 = vld [vmem:[%s2016_s13 + $0xe4] sm:$0xf0] }
  0x7d   : > { %997 = vmatmul.bf16.gmra.mxu1 %v1582_v28  ;;  %v2220_v28 = vld [vmem:[%s2456_s2] ss:$0 sm:$0xff]  ;;  %v1630_v37 = vor.u32 %v1824_v26, %v1627_v27  ;;  %v351_v27 = vld [vmem:[#allocation2 + $0x28] sm:$0xff] }
  0x86   : > { %1786 = vmatmul.msk.bf16.gmra.mxu2 %vm313_vm0, %v1610_v31 }
  0x8c   : > { %913 = vmatmul.bf16.gmra.mxu0 %v1590_v39  ;;  %1042 = vmatmul.bf16.gmra.mxu3 %v1690_v40 }
  0x8d   : > { %1002 = vmatmul.bf16.gmra.mxu1 %v1594_v41  ;;  %v348_v41 = vld [vmem:[#allocation2 + $0x10] sm:$0xff] }
  0x96   : > { %1787 = vmatmul.msk.bf16.gmra.mxu2 %vm313_vm0, %v1622_v44 }
  0x99   : > { %v1062_v53 = vpop.f32.mrf.mxu2 }
  0x9c   : > { %918 = vmatmul.bf16.gmra.mxu0 %v1602_v51  ;;  %1047 = vmatmul.bf16.gmra.mxu3 %v1702_v52 }
  0x9d   : > { %1007 = vmatmul.bf16.gmra.mxu1 %v1606_v54 }
  0xa1   : > { %v1064_v57 = vpop.f32.mrf.mxu2 }
  0xa6   : > { %1788 = vmatmul.msk.bf16.gmra.mxu2 %vm313_vm0, %v1634_v58 }
  0xa9   : > { %v1067_v3 = vpop.f32.mrf.mxu2  ;;  %v884_v4 = vpop.f32.mrf.mxu0 }
  0xaa   : > { %v973_v6 = vpop.f32.mrf.mxu1 }
  0xab   : > { %v974_v7 = vadd.f32 %v973_v6, %v884_v4  ;;  %v1642_v6 = vor.u32 %v1827_v61, %v1639_v62 }
  0xac   : > { %923 = vmatmul.bf16.gmra.mxu0 %v1614_v1  ;;  %1793 = vmatmul.msk.bf16.vlgmr.msra.gmra.mxu3 %vm313_vm0, %v1694_v2  ;;  %v1638_v2 = vor.u32 %v1828_v60, %v1637_v59 }
  0xad   : > { %v1063_v9 = vadd.f32 %v1062_v53, %v974_v7  ;;  %1012 = vmatmul.bf16.gmra.mxu1 %v1618_v5  ;;  %v1658_v53 = vor.u32 %v1832_v47, %v1657_v46 }
  0xaf   : > { %v1142_v10 = vadd.f32 %v1063_v9, %v346_v8  ;;  %v2200_v11 = vpop.f32.mrf.mxu3 }
  0xb1   : > { %1174 = vst.msk [vmem:[#allocation2] sm:$0xff] %vm313_vm0, %v1142_v10  ;;  %v1069_v14 = vpop.f32.mrf.mxu2  ;;  %v886_v15 = vpop.f32.mrf.mxu0  ;;  %v350_v10 = vld [vmem:[#allocation2 + $0x20] sm:$0xff] }
  0xb2   : > { %v975_v16 = vpop.f32.mrf.mxu1 }
  0xb3   : > { %v976_v18 = vadd.f32 %v975_v16, %v886_v15  ;;  %v1669_v16 = vld [vmem:[%s2016_s13 + $0x128] sm:$0xf] }
  0xb5   : > { %v1065_v22 = vadd.f32 %v1064_v57, %v976_v18 }
  0xb6   : > { %1789 = vmatmul.msk.bf16.gmra.mxu2 %vm313_vm0, %v1646_v17  ;;  %v1835_v17 = vld [vmem:[%s2016_s13 + $0x130] sm:$0xf0] }
  0xb7   : > { %v1143_v29 = vadd.f32 %v1065_v22, %v347_v20  ;;  %v2222_v30 = vpop.f32.mrf.mxu3  ;;  %v1670_v24 = vor.u32 %v1835_v17, %v1669_v16 }
  0xb8   : > { %v1209_v31 = vld [vmem:[#allocation2] sm:$0xff] }
  0xb9   : > { %v1245_v34 = vmul.f32 %v2208_v19, %v1209_v31  ;;  %1175 = vst.msk [vmem:[#allocation2 + $0x8] sm:$0xff] %vm313_vm0, %v1143_v29  ;;  %v1072_v35 = vpop.f32.mrf.mxu2  ;;  %v889_v36 = vpop.f32.mrf.mxu0 }
  0xba   : > { %v978_v38 = vpop.f32.mrf.mxu1 }
  0xbb   : > { %v1281_v39 = vadd.f32 %v2220_v28, %v1245_v34  ;;  %v979_v40 = vadd.f32 %v978_v38, %v889_v36  ;;  %v1830_v34 = vld [vmem:[%s2016_s13 + $0x10c] sm:$0xf] }
  0xbc   : > { %928 = vmatmul.bf16.gmra.mxu0 %v1626_v32  ;;  %1794 = vmatmul.msk.bf16.gmra.mxu3 %vm313_vm0, %v1706_v33  ;;  %v1649_v32 = vld [vmem:[%s2016_s13 + $0x108] sm:$0xf]  ;;  %v1831_v33 = vld [vmem:[%s2016_s13 + $0x110] sm:$0xf0] }
  0xbd   : > { %v1313_v42 = vmax.f32 %v1281_v39, 0.0  ;;  %v1068_v43 = vadd.f32 %v1067_v3, %v979_v40  ;;  %1017 = vmatmul.bf16.gmra.mxu1 %v1630_v37  ;;  %v1650_v39 = vor.u32 %v1831_v33, %v1649_v32 }
  0xbf   : > { %1345 = vst.msk [vmem:[%s2231_s23] sm:$0xff] %vm313_vm0, %v1313_v42  ;;  %v1144_v44 = vadd.f32 %v1068_v43, %v348_v41  ;;  %v2236_v45 = vpop.f32.mrf.mxu3 }
  0xc0   : > { %v1210_v48 = vld [vmem:[#allocation2 + $0x8] sm:$0xff] }
  0xc1   : > { %v1246_v49 = vmul.f32 %v2208_v19, %v1210_v48  ;;  %1176 = vst.msk [vmem:[#allocation2 + $0x10] sm:$0xff] %vm313_vm0, %v1144_v44  ;;  %v1074_v50 = vpop.f32.mrf.mxu2  ;;  %v891_v51 = vpop.f32.mrf.mxu0  ;;  %v352_v48 = vld [vmem:[#allocation2 + $0x30] sm:$0xff] }
  0xc2   : > { %v980_v52 = vpop.f32.mrf.mxu1 }
  0xc3   : > { %v1282_v54 = vadd.f32 %v2220_v28, %v1246_v49  ;;  %v981_v55 = vadd.f32 %v980_v52, %v891_v51 }
  0xc5   : > { %v1314_v57 = vmax.f32 %v1282_v54, 0.0  ;;  %v1070_v58 = vadd.f32 %v1069_v14, %v981_v55  ;;  %v1838_v54 = vld [vmem:[%s2016_s13 + $0x148] sm:$0xf0] }
  0xc6   : > { %1790 = vmatmul.msk.bf16.gmra.mxu2 %vm313_vm0, %v1658_v53  ;;  %v1681_v53 = vld [vmem:[%s2016_s13 + $0x140] sm:$0xf] }
  0xc7   : > { %1346 = vst.msk [vmem:[%s2231_s23 + $0x8] sm:$0xff] %vm313_vm0, %v1314_v57  ;;  %v1145_v63 = vadd.f32 %v1070_v58, %v349_v56  ;;  %v2250_v0 = vpop.f32.mrf.mxu3  ;;  %v1682_v60 = vor.u32 %v1838_v54, %v1681_v53 }
  0xc8   : > { %v1211_v1 = vld [vmem:[#allocation2 + $0x10] sm:$0xff] }
  0xc9   : > { %v1247_v3 = vmul.f32 %v2208_v19, %v1211_v1  ;;  %1177 = vst.msk [vmem:[#allocation2 + $0x18] sm:$0xff] %vm313_vm0, %v1145_v63  ;;  %v1077_v4 = vpop.f32.mrf.mxu2  ;;  %v894_v5 = vpop.f32.mrf.mxu0  ;;  %v353_v63 = vld [vmem:[#allocation2 + $0x38] sm:$0xff] }
  0xca   : > { %v983_v7 = vpop.f32.mrf.mxu1 }
  0xcb   : > { %v1283_v8 = vadd.f32 %v2220_v28, %v1247_v3  ;;  %v984_v9 = vadd.f32 %v983_v7, %v894_v5 }
  0xcc   : > { %933 = vmatmul.bf16.gmra.mxu0 %v1638_v2 }
  0xcd   : > { %v1315_v12 = vmax.f32 %v1283_v8, 0.0  ;;  %v1073_v13 = vadd.f32 %v1072_v35, %v984_v9  ;;  %1022 = vmatmul.bf16.gmra.mxu1 %v1642_v6  ;;  %v1651_v35 = vld [vmem:[%s2016_s13 + $0x114] sm:$0xf0] }
  0xce   : > { %v1654_v43 = vor.u32 %v1830_v34, %v1651_v35 }
  0xcf   : > { %1347 = vst.msk [vmem:[%s2231_s23 + $0x10] sm:$0xff] %vm313_vm0, %v1315_v12  ;;  %v1146_v14 = vadd.f32 %v1073_v13, %v350_v10  ;;  %v2257_v15 = vpop.f32.mrf.mxu3  ;;  %v354_v13 = vld [vmem:[#allocation2 + $0x40] sm:$0xff] }
  0xd0   : > { %v1212_v18 = vld [vmem:[#allocation2 + $0x18] sm:$0xff] }
  0xd1   : > { %v1248_v20 = vmul.f32 %v2208_v19, %v1212_v18  ;;  %1178 = vst.msk [vmem:[#allocation2 + $0x20] sm:$0xff] %vm313_vm0, %v1146_v14  ;;  %v1079_v21 = vpop.f32.mrf.mxu2  ;;  %v896_v22 = vpop.f32.mrf.mxu0 }
  0xd2   : > { %v985_v23 = vpop.f32.mrf.mxu1 }
  0xd3   : > { %v1284_v25 = vadd.f32 %v2220_v28, %v1248_v20  ;;  %v986_v26 = vadd.f32 %v985_v23, %v896_v22 }
  0xd5   : > { %v1316_v29 = vmax.f32 %v1284_v25, 0.0  ;;  %v1075_v31 = vadd.f32 %v1074_v50, %v986_v26 }
  0xd6   : > { %1791 = vmatmul.msk.bf16.gmra.mxu2 %vm313_vm0, %v1670_v24 }
  0xd7   : > { %1348 = vst.msk [vmem:[%s2231_s23 + $0x18] sm:$0xff] %vm313_vm0, %v1316_v29  ;;  %v1147_v36 = vadd.f32 %v1075_v31, %v351_v27  ;;  %v2271_v37 = vpop.f32.mrf.mxu3  ;;  %v355_v29 = vld [vmem:[#allocation2 + $0x48] sm:$0xff] }
  0xd8   : > { %v1213_v38 = vld [vmem:[#allocation2 + $0x20] sm:$0xff] }
  0xd9   : > { %v1249_v40 = vmul.f32 %v2208_v19, %v1213_v38  ;;  %1179 = vst.msk [vmem:[#allocation2 + $0x28] sm:$0xff] %vm313_vm0, %v1147_v36  ;;  %v1082_v41 = vpop.f32.mrf.mxu2  ;;  %v899_v42 = vpop.f32.mrf.mxu0 }
  0xda   : > { %v988_v44 = vpop.f32.mrf.mxu1 }
  0xdb   : > { %v1285_v46 = vadd.f32 %v2220_v28, %v1249_v40  ;;  %v989_v47 = vadd.f32 %v988_v44, %v899_v42 }
  0xdc   : > { %938 = vmatmul.bf16.gmra.mxu0 %v1650_v39 }
  0xdd   : > { %v1317_v49 = vmax.f32 %v1285_v46, 0.0  ;;  %v1078_v50 = vadd.f32 %v1077_v4, %v989_v47  ;;  %1027 = vmatmul.bf16.gmra.mxu1 %v1654_v43  ;;  %v356_v43 = vld [vmem:[#allocation2 + $0x50] sm:$0xff] }
  0xdf   : > { %1349 = vst.msk [vmem:[%s2231_s23 + $0x20] sm:$0xff] %vm313_vm0, %v1317_v49  ;;  %v1148_v51 = vadd.f32 %v1078_v50, %v352_v48  ;;  %v2278_v52 = vpop.f32.mrf.mxu3 }
  0xe0   : > { %v1214_v55 = vld [vmem:[#allocation2 + $0x28] sm:$0xff] }
  0xe1   : > { %v1250_v56 = vmul.f32 %v2208_v19, %v1214_v55  ;;  %1180 = vst.msk [vmem:[#allocation2 + $0x30] sm:$0xff] %vm313_vm0, %v1148_v51  ;;  %v1084_v57 = vpop.f32.mrf.mxu2  ;;  %v901_v58 = vpop.f32.mrf.mxu0 }
  0xe2   : > { %v990_v59 = vpop.f32.mrf.mxu1 }
  0xe3   : > { %v1286_v61 = vadd.f32 %v2220_v28, %v1250_v56  ;;  %v991_v62 = vadd.f32 %v990_v59, %v901_v58 }
  0xe5   : > { %v1318_v1 = vmax.f32 %v1286_v61, 0.0  ;;  %v1080_v2 = vadd.f32 %v1079_v21, %v991_v62 }
  0xe6   : > { %1792 = vmatmul.msk.bf16.gmra.mxu2 %vm313_vm0, %v1682_v60 }
  0xe7   : > { %1350 = vst.msk [vmem:[%s2231_s23 + $0x28] sm:$0xff] %vm313_vm0, %v1318_v1  ;;  %v1149_v3 = vadd.f32 %v1080_v2, %v353_v63  ;;  %v2288_v4 = vpop.f32.mrf.mxu3 }
  0xe8   : > { %v1215_v5 = vld [vmem:[#allocation2 + $0x30] sm:$0xff] }
  0xe9   : > { %v1251_v6 = vmul.f32 %v2208_v19, %v1215_v5  ;;  %1181 = vst.msk [vmem:[#allocation2 + $0x38] sm:$0xff] %vm313_vm0, %v1149_v3  ;;  %v1087_v7 = vpop.f32.mrf.mxu2  ;;  %v904_v8 = vpop.f32.mrf.mxu0 }
  0xea   : > { %v993_v9 = vpop.f32.mrf.mxu1 }
  0xeb   : > { %v1287_v10 = vadd.f32 %v2220_v28, %v1251_v6  ;;  %v994_v12 = vadd.f32 %v993_v9, %v904_v8 }
  0xed   : > { %v1319_v14 = vmax.f32 %v1287_v10, 0.0  ;;  %v1083_v16 = vadd.f32 %v1082_v41, %v994_v12 }
  0xef   : > { %1351 = vst.msk [vmem:[%s2231_s23 + $0x30] sm:$0xff] %vm313_vm0, %v1319_v14  ;;  %v1150_v17 = vadd.f32 %v1083_v16, %v354_v13  ;;  %v1033_v18 = vpop.f32.mrf.mxu3 }
  0xf0   : > { %v1216_v20 = vld [vmem:[#allocation2 + $0x38] sm:$0xff]  ;;  %v2296_v21 = vadd.f32 %v1033_v18, %v2200_v11 }
  0xf1   : > { %v1252_v22 = vmul.f32 %v2208_v19, %v1216_v20  ;;  %1182 = vst.msk [vmem:[#allocation2 + $0x40] sm:$0xff] %vm313_vm0, %v1150_v17  ;;  %v1089_v23 = vpop.f32.mrf.mxu2  ;;  %v906_v24 = vpop.f32.mrf.mxu0 }
  0xf2   : > { %v995_v25 = vpop.f32.mrf.mxu1 }
  0xf3   : > { %v1288_v26 = vadd.f32 %v2220_v28, %v1252_v22  ;;  %v996_v27 = vadd.f32 %v995_v25, %v906_v24  ;;  %v359_v22 = vld [vmem:[#allocation2 + $0x68] sm:$0xff] }
  0xf5   : > { %v1320_v31 = vmax.f32 %v1288_v26, 0.0  ;;  %v1085_v32 = vadd.f32 %v1084_v57, %v996_v27  ;;  %v357_v57 = vld [vmem:[#allocation2 + $0x58] sm:$0xff] }
  0xf7   : > { %1352 = vst.msk [vmem:[%s2231_s23 + $0x38] sm:$0xff] %vm313_vm0, %v1320_v31  ;;  %v1151_v33 = vadd.f32 %v1085_v32, %v355_v29  ;;  %v1035_v34 = vpop.f32.mrf.mxu3 }
  0xf8   : > { %v1217_v11 = vld [vmem:[#allocation2 + $0x40] sm:$0xff]  ;;  %v2304_v35 = vadd.f32 %v1035_v34, %v2222_v30 }
  0xf9   : > { %v1253_v36 = vmul.f32 %v2208_v19, %v1217_v11  ;;  %1183 = vst.msk [vmem:[#allocation2 + $0x48] sm:$0xff] %vm313_vm0, %v1151_v33  ;;  %v1092_v38 = vpop.f32.mrf.mxu2  ;;  %v909_v39 = vpop.f32.mrf.mxu0 }
  0xfa   : > { %v998_v40 = vpop.f32.mrf.mxu1 }
  0xfb   : > { %v1289_v41 = vadd.f32 %v2220_v28, %v1253_v36  ;;  %v999_v42 = vadd.f32 %v998_v40, %v909_v39  ;;  %v360_v36 = vld [vmem:[#allocation2 + $0x70] sm:$0xff] }
  0xfd   : > { %v1321_v44 = vmax.f32 %v1289_v41, 0.0  ;;  %v1088_v46 = vadd.f32 %v1087_v7, %v999_v42  ;;  %v358_v7 = vld [vmem:[#allocation2 + $0x60] sm:$0xff] }
  0xff   : > { %1353 = vst.msk [vmem:[%s2231_s23 + $0x40] sm:$0xff] %vm313_vm0, %v1321_v44  ;;  %v1152_v47 = vadd.f32 %v1088_v46, %v356_v43  ;;  %v1038_v48 = vpop.f32.mrf.mxu3 }
 0x100   : > { %v1218_v30 = vld [vmem:[#allocation2 + $0x48] sm:$0xff]  ;;  %v2312_v49 = vadd.f32 %v1038_v48, %v2236_v45 }
 0x101   : > { %v1254_v50 = vmul.f32 %v2208_v19, %v1218_v30  ;;  %1184 = vst.msk [vmem:[#allocation2 + $0x50] sm:$0xff] %vm313_vm0, %v1152_v47  ;;  %v1094_v51 = vpop.f32.mrf.mxu2  ;;  %v911_v53 = vpop.f32.mrf.mxu0 }
 0x102   : > { %v1000_v54 = vpop.f32.mrf.mxu1 }
 0x103   : > { %v1290_v55 = vadd.f32 %v2220_v28, %v1254_v50  ;;  %v1001_v56 = vadd.f32 %v1000_v54, %v911_v53  ;;  %v361_v50 = vld [vmem:[#allocation2 + $0x78] sm:$0xff] }
 0x105   : > { %v1322_v58 = vmax.f32 %v1290_v55, 0.0  ;;  %v1090_v59 = vadd.f32 %v1089_v23, %v1001_v56 }
 0x107   : > { %1354 = vst.msk [vmem:[%s2231_s23 + $0x48] sm:$0xff] %vm313_vm0, %v1322_v58  ;;  %v1153_v60 = vadd.f32 %v1090_v59, %v357_v57  ;;  %v1040_v61 = vpop.f32.mrf.mxu3 }
 0x108   : > { %v1219_v45 = vld [vmem:[#allocation2 + $0x50] sm:$0xff]  ;;  %v2320_v62 = vadd.f32 %v1040_v61, %v2250_v0 }
 0x109   : > { %v1255_v63 = vmul.f32 %v2208_v19, %v1219_v45  ;;  %1185 = vst.msk [vmem:[#allocation2 + $0x58] sm:$0xff] %vm313_vm0, %v1153_v60  ;;  %v1097_v1 = vpop.f32.mrf.mxu2  ;;  %v914_v2 = vpop.f32.mrf.mxu0 }
 0x10a   : > { %v1003_v3 = vpop.f32.mrf.mxu1 }
 0x10b   : > { %v1291_v5 = vadd.f32 %v2220_v28, %v1255_v63  ;;  %v1004_v6 = vadd.f32 %v1003_v3, %v914_v2  ;;  %v362_v63 = vld [vmem:[#allocation2 + $0x80] sm:$0xff] }
 0x10d   : > { %v1323_v8 = vmax.f32 %v1291_v5, 0.0  ;;  %v1093_v9 = vadd.f32 %v1092_v38, %v1004_v6  ;;  %v374_v6 = vld [vmem:[#allocation2 + $0xe0] sm:$0xff] }
 0x10f   : > { %1355 = vst.msk [vmem:[%s2231_s23 + $0x50] sm:$0xff] %vm313_vm0, %v1323_v8  ;;  %v1154_v10 = vadd.f32 %v1093_v9, %v358_v7  ;;  %v1043_v12 = vpop.f32.mrf.mxu3 }
 0x110   : > { %v1220_v0 = vld [vmem:[#allocation2 + $0x58] sm:$0xff]  ;;  %v1044_v3 = vadd.f32 %v1043_v12, %v2257_v15  ;;  %v363_v15 = vld [vmem:[#allocation2 + $0x88] sm:$0xff] }
 0x111   : > { %v1256_v13 = vmul.f32 %v2208_v19, %v1220_v0  ;;  %1186 = vst.msk [vmem:[#allocation2 + $0x60] sm:$0xff] %vm313_vm0, %v1154_v10  ;;  %v1099_v14 = vpop.f32.mrf.mxu2  ;;  %v916_v16 = vpop.f32.mrf.mxu0 }
 0x112   : > { %v1005_v17 = vpop.f32.mrf.mxu1 }
 0x113   : > { %v1292_v18 = vadd.f32 %v2220_v28, %v1256_v13  ;;  %v1006_v20 = vadd.f32 %v1005_v17, %v916_v16 }
 0x115   : > { %v1324_v23 = vmax.f32 %v1292_v18, 0.0  ;;  %v1095_v24 = vadd.f32 %v1094_v51, %v1006_v20 }
 0x117   : > { %1356 = vst.msk [vmem:[%s2231_s23 + $0x58] sm:$0xff] %vm313_vm0, %v1324_v23  ;;  %v1155_v25 = vadd.f32 %v1095_v24, %v359_v22  ;;  %v1045_v26 = vpop.f32.mrf.mxu3  ;;  %v375_v24 = vld [vmem:[#allocation2 + $0xe8] sm:$0xff] }
 0x118   : > { %v1221_v27 = vld [vmem:[#allocation2 + $0x60] sm:$0xff]  ;;  %v1046_v22 = vadd.f32 %v1045_v26, %v2271_v37 }
 0x119   : > { %v1257_v29 = vmul.f32 %v2208_v19, %v1221_v27  ;;  %1187 = vst.msk [vmem:[#allocation2 + $0x68] sm:$0xff] %vm313_vm0, %v1155_v25  ;;  %v1102_v31 = vpop.f32.mrf.mxu2  ;;  %v919_v32 = vpop.f32.mrf.mxu0 }
 0x11a   : > { %v1008_v33 = vpop.f32.mrf.mxu1 }
 0x11b   : > { %v1293_v34 = vadd.f32 %v2220_v28, %v1257_v29  ;;  %v1009_v11 = vadd.f32 %v1008_v33, %v919_v32 }
 0x11d   : > { %v1325_v38 = vmax.f32 %v1293_v34, 0.0  ;;  %v1098_v39 = vadd.f32 %v1097_v1, %v1009_v11 }
 0x11f   : > { %1357 = vst.msk [vmem:[%s2231_s23 + $0x60] sm:$0xff] %vm313_vm0, %v1325_v38  ;;  %v1156_v40 = vadd.f32 %v1098_v39, %v360_v36  ;;  %v2337_v41 = vpop.f32.mrf.mxu3  ;;  %v364_v39 = vld [vmem:[#allocation2 + $0x90] sm:$0xff] }
 0x120   : > { %v1222_v42 = vld [vmem:[#allocation2 + $0x68] sm:$0xff] }
 0x121   : > { %v1258_v43 = vmul.f32 %v2208_v19, %v1222_v42  ;;  %1188 = vst.msk [vmem:[#allocation2 + $0x70] sm:$0xff] %vm313_vm0, %v1156_v40  ;;  %v1104_v44 = vpop.f32.mrf.mxu2  ;;  %v921_v46 = vpop.f32.mrf.mxu0 }
 0x122   : > { %v1010_v47 = vpop.f32.mrf.mxu1 }
 0x123   : > { %v1294_v48 = vadd.f32 %v2220_v28, %v1258_v43  ;;  %v1011_v30 = vadd.f32 %v1010_v47, %v921_v46  ;;  %v1049_v43 = vadd.f32 %v2337_v41, %v2278_v52  ;;  %v376_v47 = vld [vmem:[#allocation2 + $0xf0] sm:$0xff] }
 0x125   : > { %v1326_v51 = vmax.f32 %v1294_v48, 0.0  ;;  %v1100_v53 = vadd.f32 %v1099_v14, %v1011_v30 }
 0x127   : > { %1358 = vst.msk [vmem:[%s2231_s23 + $0x68] sm:$0xff] %vm313_vm0, %v1326_v51  ;;  %v1157_v54 = vadd.f32 %v1100_v53, %v361_v50  ;;  %v2344_v55 = vpop.f32.mrf.mxu3 }
 0x128   : > { %v1223_v56 = vld [vmem:[#allocation2 + $0x70] sm:$0xff] }
 0x129   : > { %v1259_v57 = vmul.f32 %v2208_v19, %v1223_v56  ;;  %1189 = vst.msk [vmem:[#allocation2 + $0x78] sm:$0xff] %vm313_vm0, %v1157_v54  ;;  %v1107_v58 = vpop.f32.mrf.mxu2  ;;  %v924_v59 = vpop.f32.mrf.mxu0 }
 0x12a   : > { %v1013_v60 = vpop.f32.mrf.mxu1 }
 0x12b   : > { %v1295_v61 = vadd.f32 %v2220_v28, %v1259_v57  ;;  %v1014_v45 = vadd.f32 %v1013_v60, %v924_v59 }
 0x12d   : > { %v1327_v1 = vmax.f32 %v1295_v61, 0.0  ;;  %v1103_v2 = vadd.f32 %v1102_v31, %v1014_v45  ;;  %v365_v61 = vld [vmem:[#allocation2 + $0x98] sm:$0xff] }
 0x12f   : > { %1359 = vst.msk [vmem:[%s2231_s23 + $0x70] sm:$0xff] %vm313_vm0, %v1327_v1  ;;  %v1158_v5 = vadd.f32 %v1103_v2, %v362_v63  ;;  %v1132_v7 = vpop.f32.mrf.mxu3  ;;  %v1051_v1 = vadd.f32 %v2344_v55, %v2288_v4 }
 0x130   : > { %v1224_v8 = vld [vmem:[#allocation2 + $0x78] sm:$0xff]  ;;  %v1133_v9 = vadd.f32 %v1132_v7, %v1044_v3 }
 0x131   : > { %v1260_v10 = vmul.f32 %v2208_v19, %v1224_v8  ;;  %1190 = vst.msk [vmem:[#allocation2 + $0x80] sm:$0xff] %vm313_vm0, %v1158_v5  ;;  %v1109_v0 = vpop.f32.mrf.mxu2  ;;  %v926_v13 = vpop.f32.mrf.mxu0  ;;  %v377_v5 = vld [vmem:[#allocation2 + $0xf8] sm:$0xff] }
 0x132   : > { %v1170_v14 = vadd.f32 %v1133_v9, %v374_v6  ;;  %v1015_v16 = vpop.f32.mrf.mxu1 }
 0x133   : > { %v1296_v17 = vadd.f32 %v2220_v28, %v1260_v10  ;;  %v1016_v18 = vadd.f32 %v1015_v16, %v926_v13 }
 0x134   : > { %1202 = vst.msk [vmem:[#allocation2 + $0xe0] sm:$0xff] %vm313_vm0, %v1170_v14 }
 0x135   : > { %v1328_v12 = vmax.f32 %v1296_v17, 0.0  ;;  %v1105_v20 = vadd.f32 %v1104_v44, %v1016_v18 }
 0x137   : > { %1360 = vst.msk [vmem:[%s2231_s23 + $0x78] sm:$0xff] %vm313_vm0, %v1328_v12  ;;  %v1159_v23 = vadd.f32 %v1105_v20, %v363_v15  ;;  %v1134_v25 = vpop.f32.mrf.mxu3  ;;  %v366_v15 = vld [vmem:[#allocation2 + $0xa0] sm:$0xff] }
 0x138   : > { %v1225_v27 = vld [vmem:[#allocation2 + $0x80] sm:$0xff]  ;;  %v1135_v29 = vadd.f32 %v1134_v25, %v1046_v22 }
 0x139   : > { %v1261_v31 = vmul.f32 %v2208_v19, %v1225_v27  ;;  %1191 = vst.msk [vmem:[#allocation2 + $0x88] sm:$0xff] %vm313_vm0, %v1159_v23  ;;  %v1112_v32 = vpop.f32.mrf.mxu2  ;;  %v929_v33 = vpop.f32.mrf.mxu0 }
 0x13a   : > { %v1171_v34 = vadd.f32 %v1135_v29, %v375_v24  ;;  %v1018_v11 = vpop.f32.mrf.mxu1 }
 0x13b   : > { %v1297_v36 = vadd.f32 %v2220_v28, %v1261_v31  ;;  %v1237_v38 = vld [vmem:[#allocation2 + $0xe0] sm:$0xff]  ;;  %v1019_v37 = vadd.f32 %v1018_v11, %v929_v33 }
 0x13c   : > { %v1273_v26 = vmul.f32 %v2208_v19, %v1237_v38  ;;  %1203 = vst.msk [vmem:[#allocation2 + $0xe8] sm:$0xff] %vm313_vm0, %v1171_v34  ;;  %v367_v38 = vld [vmem:[#allocation2 + $0xa8] sm:$0xff] }
 0x13d   : > { %v1329_v40 = vmax.f32 %v1297_v36, 0.0  ;;  %v1108_v42 = vadd.f32 %v1107_v58, %v1019_v37 }
 0x13e   : > { %v1309_v44 = vadd.f32 %v2220_v28, %v1273_v26 }
 0x13f   : > { %1361 = vst.msk [vmem:[%s2231_s23 + $0x80] sm:$0xff] %vm313_vm0, %v1329_v40  ;;  %v1160_v46 = vadd.f32 %v1108_v42, %v364_v39  ;;  %v1137_v48 = vpop.f32.mrf.mxu3 }
 0x140   : > { %v1341_v30 = vmax.f32 %v1309_v44, 0.0  ;;  %v1226_v50 = vld [vmem:[#allocation2 + $0x88] sm:$0xff]  ;;  %v1138_v51 = vadd.f32 %v1137_v48, %v1049_v43 }
 0x141   : > { %v1262_v53 = vmul.f32 %v2208_v19, %v1226_v50  ;;  %1192 = vst.msk [vmem:[#allocation2 + $0x90] sm:$0xff] %vm313_vm0, %v1160_v46  ;;  %v1114_v54 = vpop.f32.mrf.mxu2  ;;  %v931_v56 = vpop.f32.mrf.mxu0  ;;  %v370_v46 = vld [vmem:[#allocation2 + $0xc0] sm:$0xff] }
 0x142   : > { %1373 = vst.msk [vmem:[%s2231_s23 + $0xe0] sm:$0xff] %vm313_vm0, %v1341_v30  ;;  %v1172_v52 = vadd.f32 %v1138_v51, %v376_v47  ;;  %v1020_v41 = vpop.f32.mrf.mxu1 }
 0x143   : > { %v1298_v57 = vadd.f32 %v2220_v28, %v1262_v53  ;;  %v1238_v58 = vld [vmem:[#allocation2 + $0xe8] sm:$0xff]  ;;  %v1021_v59 = vadd.f32 %v1020_v41, %v931_v56  ;;  %v368_v56 = vld [vmem:[#allocation2 + $0xb0] sm:$0xff] }
 0x144   : > { %v1274_v60 = vmul.f32 %v2208_v19, %v1238_v58  ;;  %1204 = vst.msk [vmem:[#allocation2 + $0xf0] sm:$0xff] %vm313_vm0, %v1172_v52 }
 0x145   : > { %v1330_v45 = vmax.f32 %v1298_v57, 0.0  ;;  %v1110_v63 = vadd.f32 %v1109_v0, %v1021_v59 }
 0x146   : > { %v1310_v2 = vadd.f32 %v2220_v28, %v1274_v60 }
 0x147   : > { %1362 = vst.msk [vmem:[%s2231_s23 + $0x88] sm:$0xff] %vm313_vm0, %v1330_v45  ;;  %v1161_v3 = vadd.f32 %v1110_v63, %v365_v61  ;;  %v1139_v6 = vpop.f32.mrf.mxu3 }
 0x148   : > { %v1342_v7 = vmax.f32 %v1310_v2, 0.0  ;;  %v1227_v8 = vld [vmem:[#allocation2 + $0x90] sm:$0xff]  ;;  %v1140_v9 = vadd.f32 %v1139_v6, %v1051_v1 }
 0x149   : > { %v1263_v10 = vmul.f32 %v2208_v19, %v1227_v8  ;;  %1193 = vst.msk [vmem:[#allocation2 + $0x98] sm:$0xff] %vm313_vm0, %v1161_v3  ;;  %v1117_v13 = vpop.f32.mrf.mxu2  ;;  %v934_v0 = vpop.f32.mrf.mxu0 }
 0x14a   : > { %1374 = vst.msk [vmem:[%s2231_s23 + $0xe8] sm:$0xff] %vm313_vm0, %v1342_v7  ;;  %v1173_v4 = vadd.f32 %v1140_v9, %v377_v5  ;;  %v1023_v55 = vpop.f32.mrf.mxu1  ;;  %v369_v5 = vld [vmem:[#allocation2 + $0xb8] sm:$0xff] }
 0x14b   : > { %v1299_v14 = vadd.f32 %v2220_v28, %v1263_v10  ;;  %v1239_v16 = vld [vmem:[#allocation2 + $0xf0] sm:$0xff]  ;;  %v1024_v17 = vadd.f32 %v1023_v55, %v934_v0 }
 0x14c   : > { %v1275_v18 = vmul.f32 %v2208_v19, %v1239_v16  ;;  %1205 = vst.msk [vmem:[#allocation2 + $0xf8] sm:$0xff] %vm313_vm0, %v1173_v4  ;;  %v372_v4 = vld [vmem:[#allocation2 + $0xd0] sm:$0xff] }
 0x14d   : > { %v1331_v12 = vmax.f32 %v1299_v14, 0.0  ;;  %v1113_v20 = vadd.f32 %v1112_v32, %v1024_v17 }
 0x14e   : > { %v1311_v22 = vadd.f32 %v2220_v28, %v1275_v18 }
 0x14f   : > { %1363 = vst.msk [vmem:[%s2231_s23 + $0x90] sm:$0xff] %vm313_vm0, %v1331_v12  ;;  %v1162_v23 = vadd.f32 %v1113_v20, %v366_v15 }
 0x150   : > { %v1343_v24 = vmax.f32 %v1311_v22, 0.0  ;;  %v1228_v25 = vld [vmem:[#allocation2 + $0x98] sm:$0xff] }
 0x151   : > { %v1264_v27 = vmul.f32 %v2208_v19, %v1228_v25  ;;  %1194 = vst.msk [vmem:[#allocation2 + $0xa0] sm:$0xff] %vm313_vm0, %v1162_v23  ;;  %v1119_v29 = vpop.f32.mrf.mxu2  ;;  %v936_v31 = vpop.f32.mrf.mxu0 }
 0x152   : > { %1375 = vst.msk [vmem:[%s2231_s23 + $0xf0] sm:$0xff] %vm313_vm0, %v1343_v24  ;;  %v1025_v33 = vpop.f32.mrf.mxu1  ;;  %v373_v24 = vld [vmem:[#allocation2 + $0xd8] sm:$0xff] }
 0x153   : > { %v1300_v34 = vadd.f32 %v2220_v28, %v1264_v27  ;;  %v1240_v32 = vld [vmem:[#allocation2 + $0xf8] sm:$0xff]  ;;  %v1026_v11 = vadd.f32 %v1025_v33, %v936_v31 }
 0x154   : > { %v1276_v36 = vmul.f32 %v2208_v19, %v1240_v32 }
 0x155   : > { %v1332_v37 = vmax.f32 %v1300_v34, 0.0  ;;  %v1115_v26 = vadd.f32 %v1114_v54, %v1026_v11 }
 0x156   : > { %v1312_v39 = vadd.f32 %v2220_v28, %v1276_v36 }
 0x157   : > { %1364 = vst.msk [vmem:[%s2231_s23 + $0x98] sm:$0xff] %vm313_vm0, %v1332_v37  ;;  %v1163_v40 = vadd.f32 %v1115_v26, %v367_v38 }
 0x158   : > { %v1344_v42 = vmax.f32 %v1312_v39, 0.0  ;;  %v1229_v43 = vld [vmem:[#allocation2 + $0xa0] sm:$0xff] }
 0x159   : > { %v1265_v44 = vmul.f32 %v2208_v19, %v1229_v43  ;;  %1195 = vst.msk [vmem:[#allocation2 + $0xa8] sm:$0xff] %vm313_vm0, %v1163_v40  ;;  %v1122_v47 = vpop.f32.mrf.mxu2  ;;  %v939_v48 = vpop.f32.mrf.mxu0 }
 0x15a   : > { %1376 = vst.msk [vmem:[%s2231_s23 + $0xf8] sm:$0xff] %vm313_vm0, %v1344_v42  ;;  %v1123_v30 = vadd.f32 %v1122_v47, %v2296_v21  ;;  %v1028_v50 = vpop.f32.mrf.mxu1  ;;  %v371_v21 = vld [vmem:[#allocation2 + $0xc8] sm:$0xff] }
 0x15b   : > { %v1301_v51 = vadd.f32 %v2220_v28, %v1265_v44  ;;  %v1029_v53 = vadd.f32 %v1028_v50, %v939_v48 }
 0x15c   : > { %v1166_v54 = vadd.f32 %v1123_v30, %v370_v46 }
 0x15d   : > { %v1333_v52 = vmax.f32 %v1301_v51, 0.0  ;;  %v1118_v41 = vadd.f32 %v1117_v13, %v1029_v53 }
 0x15e   : > { %1198 = vst.msk [vmem:[#allocation2 + $0xc0] sm:$0xff] %vm313_vm0, %v1166_v54 }
 0x15f   : > { %1365 = vst.msk [vmem:[%s2231_s23 + $0xa0] sm:$0xff] %vm313_vm0, %v1333_v52  ;;  %v1164_v57 = vadd.f32 %v1118_v41, %v368_v56 }
 0x160   : > { %v1230_v58 = vld [vmem:[#allocation2 + $0xa8] sm:$0xff] }
 0x161   : > { %v1266_v59 = vmul.f32 %v2208_v19, %v1230_v58  ;;  %1196 = vst.msk [vmem:[#allocation2 + $0xb0] sm:$0xff] %vm313_vm0, %v1164_v57  ;;  %v1124_v60 = vpop.f32.mrf.mxu2  ;;  %v941_v61 = vpop.f32.mrf.mxu0 }
 0x162   : > { %v1125_v45 = vadd.f32 %v1124_v60, %v2304_v35  ;;  %v1030_v63 = vpop.f32.mrf.mxu1 }
 0x163   : > { %v1302_v1 = vadd.f32 %v2220_v28, %v1266_v59  ;;  %v1031_v2 = vadd.f32 %v1030_v63, %v941_v61 }
 0x164   : > { %v1167_v3 = vadd.f32 %v1125_v45, %v371_v21 }
 0x165   : > { %v1334_v6 = vmax.f32 %v1302_v1, 0.0  ;;  %v1233_v7 = vld [vmem:[#allocation2 + $0xc0] sm:$0xff]  ;;  %v1120_v8 = vadd.f32 %v1119_v29, %v1031_v2 }
 0x166   : > { %v1269_v9 = vmul.f32 %v2208_v19, %v1233_v7  ;;  %1199 = vst.msk [vmem:[#allocation2 + $0xc8] sm:$0xff] %vm313_vm0, %v1167_v3 }
 0x167   : > { %1366 = vst.msk [vmem:[%s2231_s23 + $0xa8] sm:$0xff] %vm313_vm0, %v1334_v6  ;;  %v1165_v10 = vadd.f32 %v1120_v8, %v369_v5 }
 0x168   : > { %v1305_v35 = vadd.f32 %v2220_v28, %v1269_v9  ;;  %v1231_v13 = vld [vmem:[#allocation2 + $0xb0] sm:$0xff] }
 0x169   : > { %v1267_v0 = vmul.f32 %v2208_v19, %v1231_v13  ;;  %1197 = vst.msk [vmem:[#allocation2 + $0xb8] sm:$0xff] %vm313_vm0, %v1165_v10  ;;  %v1127_v55 = vpop.f32.mrf.mxu2 }
 0x16a   : > { %v1337_v14 = vmax.f32 %v1305_v35, 0.0  ;;  %v1128_v16 = vadd.f32 %v1127_v55, %v2312_v49 }
 0x16b   : > { %v1303_v17 = vadd.f32 %v2220_v28, %v1267_v0 }
 0x16c   : > { %1369 = vst.msk [vmem:[%s2231_s23 + $0xc0] sm:$0xff] %vm313_vm0, %v1337_v14  ;;  %v1168_v18 = vadd.f32 %v1128_v16, %v372_v4 }
 0x16d   : > { %v1335_v15 = vmax.f32 %v1303_v17, 0.0  ;;  %v1234_v12 = vld [vmem:[#allocation2 + $0xc8] sm:$0xff] }
 0x16e   : > { %v1270_v20 = vmul.f32 %v2208_v19, %v1234_v12  ;;  %1200 = vst.msk [vmem:[#allocation2 + $0xd0] sm:$0xff] %vm313_vm0, %v1168_v18 }
 0x16f   : > { %1367 = vst.msk [vmem:[%s2231_s23 + $0xb0] sm:$0xff] %vm313_vm0, %v1335_v15 }
 0x170   : > { %v1306_v22 = vadd.f32 %v2220_v28, %v1270_v20  ;;  %v1232_v23 = vld [vmem:[#allocation2 + $0xb8] sm:$0xff] }
 0x171   : > { %v1268_v49 = vmul.f32 %v2208_v19, %v1232_v23  ;;  %v1129_v25 = vpop.f32.mrf.mxu2 }
 0x172   : > { %v1338_v27 = vmax.f32 %v1306_v22, 0.0  ;;  %v1130_v29 = vadd.f32 %v1129_v25, %v2320_v62 }
 0x173   : > { %v1304_v31 = vadd.f32 %v2220_v28, %v1268_v49 }
 0x174   : > { %1370 = vst.msk [vmem:[%s2231_s23 + $0xc8] sm:$0xff] %vm313_vm0, %v1338_v27  ;;  %v1169_v33 = vadd.f32 %v1130_v29, %v373_v24 }
 0x175   : > { %v1336_v34 = vmax.f32 %v1304_v31, 0.0  ;;  %v1235_v32 = vld [vmem:[#allocation2 + $0xd0] sm:$0xff] }
 0x176   : > { %v1271_v11 = vmul.f32 %v2208_v19, %v1235_v32  ;;  %1201 = vst.msk [vmem:[#allocation2 + $0xd8] sm:$0xff] %vm313_vm0, %v1169_v33 }
 0x177   : > { %1368 = vst.msk [vmem:[%s2231_s23 + $0xb8] sm:$0xff] %vm313_vm0, %v1336_v34 }
 0x178   : > { %v1307_v36 = vadd.f32 %v2220_v28, %v1271_v11 }
 0x17a   : > { %v1339_v38 = vmax.f32 %v1307_v36, 0.0 }
 0x17c   : > { %1371 = vst.msk [vmem:[%s2231_s23 + $0xd0] sm:$0xff] %vm313_vm0, %v1339_v38 }
 0x17d   : > { %v1236_v62 = vld [vmem:[#allocation2 + $0xd8] sm:$0xff] }
 0x17e   : > { %v1272_v37 = vmul.f32 %v2208_v19, %v1236_v62 }
 0x180   : > { %v1308_v26 = vadd.f32 %v2220_v28, %v1272_v37 }
 0x182   : > { %v1340_v39 = vmax.f32 %v1308_v26, 0.0 }
 0x184   : > { %1372 = vst.msk [vmem:[%s2231_s23 + $0xd8] sm:$0xff] %vm313_vm0, %v1340_v39 }
 0x185 PF: > { %s14_s17 = sadd.s32 1, %s1931_s17   ;;  %s2459_s15 = smov %s1927_s16 }
 0x186   : > { %p11_p5 = scmp.ge.s32.totalorder %s14_s17, 4   ;;  %s2460_s16 = smov %s2462_s18 }
 0x188   :  { %13 = sbr.rel (!%p11_p5) target bundleno = 2 (0x2), region = 83 }

// kernel: _stem_and_pool.6
= control target key start
LH: loop header
LB: loop body
LE: loop exit
PB: predicated region body
PF: predicated region fallthrough
CT: control target
= control target key end

     0   :  { %s1960_s15 = smov 0   ;;  %s1962_s16 = smov 0   ;;  %s2455_s0 = inlined_call_operand.vmem [shape: bf16[512,288], index: 0, kind: input, shape index: {}]   ;;  %s2456_s1 = inlined_call_operand.vmem [shape: bf16[288,64], index: 1, kind: input, shape index: {}]   ;;  %s2457_s2 = inlined_call_operand.vmem [shape: f32[1,64], index: 2, kind: input, shape index: {}]   ;;  %s2458_s3 = inlined_call_operand.vmem [shape: f32[1,64], index: 3, kind: input, shape index: {}]   ;;  %s2459_s4 = inlined_call_operand.vmem [shape: f32[512,64], index: 4, kind: output, shape index: {}]  }
   0x1   :  { %s1964_s17 = smov 0  }
   0x2 LB: > { %s33_s18 = sadd.s32 1, %s1928_s16  ;;  %p1511_p0 = scmp.ge.s32.totalorder %s1932_s17, 1  ;;  %s1932_s17 = sphi %s1964_s17, %s14_s17   ;;  %s1928_s16 = sphi %s1962_s16, %s2461_s16   ;;  %s1924_s15 = sphi %s1960_s15, %s2460_s15  }
   0x3   : > { %p35_p1 = scmp.ge.s32.totalorder %s33_s18, 2  ;;  %p224_p2 = scmp.lt.s32.totalorder %s1932_s17, 3 }
   0x5   : > { %s2463_s18 = smov (%p35_p1, %s33_s18), 0  ;;  %p225_p3 = pnand %p1511_p0, %p224_p2 }
   0x6   : > { %s1512_s25 = sshll.u32 (!%p225_p3), %s1924_s15, 5 }
   0x7   : > { %228 = sbr.rel (%p225_p3) target bundleno = 389 (0x185), region = 36  ;;  %p274_p4 = scmp.lt.s32.totalorder (!%p225_p3), %s1512_s25, 63 }
   0xc   : > { %v1853_v0 = vld [vmem:[%s2456_s1 + $0x38] sm:$0xff]  ;;  %v1989_v2 = vld [vmem:[%s2456_s1 + $0x88] sm:$0xff]  ;;  %v1852_v3 = vld [vmem:[%s2456_s1 + $0x30] sm:$0xff]  ;;  %s2465_s25 = smov (!%p274_p4, %s1512_s25), 63  ;;  %vm826_vm0 = vcmask 261120   ;;  %vm313_vm1 = vcmask 523264  }
   0xd   : > { %v1984_v1 = vld [vmem:[%s2456_s1 + $0x78] sm:$0xff]  ;;  %875 = vmatpush.bf16.msra.mxu0 %v1853_v0  ;;  %1864 = vmatpush.bf16.msra.mxu3 %v1853_v0  ;;  %v1860_v4 = vld [vmem:[%s2456_s1 + $0x70] sm:$0xff]  ;;  %v2002_v5 = vld [vmem:[%s2456_s1 + $0x80] sm:$0xff]  ;;  %s1882_s6 = smul.u32 12, %s2465_s25  ;;  %s1515_s20 = sshll.u32 %s2465_s25, 3 }
   0xe   : > { %964 = vmatpush.bf16.msra.mxu1 %v1984_v1  ;;  %1059 = vmatpush.bf16.msra.mxu2 %v1989_v2  ;;  %v1851_v6 = vld [vmem:[%s2456_s1 + $0x28] sm:$0xff]  ;;  %v1850_v11 = vld [vmem:[%s2456_s1 + $0x20] sm:$0xff]  ;;  %v1849_v13 = vld [vmem:[%s2456_s1 + $0x18] sm:$0xff]  ;;  %s2232_s23 = scalar_lea.vmem %s2459_s4, %s1515_s20 }
   0xf   : > { %v1859_v7 = vld [vmem:[%s2456_s1 + $0x68] sm:$0xff]  ;;  %s2017_s13 = scalar_lea.vmem %s2455_s0, %s1882_s6  ;;  %v1858_v12 = vld [vmem:[%s2456_s1 + $0x60] sm:$0xff]  ;;  %v1857_v14 = vld [vmem:[%s2456_s1 + $0x58] sm:$0xff] }
  0x10   : > { %v1526_v8 = vld [vmem:[%s2017_s13 + $0x8] sm:$0xf]  ;;  %v1800_v9 = vld [vmem:[%s2017_s13 + $0x10] sm:$0xf0]  ;;  %v1538_v17 = vld [vmem:[%s2017_s13 + $0x20] sm:$0xf] }
  0x11   : > { %876 = vmatpush.bf16.msra.mxu0 %v1852_v3  ;;  %1865 = vmatpush.bf16.msra.mxu3 %v1852_v3  ;;  %v1527_v10 = vor.u32 %v1800_v9, %v1526_v8  ;;  %v1848_v15 = vld [vmem:[%s2456_s1 + $0x10] sm:$0xff]  ;;  %v1803_v18 = vld [vmem:[%s2017_s13 + $0x28] sm:$0xf0]  ;;  %v1846_v22 = vld [vmem:[%s2456_s1] sm:$0xff] }
  0x12   : > { %965 = vmatpush.bf16.msra.mxu1 %v1860_v4  ;;  %1060 = vmatpush.bf16.msra.mxu2 %v2002_v5  ;;  %v1856_v16 = vld [vmem:[%s2456_s1 + $0x50] sm:$0xff]  ;;  %v1847_v19 = vld [vmem:[%s2456_s1 + $0x8] sm:$0xff]  ;;  %v1539_v21 = vor.u32 %v1803_v18, %v1538_v17  ;;  %v1518_v23 = vld [vmem:[%s2017_s13] sm:$0xf] }
  0x13   : > { %v1855_v20 = vld [vmem:[%s2456_s1 + $0x48] sm:$0xff]  ;;  %v1662_v25 = vld [vmem:[%s2017_s13 + $0x120] sm:$0xf]  ;;  %v1798_v28 = vld [vmem:[%s2017_s13 + $0x4] sm:$0xf] }
  0x14   : > { %v1799_v24 = vld [vmem:[%s2017_s13 + $0x8] sm:$0xf0]  ;;  %v1854_v27 = vld [vmem:[%s2456_s1 + $0x40] sm:$0xff]  ;;  %v1520_v29 = vld [vmem:[%s2017_s13 + $0xc] sm:$0xf0] }
  0x15   : > { %877 = vmatpush.bf16.msra.mxu0 %v1851_v6  ;;  %1866 = vmatpush.bf16.msra.mxu3 %v1851_v6  ;;  %v1835_v26 = vld [vmem:[%s2017_s13 + $0x128] sm:$0xf0]  ;;  %v1519_v30 = vor.u32 %v1799_v24, %v1518_v23  ;;  %v1523_v32 = vor.u32 %v1798_v28, %v1520_v29  ;;  %v1550_v33 = vld [vmem:[%s2017_s13 + $0x38] sm:$0xf]  ;;  %v1806_v34 = vld [vmem:[%s2017_s13 + $0x40] sm:$0xf0] }
  0x16   : > { %966 = vmatpush.bf16.msra.mxu1 %v1859_v7  ;;  %1780 = vmatmul.msk.bf16.vlgmr.msra.gmra.mxu2 %vm826_vm0, %v1527_v10  ;;  %v1663_v31 = vor.u32 %v1835_v26, %v1662_v25  ;;  %v1551_v35 = vor.u32 %v1806_v34, %v1550_v33  ;;  %v1530_v36 = vld [vmem:[%s2017_s13 + $0x18] sm:$0xf]  ;;  %v1802_v37 = vld [vmem:[%s2017_s13 + $0x20] sm:$0xf0]  ;;  %v1801_v40 = vld [vmem:[%s2017_s13 + $0x1c] sm:$0xf] }
  0x17   : > { %v1674_v38 = vld [vmem:[%s2017_s13 + $0x138] sm:$0xf]  ;;  %v1838_v39 = vld [vmem:[%s2017_s13 + $0x140] sm:$0xf0]  ;;  %v1532_v41 = vld [vmem:[%s2017_s13 + $0x24] sm:$0xf0]  ;;  %v1531_v42 = vor.u32 %v1802_v37, %v1530_v36 }
  0x18   : > { %v1675_v43 = vor.u32 %v1838_v39, %v1674_v38  ;;  %v1535_v44 = vor.u32 %v1801_v40, %v1532_v41  ;;  %v1562_v45 = vld [vmem:[%s2017_s13 + $0x50] sm:$0xf]  ;;  %v1809_v46 = vld [vmem:[%s2017_s13 + $0x58] sm:$0xf0]  ;;  %v1804_v52 = vld [vmem:[%s2017_s13 + $0x34] sm:$0xf] }
  0x19   : > { %878 = vmatpush.bf16.msra.mxu0 %v1850_v11  ;;  %1867 = vmatpush.bf16.msra.mxu3 %v1850_v11  ;;  %v1563_v47 = vor.u32 %v1809_v46, %v1562_v45  ;;  %v1542_v48 = vld [vmem:[%s2017_s13 + $0x30] sm:$0xf]  ;;  %v1805_v49 = vld [vmem:[%s2017_s13 + $0x38] sm:$0xf0]  ;;  %v1544_v53 = vld [vmem:[%s2017_s13 + $0x3c] sm:$0xf0] }
  0x1a   : > { %967 = vmatpush.bf16.msra.mxu1 %v1858_v12  ;;  %v1686_v50 = vld [vmem:[%s2017_s13 + $0x150] sm:$0xf]  ;;  %v1841_v51 = vld [vmem:[%s2017_s13 + $0x158] sm:$0xf0]  ;;  %v1543_v54 = vor.u32 %v1805_v49, %v1542_v48  ;;  %v1547_v56 = vor.u32 %v1804_v52, %v1544_v53  ;;  %v1574_v57 = vld [vmem:[%s2017_s13 + $0x68] sm:$0xf] }
  0x1b   : > { %v1687_v55 = vor.u32 %v1841_v51, %v1686_v50  ;;  %v1812_v58 = vld [vmem:[%s2017_s13 + $0x70] sm:$0xf0]  ;;  %v1554_v60 = vld [vmem:[%s2017_s13 + $0x48] sm:$0xf]  ;;  %v1807_v0 = vld [vmem:[%s2017_s13 + $0x4c] sm:$0xf] }
  0x1c   : > { %v1575_v59 = vor.u32 %v1812_v58, %v1574_v57  ;;  %v1808_v61 = vld [vmem:[%s2017_s13 + $0x50] sm:$0xf0]  ;;  %v1698_v62 = vld [vmem:[%s2017_s13 + $0x168] sm:$0xf]  ;;  %v1815_v6 = vld [vmem:[%s2017_s13 + $0x88] sm:$0xf0] }
  0x1d   : > { %879 = vmatpush.bf16.msra.mxu0 %v1849_v13  ;;  %1868 = vmatpush.bf16.msra.mxu3 %v1849_v13  ;;  %v1844_v63 = vld [vmem:[%s2017_s13 + $0x170] sm:$0xf0]  ;;  %v1566_v8 = vld [vmem:[%s2017_s13 + $0x60] sm:$0xf]  ;;  %v1811_v9 = vld [vmem:[%s2017_s13 + $0x68] sm:$0xf0] }
  0x1e   : > { %968 = vmatpush.bf16.msra.mxu1 %v1857_v14  ;;  %v1699_v3 = vor.u32 %v1844_v63, %v1698_v62  ;;  %v1834_v10 = vld [vmem:[%s2017_s13 + $0x124] sm:$0xf]  ;;  %v1664_v11 = vld [vmem:[%s2017_s13 + $0x12c] sm:$0xf0]  ;;  %v1598_v17 = vld [vmem:[%s2017_s13 + $0x98] sm:$0xf] }
  0x1f   : > { %v1568_v13 = vld [vmem:[%s2017_s13 + $0x6c] sm:$0xf0]  ;;  %v1818_v18 = vld [vmem:[%s2017_s13 + $0xa0] sm:$0xf0]  ;;  %v1676_v23 = vld [vmem:[%s2017_s13 + $0x144] sm:$0xf0] }
  0x20   : > { %v1813_v24 = vld [vmem:[%s2017_s13 + $0x7c] sm:$0xf]  ;;  %v1580_v25 = vld [vmem:[%s2017_s13 + $0x84] sm:$0xf0]  ;;  %v1610_v29 = vld [vmem:[%s2017_s13 + $0xb0] sm:$0xf] }
  0x21   : > { %880 = vmatpush.bf16.msra.mxu0 %v1848_v15  ;;  %1869 = vmatpush.bf16.msra.mxu3 %v1848_v15  ;;  %v1667_v15 = vor.u32 %v1834_v10, %v1664_v11  ;;  %v1583_v28 = vor.u32 %v1813_v24, %v1580_v25  ;;  %v1817_v33 = vld [vmem:[%s2017_s13 + $0x98] sm:$0xf0]  ;;  %v1840_v34 = vld [vmem:[%s2017_s13 + $0x154] sm:$0xf]  ;;  %v1592_v37 = vld [vmem:[%s2017_s13 + $0x9c] sm:$0xf0] }
  0x22   : > { %969 = vmatpush.bf16.msra.mxu1 %v1856_v16  ;;  %v1816_v36 = vld [vmem:[%s2017_s13 + $0x94] sm:$0xf]  ;;  %v1934_v38 = vmov 0.0   ;;  %v1602_v45 = vld [vmem:[%s2017_s13 + $0xa8] sm:$0xf] }
  0x23   : > { %314 = vst.msk [vmem:[#allocation2] sm:$0xff] %vm313_vm1, %v1934_v38  ;;  %v1595_v41 = vor.u32 %v1816_v36, %v1592_v37  ;;  %v1820_v46 = vld [vmem:[%s2017_s13 + $0xb0] sm:$0xf0]  ;;  %v1700_v48 = vld [vmem:[%s2017_s13 + $0x174] sm:$0xf0] }
  0x24   : > { %315 = vst.msk [vmem:[#allocation2 + $0x8] sm:$0xff] %vm313_vm1, %v1934_v38  ;;  %v1819_v49 = vld [vmem:[%s2017_s13 + $0xac] sm:$0xf]  ;;  %v1604_v50 = vld [vmem:[%s2017_s13 + $0xb4] sm:$0xf0]  ;;  %v1603_v51 = vor.u32 %v1820_v46, %v1602_v45 }
  0x25   : > { %881 = vmatpush.bf16.msra.mxu0 %v1847_v19  ;;  %1870 = vmatpush.bf16.msra.mxu3 %v1847_v19  ;;  %v1599_v19 = vor.u32 %v1818_v18, %v1598_v17  ;;  %316 = vst.msk [vmem:[#allocation2 + $0x10] sm:$0xff] %vm313_vm1, %v1934_v38  ;;  %v1842_v62 = vld [vmem:[%s2017_s13 + $0x160] sm:$0xf0]  ;;  %v1706_v24 = vld [vmem:[%s2017_s13 + $0x170] sm:$0xf] }
  0x26   : > { %970 = vmatpush.bf16.msra.mxu1 %v1855_v20  ;;  %1781 = vmatmul.msk.bf16.gmra.mxu2 %vm826_vm0, %v1539_v21  ;;  %v1814_v21 = vld [vmem:[%s2017_s13 + $0x80] sm:$0xf0]  ;;  %317 = vst.msk [vmem:[#allocation2 + $0x18] sm:$0xff] %vm313_vm1, %v1934_v38  ;;  %v1845_v25 = vld [vmem:[%s2017_s13 + $0x178] sm:$0xf0] }
  0x27   : > { %318 = vst.msk [vmem:[#allocation2 + $0x20] sm:$0xff] %vm313_vm1, %v1934_v38  ;;  %v1822_v63 = vld [vmem:[%s2017_s13 + $0xc4] sm:$0xf]  ;;  %v1658_v46 = vld [vmem:[%s2017_s13 + $0x110] sm:$0xf] }
  0x28   : > { %319 = vst.msk [vmem:[#allocation2 + $0x28] sm:$0xff] %vm313_vm1, %v1934_v38 }
  0x29   : > { %882 = vmatpush.bf16.msra.mxu0 %v1846_v22  ;;  %1871 = vmatpush.bf16.msra.mxu3 %v1846_v22  ;;  %v1837_v22 = vld [vmem:[%s2017_s13 + $0x13c] sm:$0xf]  ;;  %320 = vst.msk [vmem:[#allocation2 + $0x30] sm:$0xff] %vm313_vm1, %v1934_v38 }
  0x2a   : > { %971 = vmatpush.bf16.msra.mxu1 %v1854_v27  ;;  %321 = vst.msk [vmem:[#allocation2 + $0x38] sm:$0xff] %vm313_vm1, %v1934_v38 }
  0x2b   : > { %322 = vst.msk [vmem:[#allocation2 + $0x40] sm:$0xff] %vm313_vm1, %v1934_v38 }
  0x2c   : > { %883 = vmatmul.bf16.vlgmr.msra.gmra.mxu0 %v1519_v30  ;;  %943 = vmatmul.bf16.vlgmr.msra.gmra.mxu3 %v1663_v31  ;;  %v1821_v30 = vld [vmem:[%s2017_s13 + $0xb8] sm:$0xf0]  ;;  %323 = vst.msk [vmem:[#allocation2 + $0x48] sm:$0xff] %vm313_vm1, %v1934_v38 }
  0x2d   : > { %1872 = vmatpush.bf16.msrb.mxu3 %v1984_v1  ;;  %972 = vmatmul.bf16.vlgmr.msra.gmra.mxu1 %v1523_v32  ;;  %v1556_v1 = vld [vmem:[%s2017_s13 + $0x54] sm:$0xf0]  ;;  %v1611_v31 = vor.u32 %v1821_v30, %v1610_v29  ;;  %v1590_v32 = vld [vmem:[%s2017_s13 + $0x90] sm:$0xf]  ;;  %324 = vst.msk [vmem:[#allocation2 + $0x50] sm:$0xff] %vm313_vm1, %v1934_v38 }
  0x2e   : > { %v1591_v39 = vor.u32 %v1817_v33, %v1590_v32  ;;  %325 = vst.msk [vmem:[#allocation2 + $0x58] sm:$0xff] %vm313_vm1, %v1934_v38  ;;  %v1707_v33 = vor.u32 %v1845_v25, %v1706_v24 }
  0x2f   : > { %326 = vst.msk [vmem:[#allocation2 + $0x60] sm:$0xff] %vm313_vm1, %v1934_v38 }
  0x30   : > { %327 = vst.msk [vmem:[#allocation2 + $0x68] sm:$0xff] %vm313_vm1, %v1934_v38 }
  0x31   : > { %1873 = vmatpush.bf16.msrb.mxu3 %v1860_v4  ;;  %v1559_v4 = vor.u32 %v1807_v0, %v1556_v1  ;;  %328 = vst.msk [vmem:[#allocation2 + $0x70] sm:$0xff] %vm313_vm1, %v1934_v38  ;;  %v1616_v0 = vld [vmem:[%s2017_s13 + $0xcc] sm:$0xf0] }
  0x32   : > { %329 = vst.msk [vmem:[#allocation2 + $0x78] sm:$0xff] %vm313_vm1, %v1934_v38 }
  0x33   : > { %330 = vst.msk [vmem:[#allocation2 + $0x80] sm:$0xff] %vm313_vm1, %v1934_v38 }
  0x34   : > { %331 = vst.msk [vmem:[#allocation2 + $0x88] sm:$0xff] %vm313_vm1, %v1934_v38 }
  0x35   : > { %1874 = vmatpush.bf16.msrb.mxu3 %v1859_v7  ;;  %332 = vst.msk [vmem:[#allocation2 + $0x90] sm:$0xff] %vm313_vm1, %v1934_v38 }
  0x36   : > { %1782 = vmatmul.msk.bf16.gmra.mxu2 %vm826_vm0, %v1551_v35  ;;  %v1688_v35 = vld [vmem:[%s2017_s13 + $0x15c] sm:$0xf0]  ;;  %333 = vst.msk [vmem:[#allocation2 + $0x98] sm:$0xff] %vm313_vm1, %v1934_v38 }
  0x37   : > { %v1691_v40 = vor.u32 %v1840_v34, %v1688_v35  ;;  %334 = vst.msk [vmem:[#allocation2 + $0xa0] sm:$0xff] %vm313_vm1, %v1934_v38 }
  0x38   : > { %335 = vst.msk [vmem:[#allocation2 + $0xa8] sm:$0xff] %vm313_vm1, %v1934_v38 }
  0x39   : > { %1875 = vmatpush.bf16.msrb.mxu3 %v1858_v12  ;;  %v1810_v12 = vld [vmem:[%s2017_s13 + $0x64] sm:$0xf]  ;;  %336 = vst.msk [vmem:[#allocation2 + $0xb0] sm:$0xff] %vm313_vm1, %v1934_v38 }
  0x3a   : > { %337 = vst.msk [vmem:[#allocation2 + $0xb8] sm:$0xff] %vm313_vm1, %v1934_v38 }
  0x3b   : > { %338 = vst.msk [vmem:[#allocation2 + $0xc0] sm:$0xff] %vm313_vm1, %v1934_v38 }
  0x3c   : > { %888 = vmatmul.bf16.gmra.mxu0 %v1531_v42  ;;  %948 = vmatmul.bf16.gmra.mxu3 %v1675_v43  ;;  %v1622_v42 = vld [vmem:[%s2017_s13 + $0xc8] sm:$0xf]  ;;  %v1824_v43 = vld [vmem:[%s2017_s13 + $0xd0] sm:$0xf0]  ;;  %339 = vst.msk [vmem:[#allocation2 + $0xc8] sm:$0xff] %vm313_vm1, %v1934_v38 }
  0x3d   : > { %1876 = vmatpush.bf16.msrb.mxu3 %v1857_v14  ;;  %977 = vmatmul.bf16.gmra.mxu1 %v1535_v44  ;;  %v1567_v14 = vor.u32 %v1811_v9, %v1566_v8  ;;  %v1623_v44 = vor.u32 %v1824_v43, %v1622_v42  ;;  %340 = vst.msk [vmem:[#allocation2 + $0xd0] sm:$0xff] %vm313_vm1, %v1934_v38  ;;  %v346_v8 = vld [vmem:[#allocation2] sm:$0xff] }
  0x3e   : > { %341 = vst.msk [vmem:[#allocation2 + $0xd8] sm:$0xff] %vm313_vm1, %v1934_v38 }
  0x3f   : > { %342 = vst.msk [vmem:[#allocation2 + $0xe0] sm:$0xff] %vm313_vm1, %v1934_v38 }
  0x40   : > { %343 = vst.msk [vmem:[#allocation2 + $0xe8] sm:$0xff] %vm313_vm1, %v1934_v38 }
  0x41   : > { %1877 = vmatpush.bf16.msrb.mxu3 %v1856_v16  ;;  %v1571_v16 = vor.u32 %v1810_v12, %v1568_v13  ;;  %344 = vst.msk [vmem:[#allocation2 + $0xf0] sm:$0xff] %vm313_vm1, %v1934_v38  ;;  %v1646_v12 = vld [vmem:[%s2017_s13 + $0xf8] sm:$0xf]  ;;  %v1830_v13 = vld [vmem:[%s2017_s13 + $0x100] sm:$0xf0] }
  0x42   : > { %345 = vst.msk [vmem:[#allocation2 + $0xf8] sm:$0xff] %vm313_vm1, %v1934_v38  ;;  %v1647_v17 = vor.u32 %v1830_v13, %v1646_v12 }
  0x45   : > { %1878 = vmatpush.bf16.msrb.mxu3 %v1855_v20  ;;  %v1578_v20 = vld [vmem:[%s2017_s13 + $0x78] sm:$0xf] }
  0x46   : > { %1783 = vmatmul.msk.bf16.gmra.mxu2 %vm826_vm0, %v1563_v47  ;;  %v1579_v26 = vor.u32 %v1814_v21, %v1578_v20  ;;  %v1843_v47 = vld [vmem:[%s2017_s13 + $0x16c] sm:$0xf]  ;;  %v1626_v21 = vld [vmem:[%s2017_s13 + $0xd8] sm:$0xf] }
  0x47   : > { %v1703_v52 = vor.u32 %v1843_v47, %v1700_v48  ;;  %v347_v20 = vld [vmem:[#allocation2 + $0x8] sm:$0xff]  ;;  %v1833_v47 = vld [vmem:[%s2017_s13 + $0x118] sm:$0xf0] }
  0x49   : > { %1879 = vmatpush.bf16.msrb.mxu3 %v1854_v27  ;;  %v1679_v27 = vor.u32 %v1837_v22, %v1676_v23  ;;  %v1826_v23 = vld [vmem:[%s2017_s13 + $0xe0] sm:$0xf0] }
  0x4a   : > { %v1627_v32 = vor.u32 %v1826_v23, %v1626_v21 }
  0x4c   : > { %893 = vmatmul.bf16.gmra.mxu0 %v1543_v54  ;;  %953 = vmatmul.bf16.gmra.mxu3 %v1687_v55  ;;  %v1607_v54 = vor.u32 %v1819_v49, %v1604_v50  ;;  %v1634_v55 = vld [vmem:[%s2017_s13 + $0xe0] sm:$0xf] }
  0x4d   : > { %1880 = vmatpush.bf16.msra.mxu3 %v1989_v2  ;;  %982 = vmatmul.bf16.gmra.mxu1 %v1547_v56  ;;  %v1555_v2 = vor.u32 %v1808_v61, %v1554_v60  ;;  %v1827_v56 = vld [vmem:[%s2017_s13 + $0xe8] sm:$0xf0]  ;;  %v1694_v61 = vld [vmem:[%s2017_s13 + $0x158] sm:$0xf] }
  0x4e   : > { %v1635_v58 = vor.u32 %v1827_v56, %v1634_v55  ;;  %v1823_v60 = vld [vmem:[%s2017_s13 + $0xc8] sm:$0xf0]  ;;  %v349_v56 = vld [vmem:[#allocation2 + $0x18] sm:$0xff] }
  0x51   : > { %1881 = vmatpush.bf16.msra.mxu3 %v2002_v5  ;;  %v1586_v5 = vld [vmem:[%s2017_s13 + $0x80] sm:$0xf] }
  0x52   : > { %v1587_v7 = vor.u32 %v1815_v6, %v1586_v5  ;;  %v1619_v5 = vor.u32 %v1822_v63, %v1616_v0 }
  0x56   : > { %1784 = vmatmul.msk.bf16.gmra.mxu2 %vm826_vm0, %v1575_v59  ;;  %v1614_v59 = vld [vmem:[%s2017_s13 + $0xc0] sm:$0xf] }
  0x57   : > { %v1615_v1 = vor.u32 %v1823_v60, %v1614_v59  ;;  %v1638_v59 = vld [vmem:[%s2017_s13 + $0xf0] sm:$0xf]  ;;  %v1829_v60 = vld [vmem:[%s2017_s13 + $0xf8] sm:$0xf0] }
  0x5c   : > { %898 = vmatmul.bf16.gmra.mxu0 %v1555_v2  ;;  %958 = vmatmul.bf16.gmra.mxu3 %v1699_v3  ;;  %v1695_v2 = vor.u32 %v1842_v62, %v1694_v61  ;;  %v1828_v61 = vld [vmem:[%s2017_s13 + $0xf4] sm:$0xf]  ;;  %v1640_v62 = vld [vmem:[%s2017_s13 + $0xfc] sm:$0xf0] }
  0x5d   : > { %987 = vmatmul.bf16.gmra.mxu1 %v1559_v4 }
  0x66   : > { %1785 = vmatmul.msk.bf16.gmra.mxu2 %vm826_vm0, %v1587_v7 }
  0x6c   : > { %903 = vmatmul.bf16.gmra.mxu0 %v1567_v14  ;;  %1032 = vmatmul.bf16.vlgmr.msrb.gmra.mxu3 %v1667_v15 }
  0x6d   : > { %992 = vmatmul.bf16.gmra.mxu1 %v1571_v16 }
  0x76   : > { %1786 = vmatmul.msk.bf16.gmra.mxu2 %vm826_vm0, %v1599_v19  ;;  %v2209_v19 = vld [vmem:[%s2458_s3] ss:$0 sm:$0xff] }
  0x7c   : > { %908 = vmatmul.bf16.gmra.mxu0 %v1579_v26  ;;  %1037 = vmatmul.bf16.gmra.mxu3 %v1679_v27  ;;  %v1825_v26 = vld [vmem:[%s2017_s13 + $0xdc] sm:$0xf]  ;;  %v1628_v27 = vld [vmem:[%s2017_s13 + $0xe4] sm:$0xf0] }
  0x7d   : > { %997 = vmatmul.bf16.gmra.mxu1 %v1583_v28  ;;  %v2221_v28 = vld [vmem:[%s2457_s2] ss:$0 sm:$0xff]  ;;  %v1631_v37 = vor.u32 %v1825_v26, %v1628_v27  ;;  %v351_v27 = vld [vmem:[#allocation2 + $0x28] sm:$0xff] }
  0x86   : > { %1787 = vmatmul.msk.bf16.gmra.mxu2 %vm826_vm0, %v1611_v31 }
  0x8c   : > { %913 = vmatmul.bf16.gmra.mxu0 %v1591_v39  ;;  %1042 = vmatmul.bf16.gmra.mxu3 %v1691_v40 }
  0x8d   : > { %1002 = vmatmul.bf16.gmra.mxu1 %v1595_v41  ;;  %v348_v41 = vld [vmem:[#allocation2 + $0x10] sm:$0xff] }
  0x96   : > { %1788 = vmatmul.msk.bf16.gmra.mxu2 %vm826_vm0, %v1623_v44 }
  0x99   : > { %v1062_v53 = vpop.f32.mrf.mxu2 }
  0x9c   : > { %918 = vmatmul.bf16.gmra.mxu0 %v1603_v51  ;;  %1047 = vmatmul.bf16.gmra.mxu3 %v1703_v52 }
  0x9d   : > { %1007 = vmatmul.bf16.gmra.mxu1 %v1607_v54 }
  0xa1   : > { %v1064_v57 = vpop.f32.mrf.mxu2 }
  0xa6   : > { %1789 = vmatmul.msk.bf16.gmra.mxu2 %vm826_vm0, %v1635_v58 }
  0xa9   : > { %v1067_v3 = vpop.f32.mrf.mxu2  ;;  %v884_v4 = vpop.f32.mrf.mxu0 }
  0xaa   : > { %v973_v6 = vpop.f32.mrf.mxu1 }
  0xab   : > { %v974_v7 = vadd.f32 %v973_v6, %v884_v4  ;;  %v1643_v6 = vor.u32 %v1828_v61, %v1640_v62 }
  0xac   : > { %923 = vmatmul.bf16.gmra.mxu0 %v1615_v1  ;;  %1794 = vmatmul.msk.bf16.vlgmr.msra.gmra.mxu3 %vm826_vm0, %v1695_v2  ;;  %v1639_v2 = vor.u32 %v1829_v60, %v1638_v59 }
  0xad   : > { %v1063_v9 = vadd.f32 %v1062_v53, %v974_v7  ;;  %1012 = vmatmul.bf16.gmra.mxu1 %v1619_v5  ;;  %v1659_v53 = vor.u32 %v1833_v47, %v1658_v46 }
  0xaf   : > { %v1142_v10 = vadd.f32 %v1063_v9, %v346_v8  ;;  %v2201_v11 = vpop.f32.mrf.mxu3 }
  0xb1   : > { %1175 = vst.msk [vmem:[#allocation2] sm:$0xff] %vm313_vm1, %v1142_v10  ;;  %v1069_v14 = vpop.f32.mrf.mxu2  ;;  %v886_v15 = vpop.f32.mrf.mxu0  ;;  %v350_v10 = vld [vmem:[#allocation2 + $0x20] sm:$0xff] }
  0xb2   : > { %v975_v16 = vpop.f32.mrf.mxu1 }
  0xb3   : > { %v976_v18 = vadd.f32 %v975_v16, %v886_v15  ;;  %v1670_v16 = vld [vmem:[%s2017_s13 + $0x128] sm:$0xf] }
  0xb5   : > { %v1065_v22 = vadd.f32 %v1064_v57, %v976_v18 }
  0xb6   : > { %1790 = vmatmul.msk.bf16.gmra.mxu2 %vm826_vm0, %v1647_v17  ;;  %v1836_v17 = vld [vmem:[%s2017_s13 + $0x130] sm:$0xf0] }
  0xb7   : > { %v1143_v29 = vadd.f32 %v1065_v22, %v347_v20  ;;  %v2223_v30 = vpop.f32.mrf.mxu3  ;;  %v1671_v24 = vor.u32 %v1836_v17, %v1670_v16 }
  0xb8   : > { %v1210_v31 = vld [vmem:[#allocation2] sm:$0xff] }
  0xb9   : > { %v1246_v34 = vmul.f32 %v2209_v19, %v1210_v31  ;;  %1176 = vst.msk [vmem:[#allocation2 + $0x8] sm:$0xff] %vm313_vm1, %v1143_v29  ;;  %v1072_v35 = vpop.f32.mrf.mxu2  ;;  %v889_v36 = vpop.f32.mrf.mxu0 }
  0xba   : > { %v978_v38 = vpop.f32.mrf.mxu1 }
  0xbb   : > { %v1282_v39 = vadd.f32 %v2221_v28, %v1246_v34  ;;  %v979_v40 = vadd.f32 %v978_v38, %v889_v36  ;;  %v1831_v34 = vld [vmem:[%s2017_s13 + $0x10c] sm:$0xf] }
  0xbc   : > { %928 = vmatmul.bf16.gmra.mxu0 %v1627_v32  ;;  %1795 = vmatmul.msk.bf16.gmra.mxu3 %vm826_vm0, %v1707_v33  ;;  %v1650_v32 = vld [vmem:[%s2017_s13 + $0x108] sm:$0xf]  ;;  %v1832_v33 = vld [vmem:[%s2017_s13 + $0x110] sm:$0xf0] }
  0xbd   : > { %v1314_v42 = vmax.f32 %v1282_v39, 0.0  ;;  %v1068_v43 = vadd.f32 %v1067_v3, %v979_v40  ;;  %1017 = vmatmul.bf16.gmra.mxu1 %v1631_v37  ;;  %v1651_v39 = vor.u32 %v1832_v33, %v1650_v32 }
  0xbf   : > { %1346 = vst.msk [vmem:[%s2232_s23] sm:$0xff] %vm313_vm1, %v1314_v42  ;;  %v1144_v44 = vadd.f32 %v1068_v43, %v348_v41  ;;  %v2237_v45 = vpop.f32.mrf.mxu3 }
  0xc0   : > { %v1211_v48 = vld [vmem:[#allocation2 + $0x8] sm:$0xff] }
  0xc1   : > { %v1247_v49 = vmul.f32 %v2209_v19, %v1211_v48  ;;  %1177 = vst.msk [vmem:[#allocation2 + $0x10] sm:$0xff] %vm313_vm1, %v1144_v44  ;;  %v1074_v50 = vpop.f32.mrf.mxu2  ;;  %v891_v51 = vpop.f32.mrf.mxu0  ;;  %v352_v48 = vld [vmem:[#allocation2 + $0x30] sm:$0xff] }
  0xc2   : > { %v980_v52 = vpop.f32.mrf.mxu1 }
  0xc3   : > { %v1283_v54 = vadd.f32 %v2221_v28, %v1247_v49  ;;  %v981_v55 = vadd.f32 %v980_v52, %v891_v51 }
  0xc5   : > { %v1315_v57 = vmax.f32 %v1283_v54, 0.0  ;;  %v1070_v58 = vadd.f32 %v1069_v14, %v981_v55  ;;  %v1839_v54 = vld [vmem:[%s2017_s13 + $0x148] sm:$0xf0] }
  0xc6   : > { %1791 = vmatmul.msk.bf16.gmra.mxu2 %vm826_vm0, %v1659_v53  ;;  %v1682_v53 = vld [vmem:[%s2017_s13 + $0x140] sm:$0xf] }
  0xc7   : > { %1347 = vst.msk [vmem:[%s2232_s23 + $0x8] sm:$0xff] %vm313_vm1, %v1315_v57  ;;  %v1145_v63 = vadd.f32 %v1070_v58, %v349_v56  ;;  %v2251_v0 = vpop.f32.mrf.mxu3  ;;  %v1683_v60 = vor.u32 %v1839_v54, %v1682_v53 }
  0xc8   : > { %v1212_v1 = vld [vmem:[#allocation2 + $0x10] sm:$0xff] }
  0xc9   : > { %v1248_v3 = vmul.f32 %v2209_v19, %v1212_v1  ;;  %1178 = vst.msk [vmem:[#allocation2 + $0x18] sm:$0xff] %vm313_vm1, %v1145_v63  ;;  %v1077_v4 = vpop.f32.mrf.mxu2  ;;  %v894_v5 = vpop.f32.mrf.mxu0  ;;  %v353_v63 = vld [vmem:[#allocation2 + $0x38] sm:$0xff] }
  0xca   : > { %v983_v7 = vpop.f32.mrf.mxu1 }
  0xcb   : > { %v1284_v8 = vadd.f32 %v2221_v28, %v1248_v3  ;;  %v984_v9 = vadd.f32 %v983_v7, %v894_v5 }
  0xcc   : > { %933 = vmatmul.bf16.gmra.mxu0 %v1639_v2 }
  0xcd   : > { %v1316_v12 = vmax.f32 %v1284_v8, 0.0  ;;  %v1073_v13 = vadd.f32 %v1072_v35, %v984_v9  ;;  %1022 = vmatmul.bf16.gmra.mxu1 %v1643_v6  ;;  %v1652_v35 = vld [vmem:[%s2017_s13 + $0x114] sm:$0xf0] }
  0xce   : > { %v1655_v43 = vor.u32 %v1831_v34, %v1652_v35 }
  0xcf   : > { %1348 = vst.msk [vmem:[%s2232_s23 + $0x10] sm:$0xff] %vm313_vm1, %v1316_v12  ;;  %v1146_v14 = vadd.f32 %v1073_v13, %v350_v10  ;;  %v2258_v15 = vpop.f32.mrf.mxu3  ;;  %v354_v13 = vld [vmem:[#allocation2 + $0x40] sm:$0xff] }
  0xd0   : > { %v1213_v18 = vld [vmem:[#allocation2 + $0x18] sm:$0xff] }
  0xd1   : > { %v1249_v20 = vmul.f32 %v2209_v19, %v1213_v18  ;;  %1179 = vst.msk [vmem:[#allocation2 + $0x20] sm:$0xff] %vm313_vm1, %v1146_v14  ;;  %v1079_v21 = vpop.f32.mrf.mxu2  ;;  %v896_v22 = vpop.f32.mrf.mxu0 }
  0xd2   : > { %v985_v23 = vpop.f32.mrf.mxu1 }
  0xd3   : > { %v1285_v25 = vadd.f32 %v2221_v28, %v1249_v20  ;;  %v986_v26 = vadd.f32 %v985_v23, %v896_v22 }
  0xd5   : > { %v1317_v29 = vmax.f32 %v1285_v25, 0.0  ;;  %v1075_v31 = vadd.f32 %v1074_v50, %v986_v26 }
  0xd6   : > { %1792 = vmatmul.msk.bf16.gmra.mxu2 %vm826_vm0, %v1671_v24 }
  0xd7   : > { %1349 = vst.msk [vmem:[%s2232_s23 + $0x18] sm:$0xff] %vm313_vm1, %v1317_v29  ;;  %v1147_v36 = vadd.f32 %v1075_v31, %v351_v27  ;;  %v2272_v37 = vpop.f32.mrf.mxu3  ;;  %v355_v29 = vld [vmem:[#allocation2 + $0x48] sm:$0xff] }
  0xd8   : > { %v1214_v38 = vld [vmem:[#allocation2 + $0x20] sm:$0xff] }
  0xd9   : > { %v1250_v40 = vmul.f32 %v2209_v19, %v1214_v38  ;;  %1180 = vst.msk [vmem:[#allocation2 + $0x28] sm:$0xff] %vm313_vm1, %v1147_v36  ;;  %v1082_v41 = vpop.f32.mrf.mxu2  ;;  %v899_v42 = vpop.f32.mrf.mxu0 }
  0xda   : > { %v988_v44 = vpop.f32.mrf.mxu1 }
  0xdb   : > { %v1286_v46 = vadd.f32 %v2221_v28, %v1250_v40  ;;  %v989_v47 = vadd.f32 %v988_v44, %v899_v42 }
  0xdc   : > { %938 = vmatmul.bf16.gmra.mxu0 %v1651_v39 }
  0xdd   : > { %v1318_v49 = vmax.f32 %v1286_v46, 0.0  ;;  %v1078_v50 = vadd.f32 %v1077_v4, %v989_v47  ;;  %1027 = vmatmul.bf16.gmra.mxu1 %v1655_v43  ;;  %v356_v43 = vld [vmem:[#allocation2 + $0x50] sm:$0xff] }
  0xdf   : > { %1350 = vst.msk [vmem:[%s2232_s23 + $0x20] sm:$0xff] %vm313_vm1, %v1318_v49  ;;  %v1148_v51 = vadd.f32 %v1078_v50, %v352_v48  ;;  %v2279_v52 = vpop.f32.mrf.mxu3 }
  0xe0   : > { %v1215_v55 = vld [vmem:[#allocation2 + $0x28] sm:$0xff] }
  0xe1   : > { %v1251_v56 = vmul.f32 %v2209_v19, %v1215_v55  ;;  %1181 = vst.msk [vmem:[#allocation2 + $0x30] sm:$0xff] %vm313_vm1, %v1148_v51  ;;  %v1084_v57 = vpop.f32.mrf.mxu2  ;;  %v901_v58 = vpop.f32.mrf.mxu0 }
  0xe2   : > { %v990_v59 = vpop.f32.mrf.mxu1 }
  0xe3   : > { %v1287_v61 = vadd.f32 %v2221_v28, %v1251_v56  ;;  %v991_v62 = vadd.f32 %v990_v59, %v901_v58 }
  0xe5   : > { %v1319_v1 = vmax.f32 %v1287_v61, 0.0  ;;  %v1080_v2 = vadd.f32 %v1079_v21, %v991_v62 }
  0xe6   : > { %1793 = vmatmul.msk.bf16.gmra.mxu2 %vm826_vm0, %v1683_v60 }
  0xe7   : > { %1351 = vst.msk [vmem:[%s2232_s23 + $0x28] sm:$0xff] %vm313_vm1, %v1319_v1  ;;  %v1149_v3 = vadd.f32 %v1080_v2, %v353_v63  ;;  %v2289_v4 = vpop.f32.mrf.mxu3 }
  0xe8   : > { %v1216_v5 = vld [vmem:[#allocation2 + $0x30] sm:$0xff] }
  0xe9   : > { %v1252_v6 = vmul.f32 %v2209_v19, %v1216_v5  ;;  %1182 = vst.msk [vmem:[#allocation2 + $0x38] sm:$0xff] %vm313_vm1, %v1149_v3  ;;  %v1087_v7 = vpop.f32.mrf.mxu2  ;;  %v904_v8 = vpop.f32.mrf.mxu0 }
  0xea   : > { %v993_v9 = vpop.f32.mrf.mxu1 }
  0xeb   : > { %v1288_v10 = vadd.f32 %v2221_v28, %v1252_v6  ;;  %v994_v12 = vadd.f32 %v993_v9, %v904_v8 }
  0xed   : > { %v1320_v14 = vmax.f32 %v1288_v10, 0.0  ;;  %v1083_v16 = vadd.f32 %v1082_v41, %v994_v12 }
  0xef   : > { %1352 = vst.msk [vmem:[%s2232_s23 + $0x30] sm:$0xff] %vm313_vm1, %v1320_v14  ;;  %v1150_v17 = vadd.f32 %v1083_v16, %v354_v13  ;;  %v1033_v18 = vpop.f32.mrf.mxu3 }
  0xf0   : > { %v1217_v20 = vld [vmem:[#allocation2 + $0x38] sm:$0xff]  ;;  %v2297_v21 = vadd.f32 %v1033_v18, %v2201_v11 }
  0xf1   : > { %v1253_v22 = vmul.f32 %v2209_v19, %v1217_v20  ;;  %1183 = vst.msk [vmem:[#allocation2 + $0x40] sm:$0xff] %vm313_vm1, %v1150_v17  ;;  %v1089_v23 = vpop.f32.mrf.mxu2  ;;  %v906_v24 = vpop.f32.mrf.mxu0 }
  0xf2   : > { %v995_v25 = vpop.f32.mrf.mxu1 }
  0xf3   : > { %v1289_v26 = vadd.f32 %v2221_v28, %v1253_v22  ;;  %v996_v27 = vadd.f32 %v995_v25, %v906_v24  ;;  %v359_v22 = vld [vmem:[#allocation2 + $0x68] sm:$0xff] }
  0xf5   : > { %v1321_v31 = vmax.f32 %v1289_v26, 0.0  ;;  %v1085_v32 = vadd.f32 %v1084_v57, %v996_v27  ;;  %v357_v57 = vld [vmem:[#allocation2 + $0x58] sm:$0xff] }
  0xf7   : > { %1353 = vst.msk [vmem:[%s2232_s23 + $0x38] sm:$0xff] %vm313_vm1, %v1321_v31  ;;  %v1151_v33 = vadd.f32 %v1085_v32, %v355_v29  ;;  %v1035_v34 = vpop.f32.mrf.mxu3 }
  0xf8   : > { %v1218_v11 = vld [vmem:[#allocation2 + $0x40] sm:$0xff]  ;;  %v2305_v35 = vadd.f32 %v1035_v34, %v2223_v30 }
  0xf9   : > { %v1254_v36 = vmul.f32 %v2209_v19, %v1218_v11  ;;  %1184 = vst.msk [vmem:[#allocation2 + $0x48] sm:$0xff] %vm313_vm1, %v1151_v33  ;;  %v1092_v38 = vpop.f32.mrf.mxu2  ;;  %v909_v39 = vpop.f32.mrf.mxu0 }
  0xfa   : > { %v998_v40 = vpop.f32.mrf.mxu1 }
  0xfb   : > { %v1290_v41 = vadd.f32 %v2221_v28, %v1254_v36  ;;  %v999_v42 = vadd.f32 %v998_v40, %v909_v39  ;;  %v360_v36 = vld [vmem:[#allocation2 + $0x70] sm:$0xff] }
  0xfd   : > { %v1322_v44 = vmax.f32 %v1290_v41, 0.0  ;;  %v1088_v46 = vadd.f32 %v1087_v7, %v999_v42  ;;  %v358_v7 = vld [vmem:[#allocation2 + $0x60] sm:$0xff] }
  0xff   : > { %1354 = vst.msk [vmem:[%s2232_s23 + $0x40] sm:$0xff] %vm313_vm1, %v1322_v44  ;;  %v1152_v47 = vadd.f32 %v1088_v46, %v356_v43  ;;  %v1038_v48 = vpop.f32.mrf.mxu3 }
 0x100   : > { %v1219_v30 = vld [vmem:[#allocation2 + $0x48] sm:$0xff]  ;;  %v2313_v49 = vadd.f32 %v1038_v48, %v2237_v45 }
 0x101   : > { %v1255_v50 = vmul.f32 %v2209_v19, %v1219_v30  ;;  %1185 = vst.msk [vmem:[#allocation2 + $0x50] sm:$0xff] %vm313_vm1, %v1152_v47  ;;  %v1094_v51 = vpop.f32.mrf.mxu2  ;;  %v911_v53 = vpop.f32.mrf.mxu0 }
 0x102   : > { %v1000_v54 = vpop.f32.mrf.mxu1 }
 0x103   : > { %v1291_v55 = vadd.f32 %v2221_v28, %v1255_v50  ;;  %v1001_v56 = vadd.f32 %v1000_v54, %v911_v53  ;;  %v361_v50 = vld [vmem:[#allocation2 + $0x78] sm:$0xff] }
 0x105   : > { %v1323_v58 = vmax.f32 %v1291_v55, 0.0  ;;  %v1090_v59 = vadd.f32 %v1089_v23, %v1001_v56 }
 0x107   : > { %1355 = vst.msk [vmem:[%s2232_s23 + $0x48] sm:$0xff] %vm313_vm1, %v1323_v58  ;;  %v1153_v60 = vadd.f32 %v1090_v59, %v357_v57  ;;  %v1040_v61 = vpop.f32.mrf.mxu3 }
 0x108   : > { %v1220_v45 = vld [vmem:[#allocation2 + $0x50] sm:$0xff]  ;;  %v2321_v62 = vadd.f32 %v1040_v61, %v2251_v0 }
 0x109   : > { %v1256_v63 = vmul.f32 %v2209_v19, %v1220_v45  ;;  %1186 = vst.msk [vmem:[#allocation2 + $0x58] sm:$0xff] %vm313_vm1, %v1153_v60  ;;  %v1097_v1 = vpop.f32.mrf.mxu2  ;;  %v914_v2 = vpop.f32.mrf.mxu0 }
 0x10a   : > { %v1003_v3 = vpop.f32.mrf.mxu1 }
 0x10b   : > { %v1292_v5 = vadd.f32 %v2221_v28, %v1256_v63  ;;  %v1004_v6 = vadd.f32 %v1003_v3, %v914_v2  ;;  %v362_v63 = vld [vmem:[#allocation2 + $0x80] sm:$0xff] }
 0x10d   : > { %v1324_v8 = vmax.f32 %v1292_v5, 0.0  ;;  %v1093_v9 = vadd.f32 %v1092_v38, %v1004_v6  ;;  %v374_v6 = vld [vmem:[#allocation2 + $0xe0] sm:$0xff] }
 0x10f   : > { %1356 = vst.msk [vmem:[%s2232_s23 + $0x50] sm:$0xff] %vm313_vm1, %v1324_v8  ;;  %v1154_v10 = vadd.f32 %v1093_v9, %v358_v7  ;;  %v1043_v12 = vpop.f32.mrf.mxu3 }
 0x110   : > { %v1221_v0 = vld [vmem:[#allocation2 + $0x58] sm:$0xff]  ;;  %v1044_v3 = vadd.f32 %v1043_v12, %v2258_v15  ;;  %v363_v15 = vld [vmem:[#allocation2 + $0x88] sm:$0xff] }
 0x111   : > { %v1257_v13 = vmul.f32 %v2209_v19, %v1221_v0  ;;  %1187 = vst.msk [vmem:[#allocation2 + $0x60] sm:$0xff] %vm313_vm1, %v1154_v10  ;;  %v1099_v14 = vpop.f32.mrf.mxu2  ;;  %v916_v16 = vpop.f32.mrf.mxu0 }
 0x112   : > { %v1005_v17 = vpop.f32.mrf.mxu1 }
 0x113   : > { %v1293_v18 = vadd.f32 %v2221_v28, %v1257_v13  ;;  %v1006_v20 = vadd.f32 %v1005_v17, %v916_v16 }
 0x115   : > { %v1325_v23 = vmax.f32 %v1293_v18, 0.0  ;;  %v1095_v24 = vadd.f32 %v1094_v51, %v1006_v20 }
 0x117   : > { %1357 = vst.msk [vmem:[%s2232_s23 + $0x58] sm:$0xff] %vm313_vm1, %v1325_v23  ;;  %v1155_v25 = vadd.f32 %v1095_v24, %v359_v22  ;;  %v1045_v26 = vpop.f32.mrf.mxu3  ;;  %v375_v24 = vld [vmem:[#allocation2 + $0xe8] sm:$0xff] }
 0x118   : > { %v1222_v27 = vld [vmem:[#allocation2 + $0x60] sm:$0xff]  ;;  %v1046_v22 = vadd.f32 %v1045_v26, %v2272_v37 }
 0x119   : > { %v1258_v29 = vmul.f32 %v2209_v19, %v1222_v27  ;;  %1188 = vst.msk [vmem:[#allocation2 + $0x68] sm:$0xff] %vm313_vm1, %v1155_v25  ;;  %v1102_v31 = vpop.f32.mrf.mxu2  ;;  %v919_v32 = vpop.f32.mrf.mxu0 }
 0x11a   : > { %v1008_v33 = vpop.f32.mrf.mxu1 }
 0x11b   : > { %v1294_v34 = vadd.f32 %v2221_v28, %v1258_v29  ;;  %v1009_v11 = vadd.f32 %v1008_v33, %v919_v32 }
 0x11d   : > { %v1326_v38 = vmax.f32 %v1294_v34, 0.0  ;;  %v1098_v39 = vadd.f32 %v1097_v1, %v1009_v11 }
 0x11f   : > { %1358 = vst.msk [vmem:[%s2232_s23 + $0x60] sm:$0xff] %vm313_vm1, %v1326_v38  ;;  %v1156_v40 = vadd.f32 %v1098_v39, %v360_v36  ;;  %v2338_v41 = vpop.f32.mrf.mxu3  ;;  %v364_v39 = vld [vmem:[#allocation2 + $0x90] sm:$0xff] }
 0x120   : > { %v1223_v42 = vld [vmem:[#allocation2 + $0x68] sm:$0xff] }
 0x121   : > { %v1259_v43 = vmul.f32 %v2209_v19, %v1223_v42  ;;  %1189 = vst.msk [vmem:[#allocation2 + $0x70] sm:$0xff] %vm313_vm1, %v1156_v40  ;;  %v1104_v44 = vpop.f32.mrf.mxu2  ;;  %v921_v46 = vpop.f32.mrf.mxu0 }
 0x122   : > { %v1010_v47 = vpop.f32.mrf.mxu1 }
 0x123   : > { %v1295_v48 = vadd.f32 %v2221_v28, %v1259_v43  ;;  %v1011_v30 = vadd.f32 %v1010_v47, %v921_v46  ;;  %v1049_v43 = vadd.f32 %v2338_v41, %v2279_v52  ;;  %v376_v47 = vld [vmem:[#allocation2 + $0xf0] sm:$0xff] }
 0x125   : > { %v1327_v51 = vmax.f32 %v1295_v48, 0.0  ;;  %v1100_v53 = vadd.f32 %v1099_v14, %v1011_v30 }
 0x127   : > { %1359 = vst.msk [vmem:[%s2232_s23 + $0x68] sm:$0xff] %vm313_vm1, %v1327_v51  ;;  %v1157_v54 = vadd.f32 %v1100_v53, %v361_v50  ;;  %v2345_v55 = vpop.f32.mrf.mxu3 }
 0x128   : > { %v1224_v56 = vld [vmem:[#allocation2 + $0x70] sm:$0xff] }
 0x129   : > { %v1260_v57 = vmul.f32 %v2209_v19, %v1224_v56  ;;  %1190 = vst.msk [vmem:[#allocation2 + $0x78] sm:$0xff] %vm313_vm1, %v1157_v54  ;;  %v1107_v58 = vpop.f32.mrf.mxu2  ;;  %v924_v59 = vpop.f32.mrf.mxu0 }
 0x12a   : > { %v1013_v60 = vpop.f32.mrf.mxu1 }
 0x12b   : > { %v1296_v61 = vadd.f32 %v2221_v28, %v1260_v57  ;;  %v1014_v45 = vadd.f32 %v1013_v60, %v924_v59 }
 0x12d   : > { %v1328_v1 = vmax.f32 %v1296_v61, 0.0  ;;  %v1103_v2 = vadd.f32 %v1102_v31, %v1014_v45  ;;  %v365_v61 = vld [vmem:[#allocation2 + $0x98] sm:$0xff] }
 0x12f   : > { %1360 = vst.msk [vmem:[%s2232_s23 + $0x70] sm:$0xff] %vm313_vm1, %v1328_v1  ;;  %v1158_v5 = vadd.f32 %v1103_v2, %v362_v63  ;;  %v1132_v7 = vpop.f32.mrf.mxu3  ;;  %v1051_v1 = vadd.f32 %v2345_v55, %v2289_v4 }
 0x130   : > { %v1225_v8 = vld [vmem:[#allocation2 + $0x78] sm:$0xff]  ;;  %v1133_v9 = vadd.f32 %v1132_v7, %v1044_v3 }
 0x131   : > { %v1261_v10 = vmul.f32 %v2209_v19, %v1225_v8  ;;  %1191 = vst.msk [vmem:[#allocation2 + $0x80] sm:$0xff] %vm313_vm1, %v1158_v5  ;;  %v1109_v0 = vpop.f32.mrf.mxu2  ;;  %v926_v13 = vpop.f32.mrf.mxu0  ;;  %v377_v5 = vld [vmem:[#allocation2 + $0xf8] sm:$0xff] }
 0x132   : > { %v1170_v14 = vadd.f32 %v1133_v9, %v374_v6  ;;  %v1015_v16 = vpop.f32.mrf.mxu1 }
 0x133   : > { %v1297_v17 = vadd.f32 %v2221_v28, %v1261_v10  ;;  %v1016_v18 = vadd.f32 %v1015_v16, %v926_v13 }
 0x134   : > { %1203 = vst.msk [vmem:[#allocation2 + $0xe0] sm:$0xff] %vm313_vm1, %v1170_v14 }
 0x135   : > { %v1329_v12 = vmax.f32 %v1297_v17, 0.0  ;;  %v1105_v20 = vadd.f32 %v1104_v44, %v1016_v18 }
 0x137   : > { %1361 = vst.msk [vmem:[%s2232_s23 + $0x78] sm:$0xff] %vm313_vm1, %v1329_v12  ;;  %v1159_v23 = vadd.f32 %v1105_v20, %v363_v15  ;;  %v1134_v25 = vpop.f32.mrf.mxu3  ;;  %v366_v15 = vld [vmem:[#allocation2 + $0xa0] sm:$0xff] }
 0x138   : > { %v1226_v27 = vld [vmem:[#allocation2 + $0x80] sm:$0xff]  ;;  %v1135_v29 = vadd.f32 %v1134_v25, %v1046_v22 }
 0x139   : > { %v1262_v31 = vmul.f32 %v2209_v19, %v1226_v27  ;;  %1192 = vst.msk [vmem:[#allocation2 + $0x88] sm:$0xff] %vm313_vm1, %v1159_v23  ;;  %v1112_v32 = vpop.f32.mrf.mxu2  ;;  %v929_v33 = vpop.f32.mrf.mxu0 }
 0x13a   : > { %v1171_v34 = vadd.f32 %v1135_v29, %v375_v24  ;;  %v1018_v11 = vpop.f32.mrf.mxu1 }
 0x13b   : > { %v1298_v36 = vadd.f32 %v2221_v28, %v1262_v31  ;;  %v1238_v38 = vld [vmem:[#allocation2 + $0xe0] sm:$0xff]  ;;  %v1019_v37 = vadd.f32 %v1018_v11, %v929_v33 }
 0x13c   : > { %v1274_v26 = vmul.f32 %v2209_v19, %v1238_v38  ;;  %1204 = vst.msk [vmem:[#allocation2 + $0xe8] sm:$0xff] %vm313_vm1, %v1171_v34  ;;  %v367_v38 = vld [vmem:[#allocation2 + $0xa8] sm:$0xff] }
 0x13d   : > { %v1330_v40 = vmax.f32 %v1298_v36, 0.0  ;;  %v1108_v42 = vadd.f32 %v1107_v58, %v1019_v37 }
 0x13e   : > { %v1310_v44 = vadd.f32 %v2221_v28, %v1274_v26 }
 0x13f   : > { %1362 = vst.msk [vmem:[%s2232_s23 + $0x80] sm:$0xff] %vm313_vm1, %v1330_v40  ;;  %v1160_v46 = vadd.f32 %v1108_v42, %v364_v39  ;;  %v1137_v48 = vpop.f32.mrf.mxu3 }
 0x140   : > { %v1342_v30 = vmax.f32 %v1310_v44, 0.0  ;;  %v1227_v50 = vld [vmem:[#allocation2 + $0x88] sm:$0xff]  ;;  %v1138_v51 = vadd.f32 %v1137_v48, %v1049_v43 }
 0x141   : > { %v1263_v53 = vmul.f32 %v2209_v19, %v1227_v50  ;;  %1193 = vst.msk [vmem:[#allocation2 + $0x90] sm:$0xff] %vm313_vm1, %v1160_v46  ;;  %v1114_v54 = vpop.f32.mrf.mxu2  ;;  %v931_v56 = vpop.f32.mrf.mxu0  ;;  %v370_v46 = vld [vmem:[#allocation2 + $0xc0] sm:$0xff] }
 0x142   : > { %1374 = vst.msk [vmem:[%s2232_s23 + $0xe0] sm:$0xff] %vm313_vm1, %v1342_v30  ;;  %v1172_v52 = vadd.f32 %v1138_v51, %v376_v47  ;;  %v1020_v41 = vpop.f32.mrf.mxu1 }
 0x143   : > { %v1299_v57 = vadd.f32 %v2221_v28, %v1263_v53  ;;  %v1239_v58 = vld [vmem:[#allocation2 + $0xe8] sm:$0xff]  ;;  %v1021_v59 = vadd.f32 %v1020_v41, %v931_v56  ;;  %v368_v56 = vld [vmem:[#allocation2 + $0xb0] sm:$0xff] }
 0x144   : > { %v1275_v60 = vmul.f32 %v2209_v19, %v1239_v58  ;;  %1205 = vst.msk [vmem:[#allocation2 + $0xf0] sm:$0xff] %vm313_vm1, %v1172_v52 }
 0x145   : > { %v1331_v45 = vmax.f32 %v1299_v57, 0.0  ;;  %v1110_v63 = vadd.f32 %v1109_v0, %v1021_v59 }
 0x146   : > { %v1311_v2 = vadd.f32 %v2221_v28, %v1275_v60 }
 0x147   : > { %1363 = vst.msk [vmem:[%s2232_s23 + $0x88] sm:$0xff] %vm313_vm1, %v1331_v45  ;;  %v1161_v3 = vadd.f32 %v1110_v63, %v365_v61  ;;  %v1139_v6 = vpop.f32.mrf.mxu3 }
 0x148   : > { %v1343_v7 = vmax.f32 %v1311_v2, 0.0  ;;  %v1228_v8 = vld [vmem:[#allocation2 + $0x90] sm:$0xff]  ;;  %v1140_v9 = vadd.f32 %v1139_v6, %v1051_v1 }
 0x149   : > { %v1264_v10 = vmul.f32 %v2209_v19, %v1228_v8  ;;  %1194 = vst.msk [vmem:[#allocation2 + $0x98] sm:$0xff] %vm313_vm1, %v1161_v3  ;;  %v1117_v13 = vpop.f32.mrf.mxu2  ;;  %v934_v0 = vpop.f32.mrf.mxu0 }
 0x14a   : > { %1375 = vst.msk [vmem:[%s2232_s23 + $0xe8] sm:$0xff] %vm313_vm1, %v1343_v7  ;;  %v1173_v4 = vadd.f32 %v1140_v9, %v377_v5  ;;  %v1023_v55 = vpop.f32.mrf.mxu1  ;;  %v369_v5 = vld [vmem:[#allocation2 + $0xb8] sm:$0xff] }
 0x14b   : > { %v1300_v14 = vadd.f32 %v2221_v28, %v1264_v10  ;;  %v1240_v16 = vld [vmem:[#allocation2 + $0xf0] sm:$0xff]  ;;  %v1024_v17 = vadd.f32 %v1023_v55, %v934_v0 }
 0x14c   : > { %v1276_v18 = vmul.f32 %v2209_v19, %v1240_v16  ;;  %1206 = vst.msk [vmem:[#allocation2 + $0xf8] sm:$0xff] %vm313_vm1, %v1173_v4  ;;  %v372_v4 = vld [vmem:[#allocation2 + $0xd0] sm:$0xff] }
 0x14d   : > { %v1332_v12 = vmax.f32 %v1300_v14, 0.0  ;;  %v1113_v20 = vadd.f32 %v1112_v32, %v1024_v17 }
 0x14e   : > { %v1312_v22 = vadd.f32 %v2221_v28, %v1276_v18 }
 0x14f   : > { %1364 = vst.msk [vmem:[%s2232_s23 + $0x90] sm:$0xff] %vm313_vm1, %v1332_v12  ;;  %v1162_v23 = vadd.f32 %v1113_v20, %v366_v15 }
 0x150   : > { %v1344_v24 = vmax.f32 %v1312_v22, 0.0  ;;  %v1229_v25 = vld [vmem:[#allocation2 + $0x98] sm:$0xff] }
 0x151   : > { %v1265_v27 = vmul.f32 %v2209_v19, %v1229_v25  ;;  %1195 = vst.msk [vmem:[#allocation2 + $0xa0] sm:$0xff] %vm313_vm1, %v1162_v23  ;;  %v1119_v29 = vpop.f32.mrf.mxu2  ;;  %v936_v31 = vpop.f32.mrf.mxu0 }
 0x152   : > { %1376 = vst.msk [vmem:[%s2232_s23 + $0xf0] sm:$0xff] %vm313_vm1, %v1344_v24  ;;  %v1025_v33 = vpop.f32.mrf.mxu1  ;;  %v373_v24 = vld [vmem:[#allocation2 + $0xd8] sm:$0xff] }
 0x153   : > { %v1301_v34 = vadd.f32 %v2221_v28, %v1265_v27  ;;  %v1241_v32 = vld [vmem:[#allocation2 + $0xf8] sm:$0xff]  ;;  %v1026_v11 = vadd.f32 %v1025_v33, %v936_v31 }
 0x154   : > { %v1277_v36 = vmul.f32 %v2209_v19, %v1241_v32 }
 0x155   : > { %v1333_v37 = vmax.f32 %v1301_v34, 0.0  ;;  %v1115_v26 = vadd.f32 %v1114_v54, %v1026_v11 }
 0x156   : > { %v1313_v39 = vadd.f32 %v2221_v28, %v1277_v36 }
 0x157   : > { %1365 = vst.msk [vmem:[%s2232_s23 + $0x98] sm:$0xff] %vm313_vm1, %v1333_v37  ;;  %v1163_v40 = vadd.f32 %v1115_v26, %v367_v38 }
 0x158   : > { %v1345_v42 = vmax.f32 %v1313_v39, 0.0  ;;  %v1230_v43 = vld [vmem:[#allocation2 + $0xa0] sm:$0xff] }
 0x159   : > { %v1266_v44 = vmul.f32 %v2209_v19, %v1230_v43  ;;  %1196 = vst.msk [vmem:[#allocation2 + $0xa8] sm:$0xff] %vm313_vm1, %v1163_v40  ;;  %v1122_v47 = vpop.f32.mrf.mxu2  ;;  %v939_v48 = vpop.f32.mrf.mxu0 }
 0x15a   : > { %1377 = vst.msk [vmem:[%s2232_s23 + $0xf8] sm:$0xff] %vm313_vm1, %v1345_v42  ;;  %v1123_v30 = vadd.f32 %v1122_v47, %v2297_v21  ;;  %v1028_v50 = vpop.f32.mrf.mxu1  ;;  %v371_v21 = vld [vmem:[#allocation2 + $0xc8] sm:$0xff] }
 0x15b   : > { %v1302_v51 = vadd.f32 %v2221_v28, %v1266_v44  ;;  %v1029_v53 = vadd.f32 %v1028_v50, %v939_v48 }
 0x15c   : > { %v1166_v54 = vadd.f32 %v1123_v30, %v370_v46 }
 0x15d   : > { %v1334_v52 = vmax.f32 %v1302_v51, 0.0  ;;  %v1118_v41 = vadd.f32 %v1117_v13, %v1029_v53 }
 0x15e   : > { %1199 = vst.msk [vmem:[#allocation2 + $0xc0] sm:$0xff] %vm313_vm1, %v1166_v54 }
 0x15f   : > { %1366 = vst.msk [vmem:[%s2232_s23 + $0xa0] sm:$0xff] %vm313_vm1, %v1334_v52  ;;  %v1164_v57 = vadd.f32 %v1118_v41, %v368_v56 }
 0x160   : > { %v1231_v58 = vld [vmem:[#allocation2 + $0xa8] sm:$0xff] }
 0x161   : > { %v1267_v59 = vmul.f32 %v2209_v19, %v1231_v58  ;;  %1197 = vst.msk [vmem:[#allocation2 + $0xb0] sm:$0xff] %vm313_vm1, %v1164_v57  ;;  %v1124_v60 = vpop.f32.mrf.mxu2  ;;  %v941_v61 = vpop.f32.mrf.mxu0 }
 0x162   : > { %v1125_v45 = vadd.f32 %v1124_v60, %v2305_v35  ;;  %v1030_v63 = vpop.f32.mrf.mxu1 }
 0x163   : > { %v1303_v1 = vadd.f32 %v2221_v28, %v1267_v59  ;;  %v1031_v2 = vadd.f32 %v1030_v63, %v941_v61 }
 0x164   : > { %v1167_v3 = vadd.f32 %v1125_v45, %v371_v21 }
 0x165   : > { %v1335_v6 = vmax.f32 %v1303_v1, 0.0  ;;  %v1234_v7 = vld [vmem:[#allocation2 + $0xc0] sm:$0xff]  ;;  %v1120_v8 = vadd.f32 %v1119_v29, %v1031_v2 }
 0x166   : > { %v1270_v9 = vmul.f32 %v2209_v19, %v1234_v7  ;;  %1200 = vst.msk [vmem:[#allocation2 + $0xc8] sm:$0xff] %vm313_vm1, %v1167_v3 }
 0x167   : > { %1367 = vst.msk [vmem:[%s2232_s23 + $0xa8] sm:$0xff] %vm313_vm1, %v1335_v6  ;;  %v1165_v10 = vadd.f32 %v1120_v8, %v369_v5 }
 0x168   : > { %v1306_v35 = vadd.f32 %v2221_v28, %v1270_v9  ;;  %v1232_v13 = vld [vmem:[#allocation2 + $0xb0] sm:$0xff] }
 0x169   : > { %v1268_v0 = vmul.f32 %v2209_v19, %v1232_v13  ;;  %1198 = vst.msk [vmem:[#allocation2 + $0xb8] sm:$0xff] %vm313_vm1, %v1165_v10  ;;  %v1127_v55 = vpop.f32.mrf.mxu2 }
 0x16a   : > { %v1338_v14 = vmax.f32 %v1306_v35, 0.0  ;;  %v1128_v16 = vadd.f32 %v1127_v55, %v2313_v49 }
 0x16b   : > { %v1304_v17 = vadd.f32 %v2221_v28, %v1268_v0 }
 0x16c   : > { %1370 = vst.msk [vmem:[%s2232_s23 + $0xc0] sm:$0xff] %vm313_vm1, %v1338_v14  ;;  %v1168_v18 = vadd.f32 %v1128_v16, %v372_v4 }
 0x16d   : > { %v1336_v15 = vmax.f32 %v1304_v17, 0.0  ;;  %v1235_v12 = vld [vmem:[#allocation2 + $0xc8] sm:$0xff] }
 0x16e   : > { %v1271_v20 = vmul.f32 %v2209_v19, %v1235_v12  ;;  %1201 = vst.msk [vmem:[#allocation2 + $0xd0] sm:$0xff] %vm313_vm1, %v1168_v18 }
 0x16f   : > { %1368 = vst.msk [vmem:[%s2232_s23 + $0xb0] sm:$0xff] %vm313_vm1, %v1336_v15 }
 0x170   : > { %v1307_v22 = vadd.f32 %v2221_v28, %v1271_v20  ;;  %v1233_v23 = vld [vmem:[#allocation2 + $0xb8] sm:$0xff] }
 0x171   : > { %v1269_v49 = vmul.f32 %v2209_v19, %v1233_v23  ;;  %v1129_v25 = vpop.f32.mrf.mxu2 }
 0x172   : > { %v1339_v27 = vmax.f32 %v1307_v22, 0.0  ;;  %v1130_v29 = vadd.f32 %v1129_v25, %v2321_v62 }
 0x173   : > { %v1305_v31 = vadd.f32 %v2221_v28, %v1269_v49 }
 0x174   : > { %1371 = vst.msk [vmem:[%s2232_s23 + $0xc8] sm:$0xff] %vm313_vm1, %v1339_v27  ;;  %v1169_v33 = vadd.f32 %v1130_v29, %v373_v24 }
 0x175   : > { %v1337_v34 = vmax.f32 %v1305_v31, 0.0  ;;  %v1236_v32 = vld [vmem:[#allocation2 + $0xd0] sm:$0xff] }
 0x176   : > { %v1272_v11 = vmul.f32 %v2209_v19, %v1236_v32  ;;  %1202 = vst.msk [vmem:[#allocation2 + $0xd8] sm:$0xff] %vm313_vm1, %v1169_v33 }
 0x177   : > { %1369 = vst.msk [vmem:[%s2232_s23 + $0xb8] sm:$0xff] %vm313_vm1, %v1337_v34 }
 0x178   : > { %v1308_v36 = vadd.f32 %v2221_v28, %v1272_v11 }
 0x17a   : > { %v1340_v38 = vmax.f32 %v1308_v36, 0.0 }
 0x17c   : > { %1372 = vst.msk [vmem:[%s2232_s23 + $0xd0] sm:$0xff] %vm313_vm1, %v1340_v38 }
 0x17d   : > { %v1237_v62 = vld [vmem:[#allocation2 + $0xd8] sm:$0xff] }
 0x17e   : > { %v1273_v37 = vmul.f32 %v2209_v19, %v1237_v62 }
 0x180   : > { %v1309_v26 = vadd.f32 %v2221_v28, %v1273_v37 }
 0x182   : > { %v1341_v39 = vmax.f32 %v1309_v26, 0.0 }
 0x184   : > { %1373 = vst.msk [vmem:[%s2232_s23 + $0xd8] sm:$0xff] %vm313_vm1, %v1341_v39 }
 0x185 PF: > { %s14_s17 = sadd.s32 1, %s1932_s17   ;;  %s2460_s15 = smov %s1928_s16 }
 0x186   : > { %p11_p5 = scmp.ge.s32.totalorder %s14_s17, 4   ;;  %s2461_s16 = smov %s2463_s18 }
 0x188   :  { %13 = sbr.rel (!%p11_p5) target bundleno = 2 (0x2), region = 83 }

// kernel: _stem_and_pool.7
= control target key start
LH: loop header
LB: loop body
LE: loop exit
PB: predicated region body
PF: predicated region fallthrough
CT: control target
= control target key end

     0   :  { %vm152_vm0 = vcmask 523264   ;;  %s1095_s0 = inlined_call_operand.vmem [shape: f32[9,128,64], index: 0, kind: input, shape index: {}]   ;;  %s1096_s1 = inlined_call_operand.vmem [shape: f32[128,64], index: 1, kind: output, shape index: {}]  }
   0x1   :  { %v8_v0 = vld [vmem:[%s1095_s0] sm:$0xff]  ;;  %v9_v13 = vld [vmem:[%s1095_s0 + $0x8] sm:$0xff]  ;;  %v10_v32 = vld [vmem:[%s1095_s0 + $0x10] sm:$0xff] }
   0x2   :  { %v24_v1 = vld [vmem:[%s1095_s0 + $0x80] sm:$0xff]  ;;  %v153_v5 = vsel %vm152_vm0, %v8_v0, -inf  ;;  %v25_v14 = vld [vmem:[%s1095_s0 + $0x88] sm:$0xff]  ;;  %v170_v19 = vsel %vm152_vm0, %v9_v13, -inf  ;;  %v26_v33 = vld [vmem:[%s1095_s0 + $0x90] sm:$0xff]  ;;  %v187_v38 = vsel %vm152_vm0, %v10_v32, -inf }
   0x3   :  { %v40_v2 = vld [vmem:[%s1095_s0 + $0x100] sm:$0xff]  ;;  %v154_v6 = vsel %vm152_vm0, %v24_v1, -inf  ;;  %v41_v15 = vld [vmem:[%s1095_s0 + $0x108] sm:$0xff]  ;;  %v171_v20 = vsel %vm152_vm0, %v25_v14, -inf  ;;  %v42_v34 = vld [vmem:[%s1095_s0 + $0x110] sm:$0xff]  ;;  %v188_v39 = vsel %vm152_vm0, %v26_v33, -inf }
   0x4   :  { %v56_v3 = vld [vmem:[%s1095_s0 + $0x180] sm:$0xff]  ;;  %v156_v7 = vsel %vm152_vm0, %v40_v2, -inf  ;;  %v155_v11 = vmax.f32 %v153_v5, %v154_v6  ;;  %v57_v18 = vld [vmem:[%s1095_s0 + $0x188] sm:$0xff]  ;;  %v173_v21 = vsel %vm152_vm0, %v41_v15, -inf  ;;  %v172_v27 = vmax.f32 %v170_v19, %v171_v20  ;;  %v58_v37 = vld [vmem:[%s1095_s0 + $0x190] sm:$0xff] }
   0x5   :  { %v72_v4 = vld [vmem:[%s1095_s0 + $0x200] sm:$0xff]  ;;  %v158_v12 = vsel %vm152_vm0, %v56_v3, -inf  ;;  %v73_v24 = vld [vmem:[%s1095_s0 + $0x208] sm:$0xff]  ;;  %v175_v31 = vsel %vm152_vm0, %v57_v18, -inf  ;;  %v190_v40 = vsel %vm152_vm0, %v42_v34, -inf  ;;  %v74_v45 = vld [vmem:[%s1095_s0 + $0x210] sm:$0xff]  ;;  %v189_v46 = vmax.f32 %v187_v38, %v188_v39 }
   0x6   :  { %v88_v8 = vld [vmem:[%s1095_s0 + $0x280] sm:$0xff]  ;;  %v157_v17 = vmax.f32 %v155_v11, %v156_v7  ;;  %v160_v22 = vsel %vm152_vm0, %v72_v4, -inf  ;;  %v89_v25 = vld [vmem:[%s1095_s0 + $0x288] sm:$0xff]  ;;  %v174_v36 = vmax.f32 %v172_v27, %v173_v21  ;;  %v177_v44 = vsel %vm152_vm0, %v73_v24, -inf  ;;  %v11_v51 = vld [vmem:[%s1095_s0 + $0x18] sm:$0xff] }
   0x7   :  { %v104_v9 = vld [vmem:[%s1095_s0 + $0x300] sm:$0xff]  ;;  %v162_v23 = vsel %vm152_vm0, %v88_v8, -inf  ;;  %v105_v26 = vld [vmem:[%s1095_s0 + $0x308] sm:$0xff]  ;;  %v179_v48 = vsel %vm152_vm0, %v89_v25, -inf  ;;  %v192_v50 = vsel %vm152_vm0, %v58_v37, -inf  ;;  %v27_v52 = vld [vmem:[%s1095_s0 + $0x98] sm:$0xff]  ;;  %v191_v58 = vmax.f32 %v189_v46, %v190_v40 }
   0x8   :  { %v120_v10 = vld [vmem:[%s1095_s0 + $0x380] sm:$0xff]  ;;  %v159_v28 = vmax.f32 %v157_v17, %v158_v12  ;;  %v164_v29 = vsel %vm152_vm0, %v104_v9, -inf  ;;  %v121_v35 = vld [vmem:[%s1095_s0 + $0x388] sm:$0xff]  ;;  %v176_v47 = vmax.f32 %v174_v36, %v175_v31  ;;  %v181_v49 = vsel %vm152_vm0, %v105_v26, -inf  ;;  %v43_v53 = vld [vmem:[%s1095_s0 + $0x118] sm:$0xff] }
   0x9   :  { %v136_v16 = vld [vmem:[%s1095_s0 + $0x400] sm:$0xff]  ;;  %v166_v30 = vsel %vm152_vm0, %v120_v10, -inf  ;;  %v137_v43 = vld [vmem:[%s1095_s0 + $0x408] sm:$0xff]  ;;  %v183_v55 = vsel %vm152_vm0, %v121_v35, -inf  ;;  %v90_v56 = vld [vmem:[%s1095_s0 + $0x290] sm:$0xff]  ;;  %v204_v60 = vsel %vm152_vm0, %v11_v51, -inf  ;;  %v193_v4 = vmax.f32 %v191_v58, %v192_v50 }
   0xa   :  { %v161_v41 = vmax.f32 %v159_v28, %v160_v22  ;;  %v168_v42 = vsel %vm152_vm0, %v136_v16, -inf  ;;  %v106_v57 = vld [vmem:[%s1095_s0 + $0x310] sm:$0xff]  ;;  %v59_v59 = vld [vmem:[%s1095_s0 + $0x198] sm:$0xff]  ;;  %v178_v61 = vmax.f32 %v176_v47, %v177_v44  ;;  %v194_v62 = vsel %vm152_vm0, %v74_v45, -inf  ;;  %v12_v6 = vld [vmem:[%s1095_s0 + $0x20] sm:$0xff] }
   0xb   :  { %v75_v63 = vld [vmem:[%s1095_s0 + $0x218] sm:$0xff]  ;;  %v205_v0 = vsel %vm152_vm0, %v27_v52, -inf  ;;  %v207_v1 = vsel %vm152_vm0, %v43_v53, -inf  ;;  %v185_v3 = vsel %vm152_vm0, %v137_v43, -inf  ;;  %v28_v7 = vld [vmem:[%s1095_s0 + $0xa0] sm:$0xff]  ;;  %v196_v10 = vsel %vm152_vm0, %v90_v56, -inf }
   0xc   :  { %v163_v54 = vmax.f32 %v161_v41, %v162_v23  ;;  %v206_v5 = vmax.f32 %v204_v60, %v205_v0  ;;  %v44_v8 = vld [vmem:[%s1095_s0 + $0x120] sm:$0xff]  ;;  %v180_v9 = vmax.f32 %v178_v61, %v179_v48  ;;  %v198_v11 = vsel %vm152_vm0, %v106_v57, -inf  ;;  %v122_v14 = vld [vmem:[%s1095_s0 + $0x390] sm:$0xff]  ;;  %v91_v16 = vld [vmem:[%s1095_s0 + $0x298] sm:$0xff] }
   0xd   :  { %v209_v12 = vsel %vm152_vm0, %v59_v59, -inf  ;;  %v195_v15 = vmax.f32 %v193_v4, %v194_v62  ;;  %v211_v18 = vsel %vm152_vm0, %v75_v63, -inf  ;;  %v60_v19 = vld [vmem:[%s1095_s0 + $0x1a0] sm:$0xff]  ;;  %v138_v21 = vld [vmem:[%s1095_s0 + $0x410] sm:$0xff]  ;;  %v221_v22 = vsel %vm152_vm0, %v12_v6, -inf  ;;  %v107_v27 = vld [vmem:[%s1095_s0 + $0x318] sm:$0xff] }
   0xe   :  { %v165_v2 = vmax.f32 %v163_v54, %v164_v29  ;;  %v208_v17 = vmax.f32 %v206_v5, %v207_v1  ;;  %v182_v20 = vmax.f32 %v180_v9, %v181_v49  ;;  %v222_v23 = vsel %vm152_vm0, %v28_v7, -inf  ;;  %v76_v29 = vld [vmem:[%s1095_s0 + $0x220] sm:$0xff]  ;;  %v13_v31 = vld [vmem:[%s1095_s0 + $0x28] sm:$0xff]  ;;  %v123_v39 = vld [vmem:[%s1095_s0 + $0x398] sm:$0xff] }
   0xf   :  { %v224_v24 = vsel %vm152_vm0, %v44_v8, -inf  ;;  %v197_v26 = vmax.f32 %v195_v15, %v196_v10  ;;  %v200_v33 = vsel %vm152_vm0, %v122_v14, -inf  ;;  %v213_v34 = vsel %vm152_vm0, %v91_v16, -inf  ;;  %v29_v36 = vld [vmem:[%s1095_s0 + $0xa8] sm:$0xff]  ;;  %v92_v41 = vld [vmem:[%s1095_s0 + $0x2a0] sm:$0xff]  ;;  %v139_v50 = vld [vmem:[%s1095_s0 + $0x418] sm:$0xff] }
  0x10   :  { %v167_v13 = vmax.f32 %v165_v2, %v166_v30  ;;  %v210_v28 = vmax.f32 %v208_v17, %v209_v12  ;;  %v223_v30 = vmax.f32 %v221_v22, %v222_v23  ;;  %v184_v32 = vmax.f32 %v182_v20, %v183_v55  ;;  %v45_v43 = vld [vmem:[%s1095_s0 + $0x128] sm:$0xff]  ;;  %v108_v52 = vld [vmem:[%s1095_s0 + $0x320] sm:$0xff]  ;;  %v14_v60 = vld [vmem:[%s1095_s0 + $0x30] sm:$0xff] }
  0x11   :  { %v226_v35 = vsel %vm152_vm0, %v60_v19, -inf  ;;  %v199_v37 = vmax.f32 %v197_v26, %v198_v11  ;;  %v202_v38 = vsel %vm152_vm0, %v138_v21, -inf  ;;  %v215_v45 = vsel %vm152_vm0, %v107_v27, -inf  ;;  %v61_v47 = vld [vmem:[%s1095_s0 + $0x1a8] sm:$0xff]  ;;  %v30_v61 = vld [vmem:[%s1095_s0 + $0xb0] sm:$0xff]  ;;  %v124_v0 = vld [vmem:[%s1095_s0 + $0x3a0] sm:$0xff] }
  0x12   :  { %v169_v25 = vmax.f32 %v167_v13, %v168_v42  ;;  %v212_v40 = vmax.f32 %v210_v28, %v211_v18  ;;  %v225_v42 = vmax.f32 %v223_v30, %v224_v24  ;;  %v186_v44 = vmax.f32 %v184_v32, %v185_v3  ;;  %v77_v54 = vld [vmem:[%s1095_s0 + $0x228] sm:$0xff]  ;;  %v46_v3 = vld [vmem:[%s1095_s0 + $0x130] sm:$0xff]  ;;  %v140_v11 = vld [vmem:[%s1095_s0 + $0x420] sm:$0xff] }
  0x13   :  { %v228_v46 = vsel %vm152_vm0, %v76_v29, -inf  ;;  %v238_v48 = vsel %vm152_vm0, %v13_v31, -inf  ;;  %v201_v49 = vmax.f32 %v199_v37, %v200_v33  ;;  %v239_v55 = vsel %vm152_vm0, %v29_v36, -inf  ;;  %v93_v6 = vld [vmem:[%s1095_s0 + $0x2a8] sm:$0xff]  ;;  %v62_v9 = vld [vmem:[%s1095_s0 + $0x1b0] sm:$0xff]  ;;  %v15_v21 = vld [vmem:[%s1095_s0 + $0x38] sm:$0xff] }
  0x14   :  { %425 = vst.msk [vmem:[%s1096_s1] sm:$0xff] %vm152_vm0, %v169_v25  ;;  %v214_v51 = vmax.f32 %v212_v40, %v213_v34  ;;  %v227_v53 = vmax.f32 %v225_v42, %v226_v35  ;;  %v217_v56 = vsel %vm152_vm0, %v123_v39, -inf  ;;  %v230_v57 = vsel %vm152_vm0, %v92_v41, -inf  ;;  %v109_v13 = vld [vmem:[%s1095_s0 + $0x328] sm:$0xff]  ;;  %v78_v18 = vld [vmem:[%s1095_s0 + $0x230] sm:$0xff]  ;;  %v31_v22 = vld [vmem:[%s1095_s0 + $0xb8] sm:$0xff] }
  0x15   :  { %426 = vst.msk [vmem:[%s1096_s1 + $0x8] sm:$0xff] %vm152_vm0, %v186_v44  ;;  %v240_v58 = vmax.f32 %v238_v48, %v239_v55  ;;  %v241_v59 = vsel %vm152_vm0, %v45_v43, -inf  ;;  %v203_v62 = vmax.f32 %v201_v49, %v202_v38  ;;  %v243_v2 = vsel %vm152_vm0, %v61_v47, -inf  ;;  %v47_v27 = vld [vmem:[%s1095_s0 + $0x138] sm:$0xff]  ;;  %v125_v29 = vld [vmem:[%s1095_s0 + $0x3a8] sm:$0xff]  ;;  %v94_v32 = vld [vmem:[%s1095_s0 + $0x2b0] sm:$0xff] }
  0x16   :  { %v216_v63 = vmax.f32 %v214_v51, %v215_v45  ;;  %v229_v1 = vmax.f32 %v227_v53, %v228_v46  ;;  %v219_v4 = vsel %vm152_vm0, %v139_v50, -inf  ;;  %v232_v5 = vsel %vm152_vm0, %v108_v52, -inf  ;;  %v63_v34 = vld [vmem:[%s1095_s0 + $0x1b8] sm:$0xff]  ;;  %v141_v36 = vld [vmem:[%s1095_s0 + $0x428] sm:$0xff]  ;;  %v110_v37 = vld [vmem:[%s1095_s0 + $0x330] sm:$0xff] }
  0x17   :  { %v242_v7 = vmax.f32 %v240_v58, %v241_v59  ;;  %v245_v8 = vsel %vm152_vm0, %v77_v54, -inf  ;;  %427 = vst.msk [vmem:[%s1096_s1 + $0x10] sm:$0xff] %vm152_vm0, %v203_v62  ;;  %v255_v14 = vsel %vm152_vm0, %v14_v60, -inf  ;;  %v256_v15 = vsel %vm152_vm0, %v30_v61, -inf  ;;  %v79_v43 = vld [vmem:[%s1095_s0 + $0x238] sm:$0xff]  ;;  %v16_v46 = vld [vmem:[%s1095_s0 + $0x40] sm:$0xff] }
  0x18   :  { %v218_v10 = vmax.f32 %v216_v63, %v217_v56  ;;  %v231_v12 = vmax.f32 %v229_v1, %v230_v57  ;;  %v234_v16 = vsel %vm152_vm0, %v124_v0, -inf  ;;  %v257_v19 = vmax.f32 %v255_v14, %v256_v15  ;;  %v32_v47 = vld [vmem:[%s1095_s0 + $0xc0] sm:$0xff]  ;;  %v126_v50 = vld [vmem:[%s1095_s0 + $0x3b0] sm:$0xff]  ;;  %v95_v56 = vld [vmem:[%s1095_s0 + $0x2b8] sm:$0xff] }
  0x19   :  { %v244_v17 = vmax.f32 %v242_v7, %v243_v2  ;;  %v258_v20 = vsel %vm152_vm0, %v46_v3, -inf  ;;  %v247_v25 = vsel %vm152_vm0, %v93_v6, -inf  ;;  %v260_v26 = vsel %vm152_vm0, %v62_v9, -inf  ;;  %v48_v58 = vld [vmem:[%s1095_s0 + $0x140] sm:$0xff]  ;;  %v142_v60 = vld [vmem:[%s1095_s0 + $0x430] sm:$0xff]  ;;  %v111_v3 = vld [vmem:[%s1095_s0 + $0x338] sm:$0xff] }
  0x1a   :  { %v220_v23 = vmax.f32 %v218_v10, %v219_v4  ;;  %v233_v24 = vmax.f32 %v231_v12, %v232_v5  ;;  %v236_v28 = vsel %vm152_vm0, %v140_v11, -inf  ;;  %v249_v31 = vsel %vm152_vm0, %v109_v13, -inf  ;;  %v64_v59 = vld [vmem:[%s1095_s0 + $0x1c0] sm:$0xff]  ;;  %v17_v7 = vld [vmem:[%s1095_s0 + $0x48] sm:$0xff]  ;;  %v127_v15 = vld [vmem:[%s1095_s0 + $0x3b8] sm:$0xff] }
  0x1b   :  { %v246_v30 = vmax.f32 %v244_v17, %v245_v8  ;;  %v259_v33 = vmax.f32 %v257_v19, %v258_v20  ;;  %v262_v38 = vsel %vm152_vm0, %v78_v18, -inf  ;;  %v272_v39 = vsel %vm152_vm0, %v15_v21, -inf  ;;  %v80_v5 = vld [vmem:[%s1095_s0 + $0x240] sm:$0xff]  ;;  %v33_v12 = vld [vmem:[%s1095_s0 + $0xc8] sm:$0xff] }
  0x1c   :  { %428 = vst.msk [vmem:[%s1096_s1 + $0x18] sm:$0xff] %vm152_vm0, %v220_v23  ;;  %v235_v35 = vmax.f32 %v233_v24, %v234_v16  ;;  %v273_v40 = vsel %vm152_vm0, %v31_v22, -inf  ;;  %v275_v45 = vsel %vm152_vm0, %v47_v27, -inf  ;;  %v251_v49 = vsel %vm152_vm0, %v125_v29, -inf  ;;  %v96_v17 = vld [vmem:[%s1095_s0 + $0x2c0] sm:$0xff]  ;;  %v49_v19 = vld [vmem:[%s1095_s0 + $0x148] sm:$0xff] }
  0x1d   :  { %v248_v41 = vmax.f32 %v246_v30, %v247_v25  ;;  %v261_v42 = vmax.f32 %v259_v33, %v260_v26  ;;  %v274_v44 = vmax.f32 %v272_v39, %v273_v40  ;;  %v264_v51 = vsel %vm152_vm0, %v94_v32, -inf  ;;  %v65_v23 = vld [vmem:[%s1095_s0 + $0x1c8] sm:$0xff]  ;;  %v143_v26 = vld [vmem:[%s1095_s0 + $0x438] sm:$0xff]  ;;  %v128_v40 = vld [vmem:[%s1095_s0 + $0x3c0] sm:$0xff] }
  0x1e   :  { %v237_v48 = vmax.f32 %v235_v35, %v236_v28  ;;  %v277_v52 = vsel %vm152_vm0, %v63_v34, -inf  ;;  %v253_v54 = vsel %vm152_vm0, %v141_v36, -inf  ;;  %v266_v61 = vsel %vm152_vm0, %v110_v37, -inf  ;;  %v112_v28 = vld [vmem:[%s1095_s0 + $0x340] sm:$0xff]  ;;  %v81_v30 = vld [vmem:[%s1095_s0 + $0x248] sm:$0xff]  ;;  %v18_v36 = vld [vmem:[%s1095_s0 + $0x50] sm:$0xff] }
  0x1f   :  { %v250_v53 = vmax.f32 %v248_v41, %v249_v31  ;;  %v263_v55 = vmax.f32 %v261_v42, %v262_v38  ;;  %v276_v57 = vmax.f32 %v274_v44, %v275_v45  ;;  %v279_v62 = vsel %vm152_vm0, %v79_v43, -inf  ;;  %v34_v37 = vld [vmem:[%s1095_s0 + $0xd0] sm:$0xff] }
  0x20   :  { %429 = vst.msk [vmem:[%s1096_s1 + $0x20] sm:$0xff] %vm152_vm0, %v237_v48  ;;  %v289_v63 = vsel %vm152_vm0, %v16_v46, -inf  ;;  %v290_v0 = vsel %vm152_vm0, %v32_v47, -inf  ;;  %v268_v8 = vsel %vm152_vm0, %v126_v50, -inf  ;;  %v281_v9 = vsel %vm152_vm0, %v95_v56, -inf  ;;  %v50_v43 = vld [vmem:[%s1095_s0 + $0x150] sm:$0xff] }
  0x21   :  { %v252_v1 = vmax.f32 %v250_v53, %v251_v49  ;;  %v265_v2 = vmax.f32 %v263_v55, %v264_v51  ;;  %v278_v4 = vmax.f32 %v276_v57, %v277_v52  ;;  %v291_v6 = vmax.f32 %v289_v63, %v290_v0  ;;  %v97_v46 = vld [vmem:[%s1095_s0 + $0x2c8] sm:$0xff]  ;;  %v66_v49 = vld [vmem:[%s1095_s0 + $0x1d0] sm:$0xff]  ;;  %v144_v51 = vld [vmem:[%s1095_s0 + $0x440] sm:$0xff] }
  0x22   :  { %v292_v10 = vsel %vm152_vm0, %v48_v58, -inf  ;;  %v294_v11 = vsel %vm152_vm0, %v64_v59, -inf  ;;  %v270_v20 = vsel %vm152_vm0, %v142_v60, -inf  ;;  %v283_v21 = vsel %vm152_vm0, %v111_v3, -inf  ;;  %v113_v53 = vld [vmem:[%s1095_s0 + $0x348] sm:$0xff]  ;;  %v82_v58 = vld [vmem:[%s1095_s0 + $0x250] sm:$0xff] }
  0x23   :  { %v254_v13 = vmax.f32 %v252_v1, %v253_v54  ;;  %v267_v14 = vmax.f32 %v265_v2, %v266_v61  ;;  %v280_v16 = vmax.f32 %v278_v4, %v279_v62  ;;  %v293_v18 = vmax.f32 %v291_v6, %v292_v10  ;;  %v19_v61 = vld [vmem:[%s1095_s0 + $0x58] sm:$0xff] }
  0x24   :  { %v296_v22 = vsel %vm152_vm0, %v80_v5, -inf  ;;  %v306_v24 = vsel %vm152_vm0, %v17_v7, -inf  ;;  %v307_v31 = vsel %vm152_vm0, %v33_v12, -inf  ;;  %v285_v32 = vsel %vm152_vm0, %v127_v15, -inf  ;;  %v35_v62 = vld [vmem:[%s1095_s0 + $0xd8] sm:$0xff]  ;;  %v129_v5 = vld [vmem:[%s1095_s0 + $0x3c8] sm:$0xff] }
  0x25   :  { %430 = vst.msk [vmem:[%s1096_s1 + $0x28] sm:$0xff] %vm152_vm0, %v254_v13  ;;  %v269_v25 = vmax.f32 %v267_v14, %v268_v8  ;;  %v282_v27 = vmax.f32 %v280_v16, %v281_v9  ;;  %v295_v29 = vmax.f32 %v293_v18, %v294_v11  ;;  %v298_v33 = vsel %vm152_vm0, %v96_v17, -inf  ;;  %v51_v3 = vld [vmem:[%s1095_s0 + $0x158] sm:$0xff]  ;;  %v98_v8 = vld [vmem:[%s1095_s0 + $0x2d0] sm:$0xff]  ;;  %v145_v12 = vld [vmem:[%s1095_s0 + $0x448] sm:$0xff] }
  0x26   :  { %v308_v34 = vmax.f32 %v306_v24, %v307_v31  ;;  %v309_v35 = vsel %vm152_vm0, %v49_v19, -inf  ;;  %v311_v42 = vsel %vm152_vm0, %v65_v23, -inf  ;;  %v287_v44 = vsel %vm152_vm0, %v143_v26, -inf  ;;  %v67_v10 = vld [vmem:[%s1095_s0 + $0x1d8] sm:$0xff]  ;;  %v114_v13 = vld [vmem:[%s1095_s0 + $0x350] sm:$0xff]  ;;  %v36_v23 = vld [vmem:[%s1095_s0 + $0xe0] sm:$0xff] }
  0x27   :  { %v271_v38 = vmax.f32 %v269_v25, %v270_v20  ;;  %v284_v39 = vmax.f32 %v282_v27, %v283_v21  ;;  %v297_v41 = vmax.f32 %v295_v29, %v296_v22  ;;  %v300_v45 = vsel %vm152_vm0, %v112_v28, -inf  ;;  %v83_v19 = vld [vmem:[%s1095_s0 + $0x258] sm:$0xff]  ;;  %v20_v22 = vld [vmem:[%s1095_s0 + $0x60] sm:$0xff]  ;;  %v130_v26 = vld [vmem:[%s1095_s0 + $0x3d0] sm:$0xff] }
  0x28   :  { %v310_v47 = vmax.f32 %v308_v34, %v309_v35  ;;  %v313_v48 = vsel %vm152_vm0, %v81_v30, -inf  ;;  %v323_v54 = vsel %vm152_vm0, %v18_v36, -inf  ;;  %v324_v55 = vsel %vm152_vm0, %v34_v37, -inf  ;;  %v52_v34 = vld [vmem:[%s1095_s0 + $0x160] sm:$0xff]  ;;  %v146_v36 = vld [vmem:[%s1095_s0 + $0x450] sm:$0xff] }
  0x29   :  { %431 = vst.msk [vmem:[%s1096_s1 + $0x30] sm:$0xff] %vm152_vm0, %v271_v38  ;;  %v286_v50 = vmax.f32 %v284_v39, %v285_v32  ;;  %v299_v52 = vmax.f32 %v297_v41, %v298_v33  ;;  %v302_v56 = vsel %vm152_vm0, %v128_v40, -inf  ;;  %v325_v59 = vmax.f32 %v323_v54, %v324_v55  ;;  %v99_v32 = vld [vmem:[%s1095_s0 + $0x2d8] sm:$0xff]  ;;  %v68_v35 = vld [vmem:[%s1095_s0 + $0x1e0] sm:$0xff] }
  0x2a   :  { %v312_v57 = vmax.f32 %v310_v47, %v311_v42  ;;  %v326_v60 = vsel %vm152_vm0, %v50_v43, -inf  ;;  %v315_v1 = vsel %vm152_vm0, %v97_v46, -inf  ;;  %v328_v2 = vsel %vm152_vm0, %v66_v49, -inf  ;;  %v115_v43 = vld [vmem:[%s1095_s0 + $0x358] sm:$0xff]  ;;  %v21_v47 = vld [vmem:[%s1095_s0 + $0x68] sm:$0xff] }
  0x2b   :  { %v288_v63 = vmax.f32 %v286_v50, %v287_v44  ;;  %v301_v0 = vmax.f32 %v299_v52, %v300_v45  ;;  %v304_v4 = vsel %vm152_vm0, %v144_v51, -inf  ;;  %v317_v7 = vsel %vm152_vm0, %v113_v53, -inf  ;;  %v84_v45 = vld [vmem:[%s1095_s0 + $0x260] sm:$0xff]  ;;  %v37_v52 = vld [vmem:[%s1095_s0 + $0xe8] sm:$0xff]  ;;  %v131_v55 = vld [vmem:[%s1095_s0 + $0x3d8] sm:$0xff] }
  0x2c   :  { %v314_v6 = vmax.f32 %v312_v57, %v313_v48  ;;  %v327_v9 = vmax.f32 %v325_v59, %v326_v60  ;;  %v330_v14 = vsel %vm152_vm0, %v82_v58, -inf  ;;  %v340_v15 = vsel %vm152_vm0, %v19_v61, -inf  ;;  %v100_v57 = vld [vmem:[%s1095_s0 + $0x2e0] sm:$0xff]  ;;  %v53_v59 = vld [vmem:[%s1095_s0 + $0x168] sm:$0xff] }
  0x2d   :  { %432 = vst.msk [vmem:[%s1096_s1 + $0x38] sm:$0xff] %vm152_vm0, %v288_v63  ;;  %v303_v11 = vmax.f32 %v301_v0, %v302_v56  ;;  %v341_v16 = vsel %vm152_vm0, %v35_v62, -inf  ;;  %v343_v21 = vsel %vm152_vm0, %v51_v3, -inf  ;;  %v319_v25 = vsel %vm152_vm0, %v129_v5, -inf  ;;  %v69_v63 = vld [vmem:[%s1095_s0 + $0x1e8] sm:$0xff] }
  0x2e   :  { %v316_v17 = vmax.f32 %v314_v6, %v315_v1  ;;  %v329_v18 = vmax.f32 %v327_v9, %v328_v2  ;;  %v342_v20 = vmax.f32 %v340_v15, %v341_v16  ;;  %v332_v27 = vsel %vm152_vm0, %v98_v8, -inf  ;;  %v147_v2 = vld [vmem:[%s1095_s0 + $0x458] sm:$0xff]  ;;  %v85_v6 = vld [vmem:[%s1095_s0 + $0x268] sm:$0xff]  ;;  %v132_v16 = vld [vmem:[%s1095_s0 + $0x3e0] sm:$0xff] }
  0x2f   :  { %v305_v24 = vmax.f32 %v303_v11, %v304_v4  ;;  %v345_v28 = vsel %vm152_vm0, %v67_v10, -inf  ;;  %v321_v30 = vsel %vm152_vm0, %v145_v12, -inf  ;;  %v334_v37 = vsel %vm152_vm0, %v114_v13, -inf  ;;  %v116_v4 = vld [vmem:[%s1095_s0 + $0x360] sm:$0xff]  ;;  %v22_v12 = vld [vmem:[%s1095_s0 + $0x70] sm:$0xff] }
  0x30   :  { %v318_v29 = vmax.f32 %v316_v17, %v317_v7  ;;  %v331_v31 = vmax.f32 %v329_v18, %v330_v14  ;;  %v344_v33 = vmax.f32 %v342_v20, %v343_v21  ;;  %v347_v38 = vsel %vm152_vm0, %v83_v19, -inf  ;;  %v38_v13 = vld [vmem:[%s1095_s0 + $0xf0] sm:$0xff] }
  0x31   :  { %433 = vst.msk [vmem:[%s1096_s1 + $0x40] sm:$0xff] %vm152_vm0, %v305_v24  ;;  %v357_v39 = vsel %vm152_vm0, %v20_v22, -inf  ;;  %v358_v40 = vsel %vm152_vm0, %v36_v23, -inf  ;;  %v336_v48 = vsel %vm152_vm0, %v130_v26, -inf  ;;  %v349_v49 = vsel %vm152_vm0, %v99_v32, -inf  ;;  %v54_v19 = vld [vmem:[%s1095_s0 + $0x170] sm:$0xff] }
  0x32   :  { %v320_v41 = vmax.f32 %v318_v29, %v319_v25  ;;  %v333_v42 = vmax.f32 %v331_v31, %v332_v27  ;;  %v346_v44 = vmax.f32 %v344_v33, %v345_v28  ;;  %v359_v46 = vmax.f32 %v357_v39, %v358_v40  ;;  %v101_v22 = vld [vmem:[%s1095_s0 + $0x2e8] sm:$0xff]  ;;  %v70_v25 = vld [vmem:[%s1095_s0 + $0x1f0] sm:$0xff]  ;;  %v148_v27 = vld [vmem:[%s1095_s0 + $0x460] sm:$0xff] }
  0x33   :  { %v360_v50 = vsel %vm152_vm0, %v52_v34, -inf  ;;  %v362_v51 = vsel %vm152_vm0, %v68_v35, -inf  ;;  %v338_v60 = vsel %vm152_vm0, %v146_v36, -inf  ;;  %v351_v61 = vsel %vm152_vm0, %v115_v43, -inf  ;;  %v117_v29 = vld [vmem:[%s1095_s0 + $0x368] sm:$0xff]  ;;  %v86_v34 = vld [vmem:[%s1095_s0 + $0x270] sm:$0xff] }
  0x34   :  { %v322_v53 = vmax.f32 %v320_v41, %v321_v30  ;;  %v335_v54 = vmax.f32 %v333_v42, %v334_v37  ;;  %v348_v56 = vmax.f32 %v346_v44, %v347_v38  ;;  %v361_v58 = vmax.f32 %v359_v46, %v360_v50  ;;  %v23_v37 = vld [vmem:[%s1095_s0 + $0x78] sm:$0xff] }
  0x35   :  { %v364_v62 = vsel %vm152_vm0, %v84_v45, -inf  ;;  %v374_v0 = vsel %vm152_vm0, %v21_v47, -inf  ;;  %v375_v7 = vsel %vm152_vm0, %v37_v52, -inf  ;;  %v353_v8 = vsel %vm152_vm0, %v131_v55, -inf  ;;  %v39_v38 = vld [vmem:[%s1095_s0 + $0xf8] sm:$0xff]  ;;  %v133_v45 = vld [vmem:[%s1095_s0 + $0x3e8] sm:$0xff] }
  0x36   :  { %434 = vst.msk [vmem:[%s1096_s1 + $0x48] sm:$0xff] %vm152_vm0, %v322_v53  ;;  %v337_v1 = vmax.f32 %v335_v54, %v336_v48  ;;  %v350_v3 = vmax.f32 %v348_v56, %v349_v49  ;;  %v363_v5 = vmax.f32 %v361_v58, %v362_v51  ;;  %v366_v9 = vsel %vm152_vm0, %v100_v57, -inf  ;;  %v55_v43 = vld [vmem:[%s1095_s0 + $0x178] sm:$0xff]  ;;  %v102_v48 = vld [vmem:[%s1095_s0 + $0x2f0] sm:$0xff]  ;;  %v149_v55 = vld [vmem:[%s1095_s0 + $0x468] sm:$0xff] }
  0x37   :  { %v376_v10 = vmax.f32 %v374_v0, %v375_v7  ;;  %v377_v11 = vsel %vm152_vm0, %v53_v59, -inf  ;;  %v379_v18 = vsel %vm152_vm0, %v69_v63, -inf  ;;  %v355_v20 = vsel %vm152_vm0, %v147_v2, -inf  ;;  %v71_v50 = vld [vmem:[%s1095_s0 + $0x1f8] sm:$0xff]  ;;  %v118_v57 = vld [vmem:[%s1095_s0 + $0x370] sm:$0xff] }
  0x38   :  { %v339_v14 = vmax.f32 %v337_v1, %v338_v60  ;;  %v352_v15 = vmax.f32 %v350_v3, %v351_v61  ;;  %v365_v17 = vmax.f32 %v363_v5, %v364_v62  ;;  %v368_v21 = vsel %vm152_vm0, %v116_v4, -inf  ;;  %v87_v59 = vld [vmem:[%s1095_s0 + $0x278] sm:$0xff]  ;;  %v134_v3 = vld [vmem:[%s1095_s0 + $0x3f0] sm:$0xff] }
  0x39   :  { %v378_v23 = vmax.f32 %v376_v10, %v377_v11  ;;  %v381_v24 = vsel %vm152_vm0, %v85_v6, -inf  ;;  %v391_v30 = vsel %vm152_vm0, %v22_v12, -inf  ;;  %v392_v31 = vsel %vm152_vm0, %v38_v13, -inf  ;;  %v103_v5 = vld [vmem:[%s1095_s0 + $0x2f8] sm:$0xff]  ;;  %v150_v11 = vld [vmem:[%s1095_s0 + $0x470] sm:$0xff] }
  0x3a   :  { %435 = vst.msk [vmem:[%s1096_s1 + $0x50] sm:$0xff] %vm152_vm0, %v339_v14  ;;  %v354_v26 = vmax.f32 %v352_v15, %v353_v8  ;;  %v367_v28 = vmax.f32 %v365_v17, %v366_v9  ;;  %v370_v32 = vsel %vm152_vm0, %v132_v16, -inf  ;;  %v393_v35 = vmax.f32 %v391_v30, %v392_v31  ;;  %v119_v13 = vld [vmem:[%s1095_s0 + $0x378] sm:$0xff] }
  0x3b   :  { %v380_v33 = vmax.f32 %v378_v23, %v379_v18  ;;  %v394_v36 = vsel %vm152_vm0, %v54_v19, -inf  ;;  %v383_v41 = vsel %vm152_vm0, %v101_v22, -inf  ;;  %v396_v42 = vsel %vm152_vm0, %v70_v25, -inf  ;;  %v135_v19 = vld [vmem:[%s1095_s0 + $0x3f8] sm:$0xff] }
  0x3c   :  { %v356_v39 = vmax.f32 %v354_v26, %v355_v20  ;;  %v369_v40 = vmax.f32 %v367_v28, %v368_v21  ;;  %v372_v44 = vsel %vm152_vm0, %v148_v27, -inf  ;;  %v385_v47 = vsel %vm152_vm0, %v117_v29, -inf }
  0x3d   :  { %v382_v46 = vmax.f32 %v380_v33, %v381_v24  ;;  %v395_v49 = vmax.f32 %v393_v35, %v394_v36  ;;  %v398_v52 = vsel %vm152_vm0, %v86_v34, -inf  ;;  %v408_v53 = vsel %vm152_vm0, %v23_v37, -inf  ;;  %v151_v24 = vld [vmem:[%s1095_s0 + $0x478] sm:$0xff] }
  0x3e   :  { %436 = vst.msk [vmem:[%s1096_s1 + $0x58] sm:$0xff] %vm152_vm0, %v356_v39  ;;  %v371_v51 = vmax.f32 %v369_v40, %v370_v32  ;;  %v409_v54 = vsel %vm152_vm0, %v39_v38, -inf  ;;  %v411_v61 = vsel %vm152_vm0, %v55_v43, -inf  ;;  %v387_v63 = vsel %vm152_vm0, %v133_v45, -inf }
  0x3f   :  { %v384_v56 = vmax.f32 %v382_v46, %v383_v41  ;;  %v397_v58 = vmax.f32 %v395_v49, %v396_v42  ;;  %v410_v60 = vmax.f32 %v408_v53, %v409_v54  ;;  %v400_v0 = vsel %vm152_vm0, %v102_v48, -inf }
  0x40   :  { %v373_v62 = vmax.f32 %v371_v51, %v372_v44  ;;  %v413_v1 = vsel %vm152_vm0, %v71_v50, -inf  ;;  %v389_v7 = vsel %vm152_vm0, %v149_v55, -inf  ;;  %v402_v8 = vsel %vm152_vm0, %v118_v57, -inf }
  0x41   :  { %v386_v2 = vmax.f32 %v384_v56, %v385_v47  ;;  %v399_v4 = vmax.f32 %v397_v58, %v398_v52  ;;  %v412_v6 = vmax.f32 %v410_v60, %v411_v61  ;;  %v415_v9 = vsel %vm152_vm0, %v87_v59, -inf }
  0x42   :  { %437 = vst.msk [vmem:[%s1096_s1 + $0x60] sm:$0xff] %vm152_vm0, %v373_v62  ;;  %v404_v15 = vsel %vm152_vm0, %v134_v3, -inf  ;;  %v417_v16 = vsel %vm152_vm0, %v103_v5, -inf  ;;  %v406_v21 = vsel %vm152_vm0, %v150_v11, -inf  ;;  %v419_v22 = vsel %vm152_vm0, %v119_v13, -inf }
  0x43   :  { %v388_v10 = vmax.f32 %v386_v2, %v387_v63  ;;  %v401_v12 = vmax.f32 %v399_v4, %v400_v0  ;;  %v414_v14 = vmax.f32 %v412_v6, %v413_v1  ;;  %v421_v26 = vsel %vm152_vm0, %v135_v19, -inf }
  0x44   :  { %v423_v29 = vsel %vm152_vm0, %v151_v24, -inf }
  0x45   :  { %v390_v17 = vmax.f32 %v388_v10, %v389_v7  ;;  %v403_v18 = vmax.f32 %v401_v12, %v402_v8  ;;  %v416_v20 = vmax.f32 %v414_v14, %v415_v9 }
  0x47   :  { %438 = vst.msk [vmem:[%s1096_s1 + $0x68] sm:$0xff] %vm152_vm0, %v390_v17  ;;  %v405_v23 = vmax.f32 %v403_v18, %v404_v15  ;;  %v418_v25 = vmax.f32 %v416_v20, %v417_v16 }
  0x49   :  { %v407_v27 = vmax.f32 %v405_v23, %v406_v21  ;;  %v420_v28 = vmax.f32 %v418_v25, %v419_v22 }
  0x4b   :  { %439 = vst.msk [vmem:[%s1096_s1 + $0x70] sm:$0xff] %vm152_vm0, %v407_v27  ;;  %v422_v30 = vmax.f32 %v420_v28, %v421_v26 }
  0x4d   :  { %v424_v31 = vmax.f32 %v422_v30, %v423_v29 }
  0x4f   :  { %440 = vst.msk [vmem:[%s1096_s1 + $0x78] sm:$0xff] %vm152_vm0, %v424_v31 }

</bundles_post_ra>
